<compile_context>
chip_gen: v6e
topology: v6e:2x2x1
jax: 0.10.0
libtpu: 0.0.40
codegen_flags: <defaults>
</compile_context>

<pallas_src>
import math

import jax
import jax.numpy as jnp
from jax.experimental import pallas as pl
from jax.experimental.pallas import tpu as pltpu


GATE = 128  # lane-aligned gate width used by both LSTMs


# ----------------------------------------------------------------------------
# Kernel
# ----------------------------------------------------------------------------
def _gate_act(tg, c, G):
    """tg = tanh(pre-scaled gates). i/f/o columns hold tanh(z/2) == 2*sigmoid(z)-1."""
    i = 0.5 * (tg[:, 0 * G:1 * G] + 1.0)
    f = 0.5 * (tg[:, 1 * G:2 * G] + 1.0)
    g = tg[:, 2 * G:3 * G]
    o = 0.5 * (tg[:, 3 * G:4 * G] + 1.0)
    c_new = f * c + i * g
    h_new = o * jnp.tanh(c_new)
    return h_new, c_new


def lstm_tagger_fused_kernel(lens_ref, cx_ref, wx_ref,
                             cw_ih_ref, cw_hh_ref, cb_ref,
                             mw_word_ref, mw_char_ref, mw_hh_ref, mb_ref,
                             fc_w_ref, fc_b_ref, out_ref):
    """Fused: batched char LSTM -> main LSTM -> FC head. No grid, all in VMEM.

    cx_ref:  (L_max, T, Dc)  char embeddings, timestep-major so cx_ref[t] is a plane
    wx_ref:  (T, n_dim)      word embeddings
    lens_ref:(T, 1) int32    per-word char counts
    out_ref: (T, 128)        lane-dense FC scores (sliced back in the wrapper)
    """
    L_max, T, _ = cx_ref.shape
    G = GATE
    wd = cw_ih_ref.dtype           # weight dtype (f32; bf16 optional on v6e/v7x)

    # Weights loaded once into values.
    cw_ih = cw_ih_ref[...]
    cw_hh = cw_hh_ref[...]
    cb = cb_ref[...].astype(jnp.float32)
    lens = lens_ref[...]           # (T, 1) int32, lives in a vreg

    # ---- batched char LSTM over all words at once -------------------------
    # Hoisted input projection + bias: tiny MXU matmuls, all off the serial chain.
    cxg = [jnp.dot(cx_ref[t].astype(wd), cw_ih,
                   preferred_element_type=jnp.float32) + cb
           for t in range(L_max)]                       # L_max x (T, 4G)

    h_c = jnp.zeros((T, G), jnp.float32)
    c_c = jnp.zeros((T, G), jnp.float32)
    for t in range(L_max):                              # fully unrolled recurrence
        gates = cxg[t] + jnp.dot(h_c.astype(wd), cw_hh,
                                 preferred_element_type=jnp.float32)
        tg = jnp.tanh(gates)                            # ONE EUP op for all 4 gates
        h_new, c_new = _gate_act(tg, c_c, G)
        valid = lens > t                                # (T, 1) VALU compare, t static
        h_c = jnp.where(valid, h_new, h_c)
        c_c = jnp.where(valid, c_new, c_c)
    # h_c: (T, G) final char hidden; lanes >= char_hidden stay exactly zero.

    # ---- main LSTM: concat folded into a split input projection ------------
    mw_hh = mw_hh_ref[...]
    mb = mb_ref[...].astype(jnp.float32)
    xg_m = (jnp.dot(wx_ref[...].astype(wd), mw_word_ref[...],
                    preferred_element_type=jnp.float32)
            + jnp.dot(h_c.astype(wd), mw_char_ref[...],
                      preferred_element_type=jnp.float32)
            + mb)                                       # (T, 4H), hoisted

    H = mw_hh.shape[0]
    h = jnp.zeros((1, H), jnp.float32)
    c = jnp.zeros((1, H), jnp.float32)
    hs = []
    for t in range(T):                                  # unrolled; h/c stay in vregs
        gates = xg_m[t:t + 1, :] + jnp.dot(h.astype(wd), mw_hh,
                                           preferred_element_type=jnp.float32)
        tg = jnp.tanh(gates)
        h, c = _gate_act(tg, c, H)
        hs.append(h)
    h_all = jnp.concatenate(hs, axis=0)                 # (T, H), never hits scratch

    # ---- fused FC head: lane-dense (T, 128) unmasked store -----------------
    out_ref[...] = (jnp.dot(h_all.astype(wd), fc_w_ref[...],
                            preferred_element_type=jnp.float32)
                    + fc_b_ref[...].astype(jnp.float32))


def lstm_tagger_forward(lens, cx, wx, char_params, main_params, fc_w, fc_b):
    """Single fused pallas_call for the whole forward pass."""
    T = wx.shape[0]
    n_pad = fc_w.shape[1]
    n_in = 3 + len(char_params) + len(main_params) + 2
    return pl.pallas_call(
        lstm_tagger_fused_kernel,
        out_shape=jax.ShapeDtypeStruct((T, n_pad), jnp.float32),
        in_specs=[pl.BlockSpec(memory_space=pltpu.MemorySpace.VMEM)] * n_in,
        out_specs=pl.BlockSpec(memory_space=pltpu.MemorySpace.VMEM),
    )(lens, cx, wx, *char_params, *main_params, fc_w, fc_b)
    # TODO(synk): if T/H are ever scaled up, add a time-blocked grid sized against
    # scoped VMEM (32 MiB v6e/v7x, 16 MiB v5e; v7x physical VMEM is only 64 MiB).


# ----------------------------------------------------------------------------
# Parameter construction (torch-style init, gate-padded & pre-scaled layout)
# ----------------------------------------------------------------------------
def _uniform(key, shape, k):
    return jax.random.uniform(key, shape, jnp.float32, minval=-k, maxval=k)


def _raw_lstm_params(key, d_in, hidden):
    """torch.nn.LSTM-style params, already transposed for x @ W layout."""
    k = 1.0 / math.sqrt(hidden)
    k0, k1, k2, k3 = jax.random.split(key, 4)
    w_ih = _uniform(k0, (d_in, 4 * hidden), k)
    w_hh = _uniform(k1, (hidden, 4 * hidden), k)
    b = _uniform(k2, (1, 4 * hidden), k) + _uniform(k3, (1, 4 * hidden), k)
    return w_ih, w_hh, b


def _pad_gate_cols(w, hidden, gate_pad):
    """(rows, 4*hidden) -> (rows, 4*gate_pad): each gate block zero-padded in lanes."""
    out = jnp.zeros((w.shape[0], 4 * gate_pad), w.dtype)
    for g in range(4):
        out = out.at[:, g * gate_pad:g * gate_pad + hidden].set(
            w[:, g * hidden:(g + 1) * hidden])
    return out


def _pad_rows(w, row_pad):
    return jnp.zeros((row_pad, w.shape[1]), w.dtype).at[:w.shape[0], :].set(w)


def _prescale_ifo(w, gate):
    """Pre-scale i/f/o gate columns by 0.5 so sigmoid(z)=0.5*(1+tanh(z/2))."""
    s = jnp.concatenate([jnp.full((gate,), 0.5, jnp.float32),
                         jnp.full((gate,), 0.5, jnp.float32),
                         jnp.ones((gate,), jnp.float32),
                         jnp.full((gate,), 0.5, jnp.float32)])
    return w * s


class LSTMTaggerPallas:
    GATE = GATE   # lane-aligned gate width
    LANE = 128    # lane-dense padding for the FC output

    def __init__(self, key, n_word, n_dim, n_hidden, n_char, char_dim,
                 char_hidden, n_tag, param_dtype=jnp.float32):
        # param_dtype=jnp.bfloat16 halves weight DMA on v6e/v7x (gate/EUP math stays f32).
        assert n_hidden == self.GATE, "main LSTM sized to one 128-lane gate block"
        assert char_hidden <= self.GATE
        ks = jax.random.split(key, 5)
        self.n_tag = n_tag
        G = self.GATE

        # embeddings ~ N(0,1) like torch.nn.Embedding
        self.word_emb = jax.random.normal(ks[0], (n_word, n_dim), jnp.float32)
        self.char_emb = jax.random.normal(ks[1], (n_char, char_dim), jnp.float32)

        # raw torch-layout params (kept for the pure-JAX reference check)
        self.raw_char = _raw_lstm_params(ks[2], char_dim, char_hidden)
        self.raw_main = _raw_lstm_params(ks[3], n_dim + char_hidden, n_hidden)
        kf = 1.0 / math.sqrt(n_hidden)
        kw, kb = jax.random.split(ks[4])
        self.raw_fc_w = _uniform(kw, (n_hidden, n_tag), kf)
        self.raw_fc_b = _uniform(kb, (1, n_tag), kf)

        to = lambda a: a.astype(param_dtype)
        # char LSTM: gates padded to 128 lanes, W_hh rows padded, i/f/o pre-scaled
        cw_ih, cw_hh, cb = self.raw_char
        self.cw_ih = to(_prescale_ifo(_pad_gate_cols(cw_ih, char_hidden, G), G))
        self.cw_hh = to(_prescale_ifo(
            _pad_rows(_pad_gate_cols(cw_hh, char_hidden, G), G), G))
        self.cb = to(_prescale_ifo(_pad_gate_cols(cb, char_hidden, G), G))

        # main LSTM: W_ih split into word rows + (row-zero-padded) char rows
        mw_ih, mw_hh, mb = self.raw_main
        self.mw_word = to(_prescale_ifo(mw_ih[:n_dim], n_hidden))
        self.mw_char = to(_prescale_ifo(_pad_rows(mw_ih[n_dim:], G), n_hidden))
        self.mw_hh = to(_prescale_ifo(mw_hh, n_hidden))
        self.mb = to(_prescale_ifo(mb, n_hidden))

        # FC head, zero-padded to a lane-dense 128-wide output (sliced in __call__)
        n_pad = max(self.LANE, n_tag)
        self.fc_w = to(jnp.zeros((n_hidden, n_pad), jnp.float32)
                       .at[:, :n_tag].set(self.raw_fc_w))
        self.fc_b = to(jnp.zeros((1, n_pad), jnp.float32)
                       .at[:, :n_tag].set(self.raw_fc_b))

    def __call__(self, word_ids, char_ids_padded, char_lens):
        # Embedding gathers stay as plain JAX glue (data-dependent lookups).
        # char_x is laid out (L_max, T, Dc) so each timestep is one plane.
        cx = jnp.take(self.char_emb, char_ids_padded.T, axis=0)   # (L_max, T, Dc)
        wx = jnp.take(self.word_emb, word_ids, axis=0)            # (T, n_dim)
        lens = char_lens.reshape(-1, 1).astype(jnp.int32)         # (T, 1)
        out = lstm_tagger_forward(
            lens, cx, wx,
            (self.cw_ih, self.cw_hh, self.cb),
            (self.mw_word, self.mw_char, self.mw_hh, self.mb),
            self.fc_w, self.fc_b)
        return out[:, :self.n_tag]                                # (T, n_tag)


# ----------------------------------------------------------------------------
# Pure-JAX reference (torch semantics) for numerical parity checking
# ----------------------------------------------------------------------------
def _lstm_ref(x, w_ih, w_hh, b):
    """torch.nn.LSTM (single layer) over x: (L, D) -> hidden states (L, H)."""
    H = w_hh.shape[0]
    h = jnp.zeros((1, H), jnp.float32)
    c = jnp.zeros((1, H), jnp.float32)
    hs = []
    for t in range(x.shape[0]):
        g = (jnp.dot(x[t:t + 1], w_ih, precision="highest")
             + jnp.dot(h, w_hh, precision="highest") + b)
        i = jax.nn.sigmoid(g[:, :H])
        f = jax.nn.sigmoid(g[:, H:2 * H])
        gg = jnp.tanh(g[:, 2 * H:3 * H])
        o = jax.nn.sigmoid(g[:, 3 * H:])
        c = f * c + i * gg
        h = o * jnp.tanh(c)
        hs.append(h)
    return jnp.concatenate(hs, axis=0)


def reference_forward(model, word_ids, words_char_ids):
    feats = []
    for ids in words_char_ids:
        cemb = jnp.take(model.char_emb, jnp.array(ids, jnp.int32), axis=0)
        feats.append(_lstm_ref(cemb, *model.raw_char)[-1:])
    char_feat = jnp.concatenate(feats, axis=0)
    x = jnp.concatenate([jnp.take(model.word_emb, word_ids, axis=0), char_feat], axis=1)
    h = _lstm_ref(x, *model.raw_main)
    return jnp.dot(h, model.raw_fc_w, precision="highest") + model.raw_fc_b


# ----------------------------------------------------------------------------
# Demo driver
# ----------------------------------------------------------------------------
def make_sequence(tokens, dic):
    return jnp.array([dic[t] for t in tokens], dtype=jnp.int32)


if __name__ == "__main__":
    sentence = "Everybody ate the apple".split()

    word2id = {}
    for w in sentence:
        word2id.setdefault(w, len(word2id))
    character2id = {}
    for w in sentence:
        for ch in w.lower():
            character2id.setdefault(ch, len(character2id))
    tag2id = {"DET": 0, "NN": 1, "V": 2, "X": 3}

    # small, self-consistent hyperparameters (H=128 keeps gate slices lane-aligned)
    n_word, n_dim, n_hidden = len(word2id), 32, 128
    n_char, char_dim, char_hidden = len(character2id), 8, 16
    n_tag = len(tag2id)

    key = jax.random.PRNGKey(0)
    model = LSTMTaggerPallas(key, n_word, n_dim, n_hidden, n_char,
                             char_dim, char_hidden, n_tag)

    word_ids = make_sequence(sentence, word2id)                        # (T,)

    words_char_ids = [[character2id[c.lower()] for c in w] for w in sentence]
    L_max = max(len(ids) for ids in words_char_ids)
    char_ids_padded = jnp.array(
        [ids + [0] * (L_max - len(ids)) for ids in words_char_ids],
        dtype=jnp.int32)                                               # (T, L_max)
    char_lens = jnp.array([len(ids) for ids in words_char_ids], jnp.int32)  # (T,)

    out = model(word_ids, char_ids_padded, char_lens)                  # (T, n_tag)
    out = jax.block_until_ready(out)
    assert out.shape == (len(sentence), n_tag)
    assert bool(jnp.all(jnp.isfinite(out)))

    # numerical parity vs. the plain-JAX torch-semantics reference
    ref = reference_forward(model, word_ids, words_char_ids)
    err = float(jnp.max(jnp.abs(out - ref)))
    assert err < 2e-3, f"max |pallas - ref| = {err}"

    print("KERNEL_OK")
</pallas_src>

<mosaic_0001>
module attributes {stable_mosaic.version = 11 : i64} {
  func.func @lstm_tagger_fused_kernel(%arg0: memref<4x1xi32, #tpu.memory_space<vmem>>, %arg1: memref<9x4x8xf32, #tpu.memory_space<vmem>>, %arg2: memref<4x32xf32, #tpu.memory_space<vmem>>, %arg3: memref<8x512xf32, #tpu.memory_space<vmem>>, %arg4: memref<128x512xf32, #tpu.memory_space<vmem>>, %arg5: memref<1x512xf32, #tpu.memory_space<vmem>>, %arg6: memref<32x512xf32, #tpu.memory_space<vmem>>, %arg7: memref<128x512xf32, #tpu.memory_space<vmem>>, %arg8: memref<128x512xf32, #tpu.memory_space<vmem>>, %arg9: memref<1x512xf32, #tpu.memory_space<vmem>>, %arg10: memref<128x128xf32, #tpu.memory_space<vmem>>, %arg11: memref<1x128xf32, #tpu.memory_space<vmem>>, %arg12: memref<4x128xf32, #tpu.memory_space<vmem>>) attributes {dimension_semantics = [], scalar_prefetch = 0 : i64, scratch_operands = 0 : i64, tpu.core_type = #tpu.core_type<tc>} {
    %c0 = arith.constant 0 : index
    %c0_0 = arith.constant 0 : index
    %0 = vector.load %arg3[%c0, %c0_0] : memref<8x512xf32, #tpu.memory_space<vmem>>, vector<8x512xf32>
    %c0_1 = arith.constant 0 : index
    %c0_2 = arith.constant 0 : index
    %1 = vector.load %arg4[%c0_1, %c0_2] : memref<128x512xf32, #tpu.memory_space<vmem>>, vector<128x512xf32>
    %c0_3 = arith.constant 0 : index
    %c0_4 = arith.constant 0 : index
    %2 = vector.load %arg5[%c0_3, %c0_4] : memref<1x512xf32, #tpu.memory_space<vmem>>, vector<1x512xf32>
    %c0_5 = arith.constant 0 : index
    %c0_6 = arith.constant 0 : index
    %3 = vector.load %arg0[%c0_5, %c0_6] : memref<4x1xi32, #tpu.memory_space<vmem>>, vector<4x1xi32>
    %c0_7 = arith.constant 0 : index
    %c0_8 = arith.constant 0 : index
    %c0_9 = arith.constant 0 : index
    %4 = vector.load %arg1[%c0_7, %c0_8, %c0_9] : memref<9x4x8xf32, #tpu.memory_space<vmem>>, vector<1x4x8xf32>
    %5 = vector.shape_cast %4 : vector<1x4x8xf32> to vector<4x8xf32>
    %cst = arith.constant dense<0.000000e+00> : vector<4x512xf32>
    %6 = tpu.matmul %5, %0, %cst {dimension_numbers = #tpu.dot_dimension_numbers<[1], [0], [0], [1], [0, 0, 1, 1], [], []>} : vector<4x8xf32>, vector<8x512xf32>, vector<4x512xf32> -> vector<4x512xf32>
    %7 = vector.broadcast %2 : vector<1x512xf32> to vector<4x512xf32>
    %8 = arith.addf %6, %7 : vector<4x512xf32>
    %c1 = arith.constant 1 : index
    %c0_10 = arith.constant 0 : index
    %c0_11 = arith.constant 0 : index
    %9 = vector.load %arg1[%c1, %c0_10, %c0_11] : memref<9x4x8xf32, #tpu.memory_space<vmem>>, vector<1x4x8xf32>
    %10 = vector.shape_cast %9 : vector<1x4x8xf32> to vector<4x8xf32>
    %cst_12 = arith.constant dense<0.000000e+00> : vector<4x512xf32>
    %11 = tpu.matmul %10, %0, %cst_12 {dimension_numbers = #tpu.dot_dimension_numbers<[1], [0], [0], [1], [0, 0, 1, 1], [], []>} : vector<4x8xf32>, vector<8x512xf32>, vector<4x512xf32> -> vector<4x512xf32>
    %12 = vector.broadcast %2 : vector<1x512xf32> to vector<4x512xf32>
    %13 = arith.addf %11, %12 : vector<4x512xf32>
    %c2 = arith.constant 2 : index
    %c0_13 = arith.constant 0 : index
    %c0_14 = arith.constant 0 : index
    %14 = vector.load %arg1[%c2, %c0_13, %c0_14] : memref<9x4x8xf32, #tpu.memory_space<vmem>>, vector<1x4x8xf32>
    %15 = vector.shape_cast %14 : vector<1x4x8xf32> to vector<4x8xf32>
    %cst_15 = arith.constant dense<0.000000e+00> : vector<4x512xf32>
    %16 = tpu.matmul %15, %0, %cst_15 {dimension_numbers = #tpu.dot_dimension_numbers<[1], [0], [0], [1], [0, 0, 1, 1], [], []>} : vector<4x8xf32>, vector<8x512xf32>, vector<4x512xf32> -> vector<4x512xf32>
    %17 = vector.broadcast %2 : vector<1x512xf32> to vector<4x512xf32>
    %18 = arith.addf %16, %17 : vector<4x512xf32>
    %c3 = arith.constant 3 : index
    %c0_16 = arith.constant 0 : index
    %c0_17 = arith.constant 0 : index
    %19 = vector.load %arg1[%c3, %c0_16, %c0_17] : memref<9x4x8xf32, #tpu.memory_space<vmem>>, vector<1x4x8xf32>
    %20 = vector.shape_cast %19 : vector<1x4x8xf32> to vector<4x8xf32>
    %cst_18 = arith.constant dense<0.000000e+00> : vector<4x512xf32>
    %21 = tpu.matmul %20, %0, %cst_18 {dimension_numbers = #tpu.dot_dimension_numbers<[1], [0], [0], [1], [0, 0, 1, 1], [], []>} : vector<4x8xf32>, vector<8x512xf32>, vector<4x512xf32> -> vector<4x512xf32>
    %22 = vector.broadcast %2 : vector<1x512xf32> to vector<4x512xf32>
    %23 = arith.addf %21, %22 : vector<4x512xf32>
    %c4 = arith.constant 4 : index
    %c0_19 = arith.constant 0 : index
    %c0_20 = arith.constant 0 : index
    %24 = vector.load %arg1[%c4, %c0_19, %c0_20] : memref<9x4x8xf32, #tpu.memory_space<vmem>>, vector<1x4x8xf32>
    %25 = vector.shape_cast %24 : vector<1x4x8xf32> to vector<4x8xf32>
    %cst_21 = arith.constant dense<0.000000e+00> : vector<4x512xf32>
    %26 = tpu.matmul %25, %0, %cst_21 {dimension_numbers = #tpu.dot_dimension_numbers<[1], [0], [0], [1], [0, 0, 1, 1], [], []>} : vector<4x8xf32>, vector<8x512xf32>, vector<4x512xf32> -> vector<4x512xf32>
    %27 = vector.broadcast %2 : vector<1x512xf32> to vector<4x512xf32>
    %28 = arith.addf %26, %27 : vector<4x512xf32>
    %c5 = arith.constant 5 : index
    %c0_22 = arith.constant 0 : index
    %c0_23 = arith.constant 0 : index
    %29 = vector.load %arg1[%c5, %c0_22, %c0_23] : memref<9x4x8xf32, #tpu.memory_space<vmem>>, vector<1x4x8xf32>
    %30 = vector.shape_cast %29 : vector<1x4x8xf32> to vector<4x8xf32>
    %cst_24 = arith.constant dense<0.000000e+00> : vector<4x512xf32>
    %31 = tpu.matmul %30, %0, %cst_24 {dimension_numbers = #tpu.dot_dimension_numbers<[1], [0], [0], [1], [0, 0, 1, 1], [], []>} : vector<4x8xf32>, vector<8x512xf32>, vector<4x512xf32> -> vector<4x512xf32>
    %32 = vector.broadcast %2 : vector<1x512xf32> to vector<4x512xf32>
    %33 = arith.addf %31, %32 : vector<4x512xf32>
    %c6 = arith.constant 6 : index
    %c0_25 = arith.constant 0 : index
    %c0_26 = arith.constant 0 : index
    %34 = vector.load %arg1[%c6, %c0_25, %c0_26] : memref<9x4x8xf32, #tpu.memory_space<vmem>>, vector<1x4x8xf32>
    %35 = vector.shape_cast %34 : vector<1x4x8xf32> to vector<4x8xf32>
    %cst_27 = arith.constant dense<0.000000e+00> : vector<4x512xf32>
    %36 = tpu.matmul %35, %0, %cst_27 {dimension_numbers = #tpu.dot_dimension_numbers<[1], [0], [0], [1], [0, 0, 1, 1], [], []>} : vector<4x8xf32>, vector<8x512xf32>, vector<4x512xf32> -> vector<4x512xf32>
    %37 = vector.broadcast %2 : vector<1x512xf32> to vector<4x512xf32>
    %38 = arith.addf %36, %37 : vector<4x512xf32>
    %c7 = arith.constant 7 : index
    %c0_28 = arith.constant 0 : index
    %c0_29 = arith.constant 0 : index
    %39 = vector.load %arg1[%c7, %c0_28, %c0_29] : memref<9x4x8xf32, #tpu.memory_space<vmem>>, vector<1x4x8xf32>
    %40 = vector.shape_cast %39 : vector<1x4x8xf32> to vector<4x8xf32>
    %cst_30 = arith.constant dense<0.000000e+00> : vector<4x512xf32>
    %41 = tpu.matmul %40, %0, %cst_30 {dimension_numbers = #tpu.dot_dimension_numbers<[1], [0], [0], [1], [0, 0, 1, 1], [], []>} : vector<4x8xf32>, vector<8x512xf32>, vector<4x512xf32> -> vector<4x512xf32>
    %42 = vector.broadcast %2 : vector<1x512xf32> to vector<4x512xf32>
    %43 = arith.addf %41, %42 : vector<4x512xf32>
    %c8 = arith.constant 8 : index
    %c0_31 = arith.constant 0 : index
    %c0_32 = arith.constant 0 : index
    %44 = vector.load %arg1[%c8, %c0_31, %c0_32] : memref<9x4x8xf32, #tpu.memory_space<vmem>>, vector<1x4x8xf32>
    %45 = vector.shape_cast %44 : vector<1x4x8xf32> to vector<4x8xf32>
    %cst_33 = arith.constant dense<0.000000e+00> : vector<4x512xf32>
    %46 = tpu.matmul %45, %0, %cst_33 {dimension_numbers = #tpu.dot_dimension_numbers<[1], [0], [0], [1], [0, 0, 1, 1], [], []>} : vector<4x8xf32>, vector<8x512xf32>, vector<4x512xf32> -> vector<4x512xf32>
    %47 = vector.broadcast %2 : vector<1x512xf32> to vector<4x512xf32>
    %48 = arith.addf %46, %47 : vector<4x512xf32>
    %cst_34 = arith.constant 0.000000e+00 : f32
    %49 = vector.broadcast %cst_34 : f32 to vector<4x128xf32>
    %cst_35 = arith.constant 0.000000e+00 : f32
    %50 = vector.broadcast %cst_35 : f32 to vector<4x128xf32>
    %cst_36 = arith.constant dense<0.000000e+00> : vector<4x512xf32>
    %51 = tpu.matmul %49, %1, %cst_36 {dimension_numbers = #tpu.dot_dimension_numbers<[1], [0], [0], [1], [0, 0, 1, 1], [], []>} : vector<4x128xf32>, vector<128x512xf32>, vector<4x512xf32> -> vector<4x512xf32>
    %52 = arith.addf %8, %51 : vector<4x512xf32>
    %53 = math.tanh %52 : vector<4x512xf32>
    %54 = vector.extract_strided_slice %53 {offsets = [0, 0], sizes = [4, 128], strides = [1, 1]} : vector<4x512xf32> to vector<4x128xf32>
    %cst_37 = arith.constant 1.000000e+00 : f32
    %55 = vector.broadcast %cst_37 : f32 to vector<4x128xf32>
    %56 = arith.addf %54, %55 : vector<4x128xf32>
    %cst_38 = arith.constant 5.000000e-01 : f32
    %57 = vector.broadcast %cst_38 : f32 to vector<4x128xf32>
    %58 = arith.mulf %57, %56 : vector<4x128xf32>
    %59 = vector.extract_strided_slice %53 {offsets = [0, 128], sizes = [4, 128], strides = [1, 1]} : vector<4x512xf32> to vector<4x128xf32>
    %cst_39 = arith.constant 1.000000e+00 : f32
    %60 = vector.broadcast %cst_39 : f32 to vector<4x128xf32>
    %61 = arith.addf %59, %60 : vector<4x128xf32>
    %cst_40 = arith.constant 5.000000e-01 : f32
    %62 = vector.broadcast %cst_40 : f32 to vector<4x128xf32>
    %63 = arith.mulf %62, %61 : vector<4x128xf32>
    %64 = vector.extract_strided_slice %53 {offsets = [0, 256], sizes = [4, 128], strides = [1, 1]} : vector<4x512xf32> to vector<4x128xf32>
    %65 = vector.extract_strided_slice %53 {offsets = [0, 384], sizes = [4, 128], strides = [1, 1]} : vector<4x512xf32> to vector<4x128xf32>
    %cst_41 = arith.constant 1.000000e+00 : f32
    %66 = vector.broadcast %cst_41 : f32 to vector<4x128xf32>
    %67 = arith.addf %65, %66 : vector<4x128xf32>
    %cst_42 = arith.constant 5.000000e-01 : f32
    %68 = vector.broadcast %cst_42 : f32 to vector<4x128xf32>
    %69 = arith.mulf %68, %67 : vector<4x128xf32>
    %70 = arith.mulf %63, %50 : vector<4x128xf32>
    %71 = arith.mulf %58, %64 : vector<4x128xf32>
    %72 = arith.addf %70, %71 : vector<4x128xf32>
    %73 = math.tanh %72 : vector<4x128xf32>
    %74 = arith.mulf %69, %73 : vector<4x128xf32>
    %c0_i32 = arith.constant 0 : i32
    %75 = vector.broadcast %c0_i32 : i32 to vector<4x1xi32>
    %76 = arith.cmpi sgt, %3, %75 : vector<4x1xi32>
    %77 = vector.shape_cast %76 : vector<4x1xi1> to vector<4x1xi1>
    %78 = vector.broadcast %77 : vector<4x1xi1> to vector<4x128xi1>
    %79 = arith.select %78, %74, %49 : vector<4x128xi1>, vector<4x128xf32>
    %80 = vector.shape_cast %76 : vector<4x1xi1> to vector<4x1xi1>
    %81 = vector.broadcast %80 : vector<4x1xi1> to vector<4x128xi1>
    %82 = arith.select %81, %72, %50 : vector<4x128xi1>, vector<4x128xf32>
    %cst_43 = arith.constant dense<0.000000e+00> : vector<4x512xf32>
    %83 = tpu.matmul %79, %1, %cst_43 {dimension_numbers = #tpu.dot_dimension_numbers<[1], [0], [0], [1], [0, 0, 1, 1], [], []>} : vector<4x128xf32>, vector<128x512xf32>, vector<4x512xf32> -> vector<4x512xf32>
    %84 = arith.addf %13, %83 : vector<4x512xf32>
    %85 = math.tanh %84 : vector<4x512xf32>
    %86 = vector.extract_strided_slice %85 {offsets = [0, 0], sizes = [4, 128], strides = [1, 1]} : vector<4x512xf32> to vector<4x128xf32>
    %cst_44 = arith.constant 1.000000e+00 : f32
    %87 = vector.broadcast %cst_44 : f32 to vector<4x128xf32>
    %88 = arith.addf %86, %87 : vector<4x128xf32>
    %cst_45 = arith.constant 5.000000e-01 : f32
    %89 = vector.broadcast %cst_45 : f32 to vector<4x128xf32>
    %90 = arith.mulf %89, %88 : vector<4x128xf32>
    %91 = vector.extract_strided_slice %85 {offsets = [0, 128], sizes = [4, 128], strides = [1, 1]} : vector<4x512xf32> to vector<4x128xf32>
    %cst_46 = arith.constant 1.000000e+00 : f32
    %92 = vector.broadcast %cst_46 : f32 to vector<4x128xf32>
    %93 = arith.addf %91, %92 : vector<4x128xf32>
    %cst_47 = arith.constant 5.000000e-01 : f32
    %94 = vector.broadcast %cst_47 : f32 to vector<4x128xf32>
    %95 = arith.mulf %94, %93 : vector<4x128xf32>
    %96 = vector.extract_strided_slice %85 {offsets = [0, 256], sizes = [4, 128], strides = [1, 1]} : vector<4x512xf32> to vector<4x128xf32>
    %97 = vector.extract_strided_slice %85 {offsets = [0, 384], sizes = [4, 128], strides = [1, 1]} : vector<4x512xf32> to vector<4x128xf32>
    %cst_48 = arith.constant 1.000000e+00 : f32
    %98 = vector.broadcast %cst_48 : f32 to vector<4x128xf32>
    %99 = arith.addf %97, %98 : vector<4x128xf32>
    %cst_49 = arith.constant 5.000000e-01 : f32
    %100 = vector.broadcast %cst_49 : f32 to vector<4x128xf32>
    %101 = arith.mulf %100, %99 : vector<4x128xf32>
    %102 = arith.mulf %95, %82 : vector<4x128xf32>
    %103 = arith.mulf %90, %96 : vector<4x128xf32>
    %104 = arith.addf %102, %103 : vector<4x128xf32>
    %105 = math.tanh %104 : vector<4x128xf32>
    %106 = arith.mulf %101, %105 : vector<4x128xf32>
    %c1_i32 = arith.constant 1 : i32
    %107 = vector.broadcast %c1_i32 : i32 to vector<4x1xi32>
    %108 = arith.cmpi sgt, %3, %107 : vector<4x1xi32>
    %109 = vector.shape_cast %108 : vector<4x1xi1> to vector<4x1xi1>
    %110 = vector.broadcast %109 : vector<4x1xi1> to vector<4x128xi1>
    %111 = arith.select %110, %106, %79 : vector<4x128xi1>, vector<4x128xf32>
    %112 = vector.shape_cast %108 : vector<4x1xi1> to vector<4x1xi1>
    %113 = vector.broadcast %112 : vector<4x1xi1> to vector<4x128xi1>
    %114 = arith.select %113, %104, %82 : vector<4x128xi1>, vector<4x128xf32>
    %cst_50 = arith.constant dense<0.000000e+00> : vector<4x512xf32>
    %115 = tpu.matmul %111, %1, %cst_50 {dimension_numbers = #tpu.dot_dimension_numbers<[1], [0], [0], [1], [0, 0, 1, 1], [], []>} : vector<4x128xf32>, vector<128x512xf32>, vector<4x512xf32> -> vector<4x512xf32>
    %116 = arith.addf %18, %115 : vector<4x512xf32>
    %117 = math.tanh %116 : vector<4x512xf32>
    %118 = vector.extract_strided_slice %117 {offsets = [0, 0], sizes = [4, 128], strides = [1, 1]} : vector<4x512xf32> to vector<4x128xf32>
    %cst_51 = arith.constant 1.000000e+00 : f32
    %119 = vector.broadcast %cst_51 : f32 to vector<4x128xf32>
    %120 = arith.addf %118, %119 : vector<4x128xf32>
    %cst_52 = arith.constant 5.000000e-01 : f32
    %121 = vector.broadcast %cst_52 : f32 to vector<4x128xf32>
    %122 = arith.mulf %121, %120 : vector<4x128xf32>
    %123 = vector.extract_strided_slice %117 {offsets = [0, 128], sizes = [4, 128], strides = [1, 1]} : vector<4x512xf32> to vector<4x128xf32>
    %cst_53 = arith.constant 1.000000e+00 : f32
    %124 = vector.broadcast %cst_53 : f32 to vector<4x128xf32>
    %125 = arith.addf %123, %124 : vector<4x128xf32>
    %cst_54 = arith.constant 5.000000e-01 : f32
    %126 = vector.broadcast %cst_54 : f32 to vector<4x128xf32>
    %127 = arith.mulf %126, %125 : vector<4x128xf32>
    %128 = vector.extract_strided_slice %117 {offsets = [0, 256], sizes = [4, 128], strides = [1, 1]} : vector<4x512xf32> to vector<4x128xf32>
    %129 = vector.extract_strided_slice %117 {offsets = [0, 384], sizes = [4, 128], strides = [1, 1]} : vector<4x512xf32> to vector<4x128xf32>
    %cst_55 = arith.constant 1.000000e+00 : f32
    %130 = vector.broadcast %cst_55 : f32 to vector<4x128xf32>
    %131 = arith.addf %129, %130 : vector<4x128xf32>
    %cst_56 = arith.constant 5.000000e-01 : f32
    %132 = vector.broadcast %cst_56 : f32 to vector<4x128xf32>
    %133 = arith.mulf %132, %131 : vector<4x128xf32>
    %134 = arith.mulf %127, %114 : vector<4x128xf32>
    %135 = arith.mulf %122, %128 : vector<4x128xf32>
    %136 = arith.addf %134, %135 : vector<4x128xf32>
    %137 = math.tanh %136 : vector<4x128xf32>
    %138 = arith.mulf %133, %137 : vector<4x128xf32>
    %c2_i32 = arith.constant 2 : i32
    %139 = vector.broadcast %c2_i32 : i32 to vector<4x1xi32>
    %140 = arith.cmpi sgt, %3, %139 : vector<4x1xi32>
    %141 = vector.shape_cast %140 : vector<4x1xi1> to vector<4x1xi1>
    %142 = vector.broadcast %141 : vector<4x1xi1> to vector<4x128xi1>
    %143 = arith.select %142, %138, %111 : vector<4x128xi1>, vector<4x128xf32>
    %144 = vector.shape_cast %140 : vector<4x1xi1> to vector<4x1xi1>
    %145 = vector.broadcast %144 : vector<4x1xi1> to vector<4x128xi1>
    %146 = arith.select %145, %136, %114 : vector<4x128xi1>, vector<4x128xf32>
    %cst_57 = arith.constant dense<0.000000e+00> : vector<4x512xf32>
    %147 = tpu.matmul %143, %1, %cst_57 {dimension_numbers = #tpu.dot_dimension_numbers<[1], [0], [0], [1], [0, 0, 1, 1], [], []>} : vector<4x128xf32>, vector<128x512xf32>, vector<4x512xf32> -> vector<4x512xf32>
    %148 = arith.addf %23, %147 : vector<4x512xf32>
    %149 = math.tanh %148 : vector<4x512xf32>
    %150 = vector.extract_strided_slice %149 {offsets = [0, 0], sizes = [4, 128], strides = [1, 1]} : vector<4x512xf32> to vector<4x128xf32>
    %cst_58 = arith.constant 1.000000e+00 : f32
    %151 = vector.broadcast %cst_58 : f32 to vector<4x128xf32>
    %152 = arith.addf %150, %151 : vector<4x128xf32>
    %cst_59 = arith.constant 5.000000e-01 : f32
    %153 = vector.broadcast %cst_59 : f32 to vector<4x128xf32>
    %154 = arith.mulf %153, %152 : vector<4x128xf32>
    %155 = vector.extract_strided_slice %149 {offsets = [0, 128], sizes = [4, 128], strides = [1, 1]} : vector<4x512xf32> to vector<4x128xf32>
    %cst_60 = arith.constant 1.000000e+00 : f32
    %156 = vector.broadcast %cst_60 : f32 to vector<4x128xf32>
    %157 = arith.addf %155, %156 : vector<4x128xf32>
    %cst_61 = arith.constant 5.000000e-01 : f32
    %158 = vector.broadcast %cst_61 : f32 to vector<4x128xf32>
    %159 = arith.mulf %158, %157 : vector<4x128xf32>
    %160 = vector.extract_strided_slice %149 {offsets = [0, 256], sizes = [4, 128], strides = [1, 1]} : vector<4x512xf32> to vector<4x128xf32>
    %161 = vector.extract_strided_slice %149 {offsets = [0, 384], sizes = [4, 128], strides = [1, 1]} : vector<4x512xf32> to vector<4x128xf32>
    %cst_62 = arith.constant 1.000000e+00 : f32
    %162 = vector.broadcast %cst_62 : f32 to vector<4x128xf32>
    %163 = arith.addf %161, %162 : vector<4x128xf32>
    %cst_63 = arith.constant 5.000000e-01 : f32
    %164 = vector.broadcast %cst_63 : f32 to vector<4x128xf32>
    %165 = arith.mulf %164, %163 : vector<4x128xf32>
    %166 = arith.mulf %159, %146 : vector<4x128xf32>
    %167 = arith.mulf %154, %160 : vector<4x128xf32>
    %168 = arith.addf %166, %167 : vector<4x128xf32>
    %169 = math.tanh %168 : vector<4x128xf32>
    %170 = arith.mulf %165, %169 : vector<4x128xf32>
    %c3_i32 = arith.constant 3 : i32
    %171 = vector.broadcast %c3_i32 : i32 to vector<4x1xi32>
    %172 = arith.cmpi sgt, %3, %171 : vector<4x1xi32>
    %173 = vector.shape_cast %172 : vector<4x1xi1> to vector<4x1xi1>
    %174 = vector.broadcast %173 : vector<4x1xi1> to vector<4x128xi1>
    %175 = arith.select %174, %170, %143 : vector<4x128xi1>, vector<4x128xf32>
    %176 = vector.shape_cast %172 : vector<4x1xi1> to vector<4x1xi1>
    %177 = vector.broadcast %176 : vector<4x1xi1> to vector<4x128xi1>
    %178 = arith.select %177, %168, %146 : vector<4x128xi1>, vector<4x128xf32>
    %cst_64 = arith.constant dense<0.000000e+00> : vector<4x512xf32>
    %179 = tpu.matmul %175, %1, %cst_64 {dimension_numbers = #tpu.dot_dimension_numbers<[1], [0], [0], [1], [0, 0, 1, 1], [], []>} : vector<4x128xf32>, vector<128x512xf32>, vector<4x512xf32> -> vector<4x512xf32>
    %180 = arith.addf %28, %179 : vector<4x512xf32>
    %181 = math.tanh %180 : vector<4x512xf32>
    %182 = vector.extract_strided_slice %181 {offsets = [0, 0], sizes = [4, 128], strides = [1, 1]} : vector<4x512xf32> to vector<4x128xf32>
    %cst_65 = arith.constant 1.000000e+00 : f32
    %183 = vector.broadcast %cst_65 : f32 to vector<4x128xf32>
    %184 = arith.addf %182, %183 : vector<4x128xf32>
    %cst_66 = arith.constant 5.000000e-01 : f32
    %185 = vector.broadcast %cst_66 : f32 to vector<4x128xf32>
    %186 = arith.mulf %185, %184 : vector<4x128xf32>
    %187 = vector.extract_strided_slice %181 {offsets = [0, 128], sizes = [4, 128], strides = [1, 1]} : vector<4x512xf32> to vector<4x128xf32>
    %cst_67 = arith.constant 1.000000e+00 : f32
    %188 = vector.broadcast %cst_67 : f32 to vector<4x128xf32>
    %189 = arith.addf %187, %188 : vector<4x128xf32>
    %cst_68 = arith.constant 5.000000e-01 : f32
    %190 = vector.broadcast %cst_68 : f32 to vector<4x128xf32>
    %191 = arith.mulf %190, %189 : vector<4x128xf32>
    %192 = vector.extract_strided_slice %181 {offsets = [0, 256], sizes = [4, 128], strides = [1, 1]} : vector<4x512xf32> to vector<4x128xf32>
    %193 = vector.extract_strided_slice %181 {offsets = [0, 384], sizes = [4, 128], strides = [1, 1]} : vector<4x512xf32> to vector<4x128xf32>
    %cst_69 = arith.constant 1.000000e+00 : f32
    %194 = vector.broadcast %cst_69 : f32 to vector<4x128xf32>
    %195 = arith.addf %193, %194 : vector<4x128xf32>
    %cst_70 = arith.constant 5.000000e-01 : f32
    %196 = vector.broadcast %cst_70 : f32 to vector<4x128xf32>
    %197 = arith.mulf %196, %195 : vector<4x128xf32>
    %198 = arith.mulf %191, %178 : vector<4x128xf32>
    %199 = arith.mulf %186, %192 : vector<4x128xf32>
    %200 = arith.addf %198, %199 : vector<4x128xf32>
    %201 = math.tanh %200 : vector<4x128xf32>
    %202 = arith.mulf %197, %201 : vector<4x128xf32>
    %c4_i32 = arith.constant 4 : i32
    %203 = vector.broadcast %c4_i32 : i32 to vector<4x1xi32>
    %204 = arith.cmpi sgt, %3, %203 : vector<4x1xi32>
    %205 = vector.shape_cast %204 : vector<4x1xi1> to vector<4x1xi1>
    %206 = vector.broadcast %205 : vector<4x1xi1> to vector<4x128xi1>
    %207 = arith.select %206, %202, %175 : vector<4x128xi1>, vector<4x128xf32>
    %208 = vector.shape_cast %204 : vector<4x1xi1> to vector<4x1xi1>
    %209 = vector.broadcast %208 : vector<4x1xi1> to vector<4x128xi1>
    %210 = arith.select %209, %200, %178 : vector<4x128xi1>, vector<4x128xf32>
    %cst_71 = arith.constant dense<0.000000e+00> : vector<4x512xf32>
    %211 = tpu.matmul %207, %1, %cst_71 {dimension_numbers = #tpu.dot_dimension_numbers<[1], [0], [0], [1], [0, 0, 1, 1], [], []>} : vector<4x128xf32>, vector<128x512xf32>, vector<4x512xf32> -> vector<4x512xf32>
    %212 = arith.addf %33, %211 : vector<4x512xf32>
    %213 = math.tanh %212 : vector<4x512xf32>
    %214 = vector.extract_strided_slice %213 {offsets = [0, 0], sizes = [4, 128], strides = [1, 1]} : vector<4x512xf32> to vector<4x128xf32>
    %cst_72 = arith.constant 1.000000e+00 : f32
    %215 = vector.broadcast %cst_72 : f32 to vector<4x128xf32>
    %216 = arith.addf %214, %215 : vector<4x128xf32>
    %cst_73 = arith.constant 5.000000e-01 : f32
    %217 = vector.broadcast %cst_73 : f32 to vector<4x128xf32>
    %218 = arith.mulf %217, %216 : vector<4x128xf32>
    %219 = vector.extract_strided_slice %213 {offsets = [0, 128], sizes = [4, 128], strides = [1, 1]} : vector<4x512xf32> to vector<4x128xf32>
    %cst_74 = arith.constant 1.000000e+00 : f32
    %220 = vector.broadcast %cst_74 : f32 to vector<4x128xf32>
    %221 = arith.addf %219, %220 : vector<4x128xf32>
    %cst_75 = arith.constant 5.000000e-01 : f32
    %222 = vector.broadcast %cst_75 : f32 to vector<4x128xf32>
    %223 = arith.mulf %222, %221 : vector<4x128xf32>
    %224 = vector.extract_strided_slice %213 {offsets = [0, 256], sizes = [4, 128], strides = [1, 1]} : vector<4x512xf32> to vector<4x128xf32>
    %225 = vector.extract_strided_slice %213 {offsets = [0, 384], sizes = [4, 128], strides = [1, 1]} : vector<4x512xf32> to vector<4x128xf32>
    %cst_76 = arith.constant 1.000000e+00 : f32
    %226 = vector.broadcast %cst_76 : f32 to vector<4x128xf32>
    %227 = arith.addf %225, %226 : vector<4x128xf32>
    %cst_77 = arith.constant 5.000000e-01 : f32
    %228 = vector.broadcast %cst_77 : f32 to vector<4x128xf32>
    %229 = arith.mulf %228, %227 : vector<4x128xf32>
    %230 = arith.mulf %223, %210 : vector<4x128xf32>
    %231 = arith.mulf %218, %224 : vector<4x128xf32>
    %232 = arith.addf %230, %231 : vector<4x128xf32>
    %233 = math.tanh %232 : vector<4x128xf32>
    %234 = arith.mulf %229, %233 : vector<4x128xf32>
    %c5_i32 = arith.constant 5 : i32
    %235 = vector.broadcast %c5_i32 : i32 to vector<4x1xi32>
    %236 = arith.cmpi sgt, %3, %235 : vector<4x1xi32>
    %237 = vector.shape_cast %236 : vector<4x1xi1> to vector<4x1xi1>
    %238 = vector.broadcast %237 : vector<4x1xi1> to vector<4x128xi1>
    %239 = arith.select %238, %234, %207 : vector<4x128xi1>, vector<4x128xf32>
    %240 = vector.shape_cast %236 : vector<4x1xi1> to vector<4x1xi1>
    %241 = vector.broadcast %240 : vector<4x1xi1> to vector<4x128xi1>
    %242 = arith.select %241, %232, %210 : vector<4x128xi1>, vector<4x128xf32>
    %cst_78 = arith.constant dense<0.000000e+00> : vector<4x512xf32>
    %243 = tpu.matmul %239, %1, %cst_78 {dimension_numbers = #tpu.dot_dimension_numbers<[1], [0], [0], [1], [0, 0, 1, 1], [], []>} : vector<4x128xf32>, vector<128x512xf32>, vector<4x512xf32> -> vector<4x512xf32>
    %244 = arith.addf %38, %243 : vector<4x512xf32>
    %245 = math.tanh %244 : vector<4x512xf32>
    %246 = vector.extract_strided_slice %245 {offsets = [0, 0], sizes = [4, 128], strides = [1, 1]} : vector<4x512xf32> to vector<4x128xf32>
    %cst_79 = arith.constant 1.000000e+00 : f32
    %247 = vector.broadcast %cst_79 : f32 to vector<4x128xf32>
    %248 = arith.addf %246, %247 : vector<4x128xf32>
    %cst_80 = arith.constant 5.000000e-01 : f32
    %249 = vector.broadcast %cst_80 : f32 to vector<4x128xf32>
    %250 = arith.mulf %249, %248 : vector<4x128xf32>
    %251 = vector.extract_strided_slice %245 {offsets = [0, 128], sizes = [4, 128], strides = [1, 1]} : vector<4x512xf32> to vector<4x128xf32>
    %cst_81 = arith.constant 1.000000e+00 : f32
    %252 = vector.broadcast %cst_81 : f32 to vector<4x128xf32>
    %253 = arith.addf %251, %252 : vector<4x128xf32>
    %cst_82 = arith.constant 5.000000e-01 : f32
    %254 = vector.broadcast %cst_82 : f32 to vector<4x128xf32>
    %255 = arith.mulf %254, %253 : vector<4x128xf32>
    %256 = vector.extract_strided_slice %245 {offsets = [0, 256], sizes = [4, 128], strides = [1, 1]} : vector<4x512xf32> to vector<4x128xf32>
    %257 = vector.extract_strided_slice %245 {offsets = [0, 384], sizes = [4, 128], strides = [1, 1]} : vector<4x512xf32> to vector<4x128xf32>
    %cst_83 = arith.constant 1.000000e+00 : f32
    %258 = vector.broadcast %cst_83 : f32 to vector<4x128xf32>
    %259 = arith.addf %257, %258 : vector<4x128xf32>
    %cst_84 = arith.constant 5.000000e-01 : f32
    %260 = vector.broadcast %cst_84 : f32 to vector<4x128xf32>
    %261 = arith.mulf %260, %259 : vector<4x128xf32>
    %262 = arith.mulf %255, %242 : vector<4x128xf32>
    %263 = arith.mulf %250, %256 : vector<4x128xf32>
    %264 = arith.addf %262, %263 : vector<4x128xf32>
    %265 = math.tanh %264 : vector<4x128xf32>
    %266 = arith.mulf %261, %265 : vector<4x128xf32>
    %c6_i32 = arith.constant 6 : i32
    %267 = vector.broadcast %c6_i32 : i32 to vector<4x1xi32>
    %268 = arith.cmpi sgt, %3, %267 : vector<4x1xi32>
    %269 = vector.shape_cast %268 : vector<4x1xi1> to vector<4x1xi1>
    %270 = vector.broadcast %269 : vector<4x1xi1> to vector<4x128xi1>
    %271 = arith.select %270, %266, %239 : vector<4x128xi1>, vector<4x128xf32>
    %272 = vector.shape_cast %268 : vector<4x1xi1> to vector<4x1xi1>
    %273 = vector.broadcast %272 : vector<4x1xi1> to vector<4x128xi1>
    %274 = arith.select %273, %264, %242 : vector<4x128xi1>, vector<4x128xf32>
    %cst_85 = arith.constant dense<0.000000e+00> : vector<4x512xf32>
    %275 = tpu.matmul %271, %1, %cst_85 {dimension_numbers = #tpu.dot_dimension_numbers<[1], [0], [0], [1], [0, 0, 1, 1], [], []>} : vector<4x128xf32>, vector<128x512xf32>, vector<4x512xf32> -> vector<4x512xf32>
    %276 = arith.addf %43, %275 : vector<4x512xf32>
    %277 = math.tanh %276 : vector<4x512xf32>
    %278 = vector.extract_strided_slice %277 {offsets = [0, 0], sizes = [4, 128], strides = [1, 1]} : vector<4x512xf32> to vector<4x128xf32>
    %cst_86 = arith.constant 1.000000e+00 : f32
    %279 = vector.broadcast %cst_86 : f32 to vector<4x128xf32>
    %280 = arith.addf %278, %279 : vector<4x128xf32>
    %cst_87 = arith.constant 5.000000e-01 : f32
    %281 = vector.broadcast %cst_87 : f32 to vector<4x128xf32>
    %282 = arith.mulf %281, %280 : vector<4x128xf32>
    %283 = vector.extract_strided_slice %277 {offsets = [0, 128], sizes = [4, 128], strides = [1, 1]} : vector<4x512xf32> to vector<4x128xf32>
    %cst_88 = arith.constant 1.000000e+00 : f32
    %284 = vector.broadcast %cst_88 : f32 to vector<4x128xf32>
    %285 = arith.addf %283, %284 : vector<4x128xf32>
    %cst_89 = arith.constant 5.000000e-01 : f32
    %286 = vector.broadcast %cst_89 : f32 to vector<4x128xf32>
    %287 = arith.mulf %286, %285 : vector<4x128xf32>
    %288 = vector.extract_strided_slice %277 {offsets = [0, 256], sizes = [4, 128], strides = [1, 1]} : vector<4x512xf32> to vector<4x128xf32>
    %289 = vector.extract_strided_slice %277 {offsets = [0, 384], sizes = [4, 128], strides = [1, 1]} : vector<4x512xf32> to vector<4x128xf32>
    %cst_90 = arith.constant 1.000000e+00 : f32
    %290 = vector.broadcast %cst_90 : f32 to vector<4x128xf32>
    %291 = arith.addf %289, %290 : vector<4x128xf32>
    %cst_91 = arith.constant 5.000000e-01 : f32
    %292 = vector.broadcast %cst_91 : f32 to vector<4x128xf32>
    %293 = arith.mulf %292, %291 : vector<4x128xf32>
    %294 = arith.mulf %287, %274 : vector<4x128xf32>
    %295 = arith.mulf %282, %288 : vector<4x128xf32>
    %296 = arith.addf %294, %295 : vector<4x128xf32>
    %297 = math.tanh %296 : vector<4x128xf32>
    %298 = arith.mulf %293, %297 : vector<4x128xf32>
    %c7_i32 = arith.constant 7 : i32
    %299 = vector.broadcast %c7_i32 : i32 to vector<4x1xi32>
    %300 = arith.cmpi sgt, %3, %299 : vector<4x1xi32>
    %301 = vector.shape_cast %300 : vector<4x1xi1> to vector<4x1xi1>
    %302 = vector.broadcast %301 : vector<4x1xi1> to vector<4x128xi1>
    %303 = arith.select %302, %298, %271 : vector<4x128xi1>, vector<4x128xf32>
    %304 = vector.shape_cast %300 : vector<4x1xi1> to vector<4x1xi1>
    %305 = vector.broadcast %304 : vector<4x1xi1> to vector<4x128xi1>
    %306 = arith.select %305, %296, %274 : vector<4x128xi1>, vector<4x128xf32>
    %cst_92 = arith.constant dense<0.000000e+00> : vector<4x512xf32>
    %307 = tpu.matmul %303, %1, %cst_92 {dimension_numbers = #tpu.dot_dimension_numbers<[1], [0], [0], [1], [0, 0, 1, 1], [], []>} : vector<4x128xf32>, vector<128x512xf32>, vector<4x512xf32> -> vector<4x512xf32>
    %308 = arith.addf %48, %307 : vector<4x512xf32>
    %309 = math.tanh %308 : vector<4x512xf32>
    %310 = vector.extract_strided_slice %309 {offsets = [0, 0], sizes = [4, 128], strides = [1, 1]} : vector<4x512xf32> to vector<4x128xf32>
    %cst_93 = arith.constant 1.000000e+00 : f32
    %311 = vector.broadcast %cst_93 : f32 to vector<4x128xf32>
    %312 = arith.addf %310, %311 : vector<4x128xf32>
    %cst_94 = arith.constant 5.000000e-01 : f32
    %313 = vector.broadcast %cst_94 : f32 to vector<4x128xf32>
    %314 = arith.mulf %313, %312 : vector<4x128xf32>
    %315 = vector.extract_strided_slice %309 {offsets = [0, 128], sizes = [4, 128], strides = [1, 1]} : vector<4x512xf32> to vector<4x128xf32>
    %cst_95 = arith.constant 1.000000e+00 : f32
    %316 = vector.broadcast %cst_95 : f32 to vector<4x128xf32>
    %317 = arith.addf %315, %316 : vector<4x128xf32>
    %cst_96 = arith.constant 5.000000e-01 : f32
    %318 = vector.broadcast %cst_96 : f32 to vector<4x128xf32>
    %319 = arith.mulf %318, %317 : vector<4x128xf32>
    %320 = vector.extract_strided_slice %309 {offsets = [0, 256], sizes = [4, 128], strides = [1, 1]} : vector<4x512xf32> to vector<4x128xf32>
    %321 = vector.extract_strided_slice %309 {offsets = [0, 384], sizes = [4, 128], strides = [1, 1]} : vector<4x512xf32> to vector<4x128xf32>
    %cst_97 = arith.constant 1.000000e+00 : f32
    %322 = vector.broadcast %cst_97 : f32 to vector<4x128xf32>
    %323 = arith.addf %321, %322 : vector<4x128xf32>
    %cst_98 = arith.constant 5.000000e-01 : f32
    %324 = vector.broadcast %cst_98 : f32 to vector<4x128xf32>
    %325 = arith.mulf %324, %323 : vector<4x128xf32>
    %326 = arith.mulf %319, %306 : vector<4x128xf32>
    %327 = arith.mulf %314, %320 : vector<4x128xf32>
    %328 = arith.addf %326, %327 : vector<4x128xf32>
    %329 = math.tanh %328 : vector<4x128xf32>
    %330 = arith.mulf %325, %329 : vector<4x128xf32>
    %c8_i32 = arith.constant 8 : i32
    %331 = vector.broadcast %c8_i32 : i32 to vector<4x1xi32>
    %332 = arith.cmpi sgt, %3, %331 : vector<4x1xi32>
    %333 = vector.shape_cast %332 : vector<4x1xi1> to vector<4x1xi1>
    %334 = vector.broadcast %333 : vector<4x1xi1> to vector<4x128xi1>
    %335 = arith.select %334, %330, %303 : vector<4x128xi1>, vector<4x128xf32>
    %c0_99 = arith.constant 0 : index
    %c0_100 = arith.constant 0 : index
    %336 = vector.load %arg8[%c0_99, %c0_100] : memref<128x512xf32, #tpu.memory_space<vmem>>, vector<128x512xf32>
    %c0_101 = arith.constant 0 : index
    %c0_102 = arith.constant 0 : index
    %337 = vector.load %arg9[%c0_101, %c0_102] : memref<1x512xf32, #tpu.memory_space<vmem>>, vector<1x512xf32>
    %c0_103 = arith.constant 0 : index
    %c0_104 = arith.constant 0 : index
    %338 = vector.load %arg2[%c0_103, %c0_104] : memref<4x32xf32, #tpu.memory_space<vmem>>, vector<4x32xf32>
    %c0_105 = arith.constant 0 : index
    %c0_106 = arith.constant 0 : index
    %339 = vector.load %arg6[%c0_105, %c0_106] : memref<32x512xf32, #tpu.memory_space<vmem>>, vector<32x512xf32>
    %cst_107 = arith.constant dense<0.000000e+00> : vector<4x512xf32>
    %340 = tpu.matmul %338, %339, %cst_107 {dimension_numbers = #tpu.dot_dimension_numbers<[1], [0], [0], [1], [0, 0, 1, 1], [], []>} : vector<4x32xf32>, vector<32x512xf32>, vector<4x512xf32> -> vector<4x512xf32>
    %c0_108 = arith.constant 0 : index
    %c0_109 = arith.constant 0 : index
    %341 = vector.load %arg7[%c0_108, %c0_109] : memref<128x512xf32, #tpu.memory_space<vmem>>, vector<128x512xf32>
    %cst_110 = arith.constant dense<0.000000e+00> : vector<4x512xf32>
    %342 = tpu.matmul %335, %341, %cst_110 {dimension_numbers = #tpu.dot_dimension_numbers<[1], [0], [0], [1], [0, 0, 1, 1], [], []>} : vector<4x128xf32>, vector<128x512xf32>, vector<4x512xf32> -> vector<4x512xf32>
    %343 = arith.addf %340, %342 : vector<4x512xf32>
    %344 = vector.broadcast %337 : vector<1x512xf32> to vector<4x512xf32>
    %345 = arith.addf %343, %344 : vector<4x512xf32>
    %cst_111 = arith.constant 0.000000e+00 : f32
    %346 = vector.broadcast %cst_111 : f32 to vector<1x128xf32>
    %cst_112 = arith.constant 0.000000e+00 : f32
    %347 = vector.broadcast %cst_112 : f32 to vector<1x128xf32>
    %348 = vector.extract_strided_slice %345 {offsets = [0, 0], sizes = [1, 512], strides = [1, 1]} : vector<4x512xf32> to vector<1x512xf32>
    %cst_113 = arith.constant dense<0.000000e+00> : vector<1x512xf32>
    %349 = tpu.matmul %346, %336, %cst_113 {dimension_numbers = #tpu.dot_dimension_numbers<[1], [0], [0], [1], [0, 0, 1, 1], [], []>} : vector<1x128xf32>, vector<128x512xf32>, vector<1x512xf32> -> vector<1x512xf32>
    %350 = arith.addf %348, %349 : vector<1x512xf32>
    %351 = math.tanh %350 : vector<1x512xf32>
    %352 = vector.extract_strided_slice %351 {offsets = [0, 0], sizes = [1, 128], strides = [1, 1]} : vector<1x512xf32> to vector<1x128xf32>
    %cst_114 = arith.constant 1.000000e+00 : f32
    %353 = vector.broadcast %cst_114 : f32 to vector<1x128xf32>
    %354 = arith.addf %352, %353 : vector<1x128xf32>
    %cst_115 = arith.constant 5.000000e-01 : f32
    %355 = vector.broadcast %cst_115 : f32 to vector<1x128xf32>
    %356 = arith.mulf %355, %354 : vector<1x128xf32>
    %357 = vector.extract_strided_slice %351 {offsets = [0, 128], sizes = [1, 128], strides = [1, 1]} : vector<1x512xf32> to vector<1x128xf32>
    %cst_116 = arith.constant 1.000000e+00 : f32
    %358 = vector.broadcast %cst_116 : f32 to vector<1x128xf32>
    %359 = arith.addf %357, %358 : vector<1x128xf32>
    %cst_117 = arith.constant 5.000000e-01 : f32
    %360 = vector.broadcast %cst_117 : f32 to vector<1x128xf32>
    %361 = arith.mulf %360, %359 : vector<1x128xf32>
    %362 = vector.extract_strided_slice %351 {offsets = [0, 256], sizes = [1, 128], strides = [1, 1]} : vector<1x512xf32> to vector<1x128xf32>
    %363 = vector.extract_strided_slice %351 {offsets = [0, 384], sizes = [1, 128], strides = [1, 1]} : vector<1x512xf32> to vector<1x128xf32>
    %cst_118 = arith.constant 1.000000e+00 : f32
    %364 = vector.broadcast %cst_118 : f32 to vector<1x128xf32>
    %365 = arith.addf %363, %364 : vector<1x128xf32>
    %cst_119 = arith.constant 5.000000e-01 : f32
    %366 = vector.broadcast %cst_119 : f32 to vector<1x128xf32>
    %367 = arith.mulf %366, %365 : vector<1x128xf32>
    %368 = arith.mulf %361, %347 : vector<1x128xf32>
    %369 = arith.mulf %356, %362 : vector<1x128xf32>
    %370 = arith.addf %368, %369 : vector<1x128xf32>
    %371 = math.tanh %370 : vector<1x128xf32>
    %372 = arith.mulf %367, %371 : vector<1x128xf32>
    %373 = vector.extract_strided_slice %345 {offsets = [1, 0], sizes = [1, 512], strides = [1, 1]} : vector<4x512xf32> to vector<1x512xf32>
    %cst_120 = arith.constant dense<0.000000e+00> : vector<1x512xf32>
    %374 = tpu.matmul %372, %336, %cst_120 {dimension_numbers = #tpu.dot_dimension_numbers<[1], [0], [0], [1], [0, 0, 1, 1], [], []>} : vector<1x128xf32>, vector<128x512xf32>, vector<1x512xf32> -> vector<1x512xf32>
    %375 = arith.addf %373, %374 : vector<1x512xf32>
    %376 = math.tanh %375 : vector<1x512xf32>
    %377 = vector.extract_strided_slice %376 {offsets = [0, 0], sizes = [1, 128], strides = [1, 1]} : vector<1x512xf32> to vector<1x128xf32>
    %cst_121 = arith.constant 1.000000e+00 : f32
    %378 = vector.broadcast %cst_121 : f32 to vector<1x128xf32>
    %379 = arith.addf %377, %378 : vector<1x128xf32>
    %cst_122 = arith.constant 5.000000e-01 : f32
    %380 = vector.broadcast %cst_122 : f32 to vector<1x128xf32>
    %381 = arith.mulf %380, %379 : vector<1x128xf32>
    %382 = vector.extract_strided_slice %376 {offsets = [0, 128], sizes = [1, 128], strides = [1, 1]} : vector<1x512xf32> to vector<1x128xf32>
    %cst_123 = arith.constant 1.000000e+00 : f32
    %383 = vector.broadcast %cst_123 : f32 to vector<1x128xf32>
    %384 = arith.addf %382, %383 : vector<1x128xf32>
    %cst_124 = arith.constant 5.000000e-01 : f32
    %385 = vector.broadcast %cst_124 : f32 to vector<1x128xf32>
    %386 = arith.mulf %385, %384 : vector<1x128xf32>
    %387 = vector.extract_strided_slice %376 {offsets = [0, 256], sizes = [1, 128], strides = [1, 1]} : vector<1x512xf32> to vector<1x128xf32>
    %388 = vector.extract_strided_slice %376 {offsets = [0, 384], sizes = [1, 128], strides = [1, 1]} : vector<1x512xf32> to vector<1x128xf32>
    %cst_125 = arith.constant 1.000000e+00 : f32
    %389 = vector.broadcast %cst_125 : f32 to vector<1x128xf32>
    %390 = arith.addf %388, %389 : vector<1x128xf32>
    %cst_126 = arith.constant 5.000000e-01 : f32
    %391 = vector.broadcast %cst_126 : f32 to vector<1x128xf32>
    %392 = arith.mulf %391, %390 : vector<1x128xf32>
    %393 = arith.mulf %386, %370 : vector<1x128xf32>
    %394 = arith.mulf %381, %387 : vector<1x128xf32>
    %395 = arith.addf %393, %394 : vector<1x128xf32>
    %396 = math.tanh %395 : vector<1x128xf32>
    %397 = arith.mulf %392, %396 : vector<1x128xf32>
    %398 = vector.extract_strided_slice %345 {offsets = [2, 0], sizes = [1, 512], strides = [1, 1]} : vector<4x512xf32> to vector<1x512xf32>
    %cst_127 = arith.constant dense<0.000000e+00> : vector<1x512xf32>
    %399 = tpu.matmul %397, %336, %cst_127 {dimension_numbers = #tpu.dot_dimension_numbers<[1], [0], [0], [1], [0, 0, 1, 1], [], []>} : vector<1x128xf32>, vector<128x512xf32>, vector<1x512xf32> -> vector<1x512xf32>
    %400 = arith.addf %398, %399 : vector<1x512xf32>
    %401 = math.tanh %400 : vector<1x512xf32>
    %402 = vector.extract_strided_slice %401 {offsets = [0, 0], sizes = [1, 128], strides = [1, 1]} : vector<1x512xf32> to vector<1x128xf32>
    %cst_128 = arith.constant 1.000000e+00 : f32
    %403 = vector.broadcast %cst_128 : f32 to vector<1x128xf32>
    %404 = arith.addf %402, %403 : vector<1x128xf32>
    %cst_129 = arith.constant 5.000000e-01 : f32
    %405 = vector.broadcast %cst_129 : f32 to vector<1x128xf32>
    %406 = arith.mulf %405, %404 : vector<1x128xf32>
    %407 = vector.extract_strided_slice %401 {offsets = [0, 128], sizes = [1, 128], strides = [1, 1]} : vector<1x512xf32> to vector<1x128xf32>
    %cst_130 = arith.constant 1.000000e+00 : f32
    %408 = vector.broadcast %cst_130 : f32 to vector<1x128xf32>
    %409 = arith.addf %407, %408 : vector<1x128xf32>
    %cst_131 = arith.constant 5.000000e-01 : f32
    %410 = vector.broadcast %cst_131 : f32 to vector<1x128xf32>
    %411 = arith.mulf %410, %409 : vector<1x128xf32>
    %412 = vector.extract_strided_slice %401 {offsets = [0, 256], sizes = [1, 128], strides = [1, 1]} : vector<1x512xf32> to vector<1x128xf32>
    %413 = vector.extract_strided_slice %401 {offsets = [0, 384], sizes = [1, 128], strides = [1, 1]} : vector<1x512xf32> to vector<1x128xf32>
    %cst_132 = arith.constant 1.000000e+00 : f32
    %414 = vector.broadcast %cst_132 : f32 to vector<1x128xf32>
    %415 = arith.addf %413, %414 : vector<1x128xf32>
    %cst_133 = arith.constant 5.000000e-01 : f32
    %416 = vector.broadcast %cst_133 : f32 to vector<1x128xf32>
    %417 = arith.mulf %416, %415 : vector<1x128xf32>
    %418 = arith.mulf %411, %395 : vector<1x128xf32>
    %419 = arith.mulf %406, %412 : vector<1x128xf32>
    %420 = arith.addf %418, %419 : vector<1x128xf32>
    %421 = math.tanh %420 : vector<1x128xf32>
    %422 = arith.mulf %417, %421 : vector<1x128xf32>
    %423 = vector.extract_strided_slice %345 {offsets = [3, 0], sizes = [1, 512], strides = [1, 1]} : vector<4x512xf32> to vector<1x512xf32>
    %cst_134 = arith.constant dense<0.000000e+00> : vector<1x512xf32>
    %424 = tpu.matmul %422, %336, %cst_134 {dimension_numbers = #tpu.dot_dimension_numbers<[1], [0], [0], [1], [0, 0, 1, 1], [], []>} : vector<1x128xf32>, vector<128x512xf32>, vector<1x512xf32> -> vector<1x512xf32>
    %425 = arith.addf %423, %424 : vector<1x512xf32>
    %426 = math.tanh %425 : vector<1x512xf32>
    %427 = vector.extract_strided_slice %426 {offsets = [0, 0], sizes = [1, 128], strides = [1, 1]} : vector<1x512xf32> to vector<1x128xf32>
    %cst_135 = arith.constant 1.000000e+00 : f32
    %428 = vector.broadcast %cst_135 : f32 to vector<1x128xf32>
    %429 = arith.addf %427, %428 : vector<1x128xf32>
    %cst_136 = arith.constant 5.000000e-01 : f32
    %430 = vector.broadcast %cst_136 : f32 to vector<1x128xf32>
    %431 = arith.mulf %430, %429 : vector<1x128xf32>
    %432 = vector.extract_strided_slice %426 {offsets = [0, 128], sizes = [1, 128], strides = [1, 1]} : vector<1x512xf32> to vector<1x128xf32>
    %cst_137 = arith.constant 1.000000e+00 : f32
    %433 = vector.broadcast %cst_137 : f32 to vector<1x128xf32>
    %434 = arith.addf %432, %433 : vector<1x128xf32>
    %cst_138 = arith.constant 5.000000e-01 : f32
    %435 = vector.broadcast %cst_138 : f32 to vector<1x128xf32>
    %436 = arith.mulf %435, %434 : vector<1x128xf32>
    %437 = vector.extract_strided_slice %426 {offsets = [0, 256], sizes = [1, 128], strides = [1, 1]} : vector<1x512xf32> to vector<1x128xf32>
    %438 = vector.extract_strided_slice %426 {offsets = [0, 384], sizes = [1, 128], strides = [1, 1]} : vector<1x512xf32> to vector<1x128xf32>
    %cst_139 = arith.constant 1.000000e+00 : f32
    %439 = vector.broadcast %cst_139 : f32 to vector<1x128xf32>
    %440 = arith.addf %438, %439 : vector<1x128xf32>
    %cst_140 = arith.constant 5.000000e-01 : f32
    %441 = vector.broadcast %cst_140 : f32 to vector<1x128xf32>
    %442 = arith.mulf %441, %440 : vector<1x128xf32>
    %443 = arith.mulf %436, %420 : vector<1x128xf32>
    %444 = arith.mulf %431, %437 : vector<1x128xf32>
    %445 = arith.addf %443, %444 : vector<1x128xf32>
    %446 = math.tanh %445 : vector<1x128xf32>
    %447 = arith.mulf %442, %446 : vector<1x128xf32>
    %448 = tpu.concatenate %372, %397, %422, %447 in 0 : vector<1x128xf32>, vector<1x128xf32>, vector<1x128xf32>, vector<1x128xf32> -> vector<4x128xf32>
    %c0_141 = arith.constant 0 : index
    %c0_142 = arith.constant 0 : index
    %449 = vector.load %arg10[%c0_141, %c0_142] : memref<128x128xf32, #tpu.memory_space<vmem>>, vector<128x128xf32>
    %cst_143 = arith.constant dense<0.000000e+00> : vector<4x128xf32>
    %450 = tpu.matmul %448, %449, %cst_143 {dimension_numbers = #tpu.dot_dimension_numbers<[1], [0], [0], [1], [0, 0, 1, 1], [], []>} : vector<4x128xf32>, vector<128x128xf32>, vector<4x128xf32> -> vector<4x128xf32>
    %c0_144 = arith.constant 0 : index
    %c0_145 = arith.constant 0 : index
    %451 = vector.load %arg11[%c0_144, %c0_145] : memref<1x128xf32, #tpu.memory_space<vmem>>, vector<1x128xf32>
    %452 = vector.broadcast %451 : vector<1x128xf32> to vector<4x128xf32>
    %453 = arith.addf %450, %452 : vector<4x128xf32>
    %c0_146 = arith.constant 0 : index
    %c0_147 = arith.constant 0 : index
    %454 = vector.load %arg12[%c0_146, %c0_147] : memref<4x128xf32, #tpu.memory_space<vmem>>, vector<4x128xf32>
    tpu.vector_store %arg12[%c0_146, %c0_147], %453 {strides = array<i32>} : memref<4x128xf32, #tpu.memory_space<vmem>>, vector<4x128xf32>,
    return
  }
}

</mosaic_0001>

<bundles_post_ra>
// kernel: tpu_custom_call.1
= control target key start
LH: loop header
LB: loop body
LE: loop exit
PB: predicated region body
PF: predicated region fallthrough
CT: control target
= control target key end

     0   :  { %17 = vsyncpa [#allocation3], 0  ;;  %s6526_s0 = inlined_call_operand.vmem [shape: s32[4,1], index: 0, kind: input, shape index: {}]   ;;  %s6527_s1 = inlined_call_operand.vmem [shape: f32[9,4,8], index: 1, kind: input, shape index: {}]   ;;  %s6528_s2 = inlined_call_operand.vmem [shape: f32[4,32], index: 2, kind: input, shape index: {}]   ;;  %s6529_s3 = inlined_call_operand.vmem [shape: f32[8,512], index: 3, kind: input, shape index: {}]   ;;  %s6530_s4 = inlined_call_operand.hbm [shape: f32[128,512], index: 4, kind: input, shape index: {}]   ;;  %s6531_s5 = inlined_call_operand.vmem [shape: f32[1,512], index: 5, kind: input, shape index: {}]   ;;  %s6532_s6 = inlined_call_operand.hbm [shape: f32[32,512], index: 6, kind: input, shape index: {}]   ;;  %s6533_s7 = inlined_call_operand.hbm [shape: f32[128,512], index: 7, kind: input, shape index: {}]   ;;  %s6534_s8 = inlined_call_operand.hbm [shape: f32[128,512], index: 8, kind: input, shape index: {}]   ;;  %s6535_s9 = inlined_call_operand.vmem [shape: f32[1,512], index: 9, kind: input, shape index: {}]   ;;  %s6536_s10 = inlined_call_operand.hbm [shape: f32[128,128], index: 10, kind: input, shape index: {}]   ;;  %s6537_s11 = inlined_call_operand.vmem [shape: f32[1,128], index: 11, kind: input, shape index: {}]   ;;  %s6538_s12 = inlined_call_operand.hbm [shape: f32[4,128], index: 12, kind: output, shape index: {}]  }
   0x1   :  { %18 = vsyncpa [#allocation6], 0 }
   0x2   :  { %19 = vsyncpa [#allocation9], 0 }
   0x3   :  { %20 = vsyncpa [#allocation4], 0  ;;  %s4735_s21 = smov [#allocation5]   ;;  %s4736_s23 = smov [#allocation8]  }
   0x4   :  { %s48_s22 = sshll.u32 %s4735_s21, 4  ;;  %s72_s24 = sshll.u32 %s4736_s23, 4  ;;  %s49_s22 = int_to_ptr.vmem [resolvable:$true] %s48_s22  ;;  %s73_s24 = int_to_ptr.vmem [resolvable:$true] %s72_s24 }
   0x5   :  { %s4615_s25 = scalar_lea.vmem %s49_s22, 2048  ;;  %p4620_p1 = scmp.lt.s32.totalorder %s49_s22, %s49_s22 }
   0x6   :  { %p4616_p0 = scmp.ne.s32.totalorder %s49_s22, %s4615_s25  ;;  %p4621_p2 = scmp.lt.s32.totalorder %s4615_s25, %s4615_s25 }
   0x8   :  { %p4622_p3 = por %p4621_p2, %p4620_p1 }
   0xa   :  { %p4623_p4 = pnand %p4622_p3, %p4616_p0 }
   0xc   :  { %4626 = shalt.err (!%p4623_p4)
}
   0xd   :  { %s4737_s26 = smov 512   ;;  %s4738_s27 = smov 32  }
   0xe   :  { %54 = dma.hbm_to_vmem [thread:$0]  %s6532_s6, 2048, %s49_s22, [#allocation6], %s4737_s26, %s4737_s26, %s4738_s27  }
   0xf   :  { %s4635_s30 = scalar_lea.vmem %s73_s24, 8192  ;;  %p4640_p6 = scmp.lt.s32.totalorder %s73_s24, %s73_s24 }
  0x10   :  { %p4636_p5 = scmp.ne.s32.totalorder %s73_s24, %s4635_s30  ;;  %p4641_p7 = scmp.lt.s32.totalorder %s4635_s30, %s4635_s30 }
  0x12   :  { %p4642_p8 = por %p4641_p7, %p4640_p6 }
  0x14   :  { %p4643_p9 = pnand %p4642_p8, %p4636_p5 }
  0x16   :  { %4646 = shalt.err (!%p4643_p9)
}
  0x17   :  { %78 = dma.hbm_to_vmem [thread:$0]  %s6534_s8, 8192, %s73_s24, [#allocation9], %s4737_s26, %s4737_s26, %s4738_s27  }
  0x18   :  { %s4739_s15 = smov [#allocation2]   ;;  %s4740_s17 = smov [#allocation7]  }
  0x19   :  { %s34_s16 = sshll.u32 %s4739_s15, 4  ;;  %s60_s18 = sshll.u32 %s4740_s17, 4  ;;  %s35_s16 = int_to_ptr.vmem [resolvable:$true] %s34_s16  ;;  %s61_s18 = int_to_ptr.vmem [resolvable:$true] %s60_s18 }
  0x1a   :  { %s4655_s6 = scalar_lea.vmem %s35_s16, 8192  ;;  %p4660_p11 = scmp.lt.s32.totalorder %s35_s16, %s35_s16 }
  0x1b   :  { %p4656_p10 = scmp.ne.s32.totalorder %s35_s16, %s4655_s6  ;;  %p4661_p12 = scmp.lt.s32.totalorder %s4655_s6, %s4655_s6 }
  0x1d   :  { %p4662_p13 = por %p4661_p12, %p4660_p11 }
  0x1f   :  { %p4663_p0 = pnand %p4662_p13, %p4656_p10 }
  0x21   :  { %4666 = shalt.err (!%p4663_p0)
}
  0x22   :  { %40 = dma.hbm_to_vmem [thread:$0]  %s6530_s4, 8192, %s35_s16, [#allocation3], %s4737_s26, %s4737_s26, %s4738_s27  }
  0x23   :  { %s4675_s8 = scalar_lea.vmem %s61_s18, 8192  ;;  %p4680_p2 = scmp.lt.s32.totalorder %s61_s18, %s61_s18 }
  0x24   :  { %p4676_p1 = scmp.ne.s32.totalorder %s61_s18, %s4675_s8  ;;  %p4681_p3 = scmp.lt.s32.totalorder %s4675_s8, %s4675_s8 }
  0x26   :  { %p4682_p4 = por %p4681_p3, %p4680_p2 }
  0x28   :  { %p4683_p5 = pnand %p4682_p4, %p4676_p1 }
  0x2a   :  { %4686 = shalt.err (!%p4683_p5)
}
  0x2b   :  { %66 = dma.hbm_to_vmem [thread:$0]  %s6533_s7, 8192, %s61_s18, [#allocation6], %s4737_s26, %s4737_s26, %s4738_s27  }
  0x2c   :  { %s4741_s23 = smov [#allocation10]  }
  0x2d   :  { %s86_s24 = sshll.u32 %s4741_s23, 4  ;;  %s87_s24 = int_to_ptr.vmem [resolvable:$true] %s86_s24 }
  0x2e   :  { %s4695_s25 = scalar_lea.vmem %s87_s24, 2048  ;;  %p4700_p7 = scmp.lt.s32.totalorder %s87_s24, %s87_s24 }
  0x2f   :  { %p4696_p6 = scmp.ne.s32.totalorder %s87_s24, %s4695_s25  ;;  %p4701_p8 = scmp.lt.s32.totalorder %s4695_s25, %s4695_s25 }
  0x31   :  { %p4702_p9 = por %p4701_p8, %p4700_p7 }
  0x33   :  { %p4703_p10 = pnand %p4702_p9, %p4696_p6 }
  0x35   :  { %4706 = shalt.err (!%p4703_p10)
}
  0x36   :  { %s4742_s4 = smov 128   ;;  %s4743_s28 = smov 8  }
  0x37   :  { %92 = dma.hbm_to_vmem [thread:$0]  %s6536_s10, 2048, %s87_s24, [#allocation9], %s4742_s4, %s4742_s4, %s4743_s28  }
  0x38   :  { %4727 = dma.done.wait [#allocation3], 8192  }
  0x39   :  { %4728 = vsyncadd [#allocation3], 4294959104 }
  0x3a   :  { %4729 = dma.done.wait [#allocation6], 10240  }
  0x3b   :  { %4730 = vsyncadd [#allocation6], 4294957056 }
  0x3c   :  { %4731 = dma.done.wait [#allocation9], 10240  }
  0x3d   :  { %4732 = vsyncadd [#allocation9], 4294957056  ;;  %v6539_v0 = vmov 0.0   ;;  %v6541_v1 = vmov 0   ;;  %v111_v2 = vld [vmem:[%s6529_s3 + $0x8] sm:$0xff]  ;;  %v4850_v3 = vld [vmem:[%s6529_s3] sm:$0xff] }
  0x3e   :  { %270 = vmatprep.mubr.f32.mxu1 %v6539_v0  ;;  %564 = vmatprep.mubr.f32.mxu0 %v6539_v0  ;;  %v180_v4 = vld [vmem:[%s6527_s1] sm:$0xf]  ;;  %vm202_vm0 = vcmask 64512   ;;  %v4858_v5 = vld [vmem:[%s6529_s3 + $0x18] sm:$0xff]  ;;  %v4320_v6 = vld [vmem:[%s6527_s1 + $0x8] sm:$0xf] }
  0x3f   :  { %4411 = vset.pattern.permute.xlu0 %v6541_v1  ;;  %4412 = vset.pattern.permute.xlu1 %v6541_v1  ;;  %v4866_v7 = vld [vmem:[%s6529_s3 + $0x10] sm:$0xff]  ;;  %v4323_v8 = vld [vmem:[%s6527_s1 + $0xc] sm:$0xf]  ;;  %v4317_v9 = vld [vmem:[%s6527_s1 + $0x4] sm:$0xf]  ;;  %s4747_s16 = smov [#allocation11]  }
  0x40   :  { %236 = vmatprep.subr.mxu1 %v111_v2  ;;  %530 = vmatprep.subr.mxu0 %v111_v2  ;;  %v4326_v10 = vld [vmem:[%s6527_s1 + $0x10] sm:$0xf]  ;;  %v4329_v11 = vld [vmem:[%s6527_s1 + $0x14] sm:$0xf]  ;;  %v4332_v12 = vld [vmem:[%s6527_s1 + $0x18] sm:$0xf] }
  0x41   :  { %237 = vmatpush1.msra.mxu1 %v4850_v3  ;;  %531 = vmatpush1.msra.mxu0 %v4850_v3  ;;  %v4335_v13 = vld [vmem:[%s6527_s1 + $0x1c] sm:$0xf]  ;;  %v4926_v14 = vld [vmem:[#allocation2 + $0x1e8] sm:$0xff]  ;;  %v4338_v15 = vld [vmem:[%s6527_s1 + $0x20] sm:$0xf]  ;;  %s4304_s17 = sshll.u32 %s4747_s16, 4  ;;  %s4305_s17 = int_to_ptr.vmem [resolvable:$true] %s4304_s17 }
  0x42   :  { %4315 = vmatmul.mubr.msk.f32.vlgmr.msra.gmra.mxu1 %vm202_vm0, %v180_v4  ;;  %307 = vmatprep.subr.mxu1 %v4858_v5  ;;  %6695 = vst [vmem:[#allocation16_spill] sm:$0xff] %v4926_v14  ;;  %v4934_v16 = vld [vmem:[#allocation2 + $0x1e0] sm:$0xff]  ;;  %v4938_v17 = vld [vmem:[#allocation2 + $0x1c8] sm:$0xff]  ;;  %v4992_v31 = vld [vmem:[#allocation2 + $0x1f8] sm:$0xff]  ;;  %s4707_s18 = scalar_lea.vmem %s4305_s17, 64  ;;  %p4712_p12 = scmp.lt.s32.totalorder %s4305_s17, %s4305_s17 }
  0x43   :  { %4321 = vmatmul.mubr.msk.f32.vlgmr.msra.gmra.mxu0 %vm202_vm0, %v4320_v6  ;;  %308 = vmatpush1.msra.mxu1 %v4866_v7  ;;  %6696 = vst [vmem:[#allocation17_spill] sm:$0xff] %v4938_v17  ;;  %v4942_v18 = vld [vmem:[#allocation2 + $0x1c0] sm:$0xff]  ;;  %v4946_v19 = vld [vmem:[#allocation2 + $0x1a8] sm:$0xff]  ;;  %6700 = vst [vmem:[#allocation21_spill] sm:$0xff] %v4992_v31  ;;  %p4708_p11 = scmp.ne.s32.totalorder %s4305_s17, %s4707_s18  ;;  %p4713_p13 = scmp.lt.s32.totalorder %s4707_s18, %s4707_s18 }
  0x44   :  { %677 = vmatprep.subr.mxu0 %v111_v2  ;;  %341 = vmatprep.mubr.f32.mxu1 %v6539_v0  ;;  %6697 = vst [vmem:[#allocation18_spill] sm:$0xff] %v4942_v18  ;;  %6698 = vst [vmem:[#allocation19_spill] sm:$0xff] %v4946_v19  ;;  %v4950_v20 = vld [vmem:[#allocation2 + $0x1a0] sm:$0xff]  ;;  %v4954_v21 = vld [vmem:[#allocation2 + $0x188] sm:$0xff] }
  0x45   :  { %678 = vmatpush1.msra.mxu0 %v4850_v3  ;;  %711 = vmatprep.mubr.f32.mxu0 %v6539_v0  ;;  %6699 = vst [vmem:[#allocation20_spill] sm:$0xff] %v4950_v20  ;;  %v4958_v22 = vld [vmem:[#allocation2 + $0x180] sm:$0xff]  ;;  %v4962_v23 = vld [vmem:[#allocation2 + $0x168] sm:$0xff]  ;;  %v5002_v34 = vld [vmem:[#allocation2 + $0x1f0] sm:$0xff]  ;;  %p4714_p0 = por %p4713_p13, %p4712_p12 }
  0x46   :  { %4316 = vmatmul.mubr.msk.f32.vlgmr.msra.gmra.mxu1 %vm202_vm0, %v180_v4  ;;  %383 = vmatprep.subr.mxu1 %v111_v2  ;;  %v4966_v24 = vld [vmem:[#allocation2 + $0x160] sm:$0xff]  ;;  %v4970_v25 = vld [vmem:[#allocation2 + $0x148] sm:$0xff]  ;;  %v5008_v36 = vld [vmem:[#allocation2 + $0x1d8] sm:$0xff] }
  0x47   :  { %4324 = vmatmul.mubr.msk.f32.vlgmr.msra.gmra.mxu0 %vm202_vm0, %v4323_v8  ;;  %384 = vmatpush1.msra.mxu1 %v4850_v3  ;;  %v4974_v26 = vld [vmem:[#allocation2 + $0x140] sm:$0xff]  ;;  %v4978_v27 = vld [vmem:[#allocation2 + $0x128] sm:$0xff]  ;;  %v5014_v38 = vld [vmem:[#allocation2 + $0x1d0] sm:$0xff]  ;;  %p4715_p1 = pnand %p4714_p0, %p4708_p11 }
  0x48   :  { %824 = vmatprep.subr.mxu0 %v111_v2  ;;  %417 = vmatprep.mubr.f32.mxu1 %v6539_v0  ;;  %v4982_v28 = vld [vmem:[#allocation2 + $0x120] sm:$0xff]  ;;  %v4986_v29 = vld [vmem:[#allocation2 + $0x108] sm:$0xff]  ;;  %v5020_v40 = vld [vmem:[#allocation2 + $0x1b8] sm:$0xff] }
  0x49   :  { %825 = vmatpush1.msra.mxu0 %v4850_v3  ;;  %858 = vmatprep.mubr.f32.mxu0 %v6539_v0  ;;  %v4990_v30 = vld [vmem:[#allocation2 + $0x100] sm:$0xff]  ;;  %v4996_v32 = vld [vmem:[#allocation2 + $0xe8] sm:$0xff]  ;;  %v5026_v42 = vld [vmem:[#allocation2 + $0x1b0] sm:$0xff] }
  0x4a   :  { %4318 = vmatmul.mubr.msk.f32.vlgmr.msra.gmra.mxu1 %vm202_vm0, %v4317_v9  ;;  %454 = vmatprep.subr.mxu1 %v4858_v5  ;;  %v5000_v33 = vld [vmem:[#allocation2 + $0xe0] sm:$0xff]  ;;  %v5006_v35 = vld [vmem:[#allocation2 + $0xc8] sm:$0xff]  ;;  %v5032_v44 = vld [vmem:[#allocation2 + $0x198] sm:$0xff] }
  0x4b   :  { %4327 = vmatmul.mubr.msk.f32.vlgmr.msra.gmra.mxu0 %vm202_vm0, %v4326_v10  ;;  %455 = vmatpush1.msra.mxu1 %v4866_v7  ;;  %v5012_v37 = vld [vmem:[#allocation2 + $0xc0] sm:$0xff]  ;;  %v5018_v39 = vld [vmem:[#allocation2 + $0xa8] sm:$0xff]  ;;  %v5038_v46 = vld [vmem:[#allocation2 + $0x190] sm:$0xff] }
  0x4c   :  { %971 = vmatprep.subr.mxu0 %v111_v2  ;;  %488 = vmatprep.mubr.f32.mxu1 %v6539_v0  ;;  %v5024_v41 = vld [vmem:[#allocation2 + $0xa0] sm:$0xff]  ;;  %v5030_v43 = vld [vmem:[#allocation2 + $0x88] sm:$0xff]  ;;  %v5044_v48 = vld [vmem:[#allocation2 + $0x178] sm:$0xff] }
  0x4d   :  { %972 = vmatpush1.msra.mxu0 %v4850_v3  ;;  %1005 = vmatprep.mubr.f32.mxu0 %v6539_v0  ;;  %v5036_v45 = vld [vmem:[#allocation2 + $0x80] sm:$0xff]  ;;  %v5042_v47 = vld [vmem:[#allocation2 + $0x68] sm:$0xff]  ;;  %v5050_v50 = vld [vmem:[#allocation2 + $0x170] sm:$0xff] }
  0x4e   :  { %4319 = vmatmul.mubr.msk.f32.vlgmr.msra.gmra.mxu1 %vm202_vm0, %v4317_v9  ;;  %601 = vmatprep.subr.mxu1 %v4858_v5  ;;  %6701 = vst [vmem:[#allocation22_spill] sm:$0xff] %v5036_v45  ;;  %6702 = vst [vmem:[#allocation23_spill] sm:$0xff] %v5042_v47  ;;  %v5048_v49 = vld [vmem:[#allocation2 + $0x60] sm:$0xff]  ;;  %v5054_v51 = vld [vmem:[#allocation2 + $0x48] sm:$0xff] }
  0x4f   :  { %4330 = vmatmul.mubr.msk.f32.vlgmr.msra.gmra.mxu0 %vm202_vm0, %v4329_v11  ;;  %602 = vmatpush1.msra.mxu1 %v4866_v7  ;;  %6703 = vst [vmem:[#allocation24_spill] sm:$0xff] %v5048_v49  ;;  %6704 = vst [vmem:[#allocation25_spill] sm:$0xff] %v5054_v51  ;;  %v5056_v52 = vld [vmem:[#allocation2 + $0x158] sm:$0xff]  ;;  %v5060_v53 = vld [vmem:[#allocation2 + $0x40] sm:$0xff] }
  0x50   :  { %1118 = vmatprep.subr.mxu0 %v111_v2  ;;  %635 = vmatprep.mubr.f32.mxu1 %v6539_v0  ;;  %6705 = vst [vmem:[#allocation26_spill] sm:$0xff] %v5060_v53  ;;  %v5062_v54 = vld [vmem:[#allocation2 + $0x150] sm:$0xff]  ;;  %v5066_v55 = vld [vmem:[#allocation2 + $0x28] sm:$0xff]  ;;  %v5068_v56 = vld [vmem:[#allocation2 + $0x138] sm:$0xff] }
  0x51   :  { %1119 = vmatpush1.msra.mxu0 %v4850_v3  ;;  %1152 = vmatprep.mubr.f32.mxu0 %v6539_v0  ;;  %6706 = vst [vmem:[#allocation27_spill] sm:$0xff] %v5066_v55  ;;  %v5073_v57 = vld [vmem:[%s6526_s0] sm:$0xf]  ;;  %v5079_v59 = vld [vmem:[#allocation2 + $0x130] sm:$0xff]  ;;  %v5083_v60 = vld [vmem:[#allocation2 + $0x8] sm:$0xff] }
  0x52   :  { %4322 = vmatmul.mubr.msk.f32.vlgmr.msra.gmra.mxu1 %vm202_vm0, %v4320_v6  ;;  %748 = vmatprep.subr.mxu1 %v4858_v5  ;;  %6707 = vst [vmem:[#allocation28_spill] sm:$0xff] %v5073_v57  ;;  %v5077_v58 = vld [vmem:[#allocation2 + $0x20] sm:$0xff]  ;;  %6709 = vst [vmem:[#allocation30_spill] sm:$0xff] %v5083_v60  ;;  %v5085_v61 = vld [vmem:[#allocation2 + $0x118] sm:$0xff]  ;;  %vm1685_vm1 = vcmp.gt.s32.totalorder %v5073_v57, 0  ;;  %vm1854_vm2 = vcmp.gt.s32.totalorder %v5073_v57, 1 }
  0x53   :  { %4333 = vmatmul.mubr.msk.f32.vlgmr.msra.gmra.mxu0 %vm202_vm0, %v4332_v12  ;;  %749 = vmatpush1.msra.mxu1 %v4866_v7  ;;  %6708 = vst [vmem:[#allocation29_spill] sm:$0xff] %v5077_v58  ;;  %v5089_v62 = vld [vmem:[#allocation2] sm:$0xff]  ;;  %v5094_v63 = vld [vmem:[#allocation2 + $0x110] sm:$0xff]  ;;  %v1686_v4 = vsel %vm1685_vm1, 1, %v6541_v1  ;;  %v1855_v9 = vsel %vm1854_vm2, 1, %v6541_v1  ;;  %vm2361_vm3 = vcmp.gt.s32.totalorder %v5073_v57, 4 }
  0x54   :  { %1265 = vmatprep.subr.mxu0 %v111_v2  ;;  %782 = vmatprep.mubr.f32.mxu1 %v6539_v0  ;;  %6710 = vst [vmem:[#allocation31_spill] sm:$0xff] %v5089_v62  ;;  %v5111_v6 = vld [vmem:[#allocation2 + $0xd0] sm:$0xff]  ;;  %vm2699_vm4 = vcmp.gt.s32.totalorder %v5073_v57, 6  ;;  %vm3037_vm5 = vcmp.gt.s32.totalorder %v5073_v57, 8  ;;  %v6722_v57 = vmov 0.0  }
  0x55   :  { %1266 = vmatpush1.msra.mxu0 %v4850_v3  ;;  %1299 = vmatprep.mubr.f32.mxu0 %v6539_v0 }
  0x56   :  { %4325 = vmatmul.mubr.msk.f32.vlgmr.msra.gmra.mxu1 %vm202_vm0, %v4323_v8  ;;  %895 = vmatprep.subr.mxu1 %v4858_v5  ;;  %v5118_v8 = vld [vmem:[#allocation2 + $0xb0] sm:$0xff] }
  0x57   :  { %4336 = vmatmul.mubr.msk.f32.vlgmr.msra.gmra.mxu0 %vm202_vm0, %v4335_v13  ;;  %896 = vmatpush1.msra.mxu1 %v4866_v7 }
  0x58   :  { %1412 = vmatprep.subr.mxu0 %v111_v2  ;;  %929 = vmatprep.mubr.f32.mxu1 %v6539_v0  ;;  %v5098_v2 = vld [vmem:[#allocation2 + $0xf8] sm:$0xff] }
  0x59   :  { %1413 = vmatpush1.msra.mxu0 %v4850_v3  ;;  %1446 = vmatprep.mubr.f32.mxu0 %v6539_v0  ;;  %v5102_v3 = vld [vmem:[#allocation2 + $0xf0] sm:$0xff] }
  0x5a   :  { %1524 = vmatprep.subr.mxu0 %v4926_v14  ;;  %4328 = vmatmul.mubr.msk.f32.vlgmr.msra.gmra.mxu1 %vm202_vm0, %v4326_v10  ;;  %v5123_v10 = vld [vmem:[#allocation2 + $0x98] sm:$0xff] }
  0x5b   :  { %1042 = vmatprep.subr.mxu1 %v4858_v5  ;;  %4339 = vmatmul.mubr.msk.f32.vlgmr.msra.gmra.mxu0 %vm202_vm0, %v4338_v15  ;;  %6711 = vst [vmem:[#allocation32_spill] sm:$0xff] %v5123_v10 }
  0x5c   :  { %1525 = vmatpush1.msra.mxu0 %v4934_v16  ;;  %1043 = vmatpush1.msra.mxu1 %v4866_v7 }
  0x5d   :  { %1526 = vmatprep.subr.mxu0 %v4938_v17  ;;  %1076 = vmatprep.mubr.f32.mxu1 %v6539_v0 }
  0x5e   :  { %1527 = vmatpush1.msra.mxu0 %v4942_v18  ;;  %4331 = vmatmul.mubr.msk.f32.vlgmr.msra.gmra.mxu1 %vm202_vm0, %v4329_v11  ;;  %v5128_v11 = vld [vmem:[#allocation2 + $0x90] sm:$0xff] }
  0x5f   :  { %1528 = vmatprep.subr.mxu0 %v4946_v19  ;;  %1189 = vmatprep.subr.mxu1 %v4858_v5  ;;  %6712 = vst [vmem:[#allocation33_spill] sm:$0xff] %v5128_v11 }
  0x60   :  { %1529 = vmatpush1.msra.mxu0 %v4950_v20  ;;  %1190 = vmatpush1.msra.mxu1 %v4866_v7 }
  0x61   :  { %1530 = vmatprep.subr.mxu0 %v4954_v21  ;;  %1223 = vmatprep.mubr.f32.mxu1 %v6539_v0 }
  0x62   :  { %1531 = vmatpush1.msra.mxu0 %v4958_v22  ;;  %4334 = vmatmul.mubr.msk.f32.vlgmr.msra.gmra.mxu1 %vm202_vm0, %v4332_v12  ;;  %v5132_v12 = vld [vmem:[#allocation2 + $0x78] sm:$0xff] }
  0x63   :  { %1532 = vmatprep.subr.mxu0 %v4962_v23  ;;  %1336 = vmatprep.subr.mxu1 %v4858_v5  ;;  %6713 = vst [vmem:[#allocation34_spill] sm:$0xff] %v5132_v12 }
  0x64   :  { %1533 = vmatpush1.msra.mxu0 %v4966_v24  ;;  %1337 = vmatpush1.msra.mxu1 %v4866_v7 }
  0x65   :  { %1534 = vmatprep.subr.mxu0 %v4970_v25  ;;  %1370 = vmatprep.mubr.f32.mxu1 %v6539_v0 }
  0x66   :  { %1535 = vmatpush1.msra.mxu0 %v4974_v26  ;;  %4337 = vmatmul.mubr.msk.f32.vlgmr.msra.gmra.mxu1 %vm202_vm0, %v4335_v13  ;;  %v5135_v13 = vld [vmem:[#allocation2 + $0x70] sm:$0xff] }
  0x67   :  { %1536 = vmatprep.subr.mxu0 %v4978_v27  ;;  %1483 = vmatprep.subr.mxu1 %v4858_v5  ;;  %v5107_v5 = vld [vmem:[#allocation2 + $0xd8] sm:$0xff]  ;;  %6714 = vst [vmem:[#allocation35_spill] sm:$0xff] %v5135_v13 }
  0x68   :  { %1537 = vmatpush1.msra.mxu0 %v4982_v28  ;;  %1484 = vmatpush1.msra.mxu1 %v4866_v7  ;;  %v5115_v7 = vld [vmem:[#allocation2 + $0xb8] sm:$0xff] }
  0x69   :  { %1538 = vmatprep.subr.mxu0 %v4986_v29  ;;  %1517 = vmatprep.mubr.f32.mxu1 %v6539_v0 }
  0x6a   :  { %1539 = vmatpush1.msra.mxu0 %v4990_v30  ;;  %1595 = vmatprep.subr.mxu1 %v4992_v31 }
  0x6b   :  { %1540 = vmatprep.subr.mxu0 %v4996_v32  ;;  %4340 = vmatmul.mubr.msk.f32.vlgmr.msra.gmra.mxu1 %vm202_vm0, %v4338_v15  ;;  %v2362_v15 = vsel %vm2361_vm3, 1, %v6541_v1  ;;  %v5152_v1 = vld [vmem:[#allocation2 + $0x30] sm:$0xff]  ;;  %vm3332_vm3 = vcmask 261120  }
  0x6c   :  { %1541 = vmatpush1.msra.mxu0 %v5000_v33  ;;  %1596 = vmatpush1.msra.mxu1 %v5002_v34  ;;  %6718 = vst [vmem:[#allocation39_spill] sm:$0xff] %v5152_v1 }
  0x6d   :  { %1542 = vmatprep.subr.mxu0 %v5006_v35  ;;  %1597 = vmatprep.subr.mxu1 %v5008_v36 }
  0x6e   :  { %1543 = vmatpush1.msra.mxu0 %v5012_v37  ;;  %1598 = vmatpush1.msra.mxu1 %v5014_v38 }
  0x6f   :  { %1544 = vmatprep.subr.mxu0 %v5018_v39  ;;  %1599 = vmatprep.subr.mxu1 %v5020_v40 }
  0x70   :  { %1545 = vmatpush1.msra.mxu0 %v5024_v41  ;;  %1600 = vmatpush1.msra.mxu1 %v5026_v42 }
  0x71   :  { %1546 = vmatprep.subr.mxu0 %v5030_v43  ;;  %1601 = vmatprep.subr.mxu1 %v5032_v44 }
  0x72   :  { %1547 = vmatpush1.msra.mxu0 %v5036_v45  ;;  %1602 = vmatpush1.msra.mxu1 %v5038_v46 }
  0x73   :  { %1548 = vmatprep.subr.mxu0 %v5042_v47  ;;  %1603 = vmatprep.subr.mxu1 %v5044_v48 }
  0x74   :  { %1549 = vmatpush1.msra.mxu0 %v5048_v49  ;;  %1604 = vmatpush1.msra.mxu1 %v5050_v50 }
  0x75   :  { %1550 = vmatprep.subr.mxu0 %v5054_v51  ;;  %1605 = vmatprep.subr.mxu1 %v5056_v52 }
  0x76   :  { %1551 = vmatpush1.msra.mxu0 %v5060_v53  ;;  %1606 = vmatpush1.msra.mxu1 %v5062_v54 }
  0x77   :  { %1552 = vmatprep.subr.mxu0 %v5066_v55  ;;  %1607 = vmatprep.subr.mxu1 %v5068_v56 }
  0x78   :  { %1553 = vmatpush1.msra.mxu0 %v5077_v58  ;;  %1608 = vmatpush1.msra.mxu1 %v5079_v59 }
  0x79   :  { %1554 = vmatprep.subr.mxu0 %v5083_v60  ;;  %1609 = vmatprep.subr.mxu1 %v5085_v61 }
  0x7a   :  { %1555 = vmatpush1.msra.mxu0 %v5089_v62  ;;  %1588 = vmatprep.mubr.f32.mxu0 %v6539_v0 }
  0x7b   :  { %1610 = vmatpush1.msra.mxu1 %v5094_v63  ;;  %1589 = vmatmul.mubr.f32.vlgmr.msra.gmra.mxu0 %v6539_v0 }
  0x7c   :  { %1611 = vmatprep.subr.mxu1 %v5098_v2  ;;  %1659 = vmatprep.mubr.f32.mxu1 %v6539_v0  ;;  %v5145_v0 = vld [vmem:[#allocation2 + $0x50] sm:$0xff] }
  0x7d   :  { %1612 = vmatpush1.msra.mxu1 %v5102_v3  ;;  %1688 = vperm.xlu0 %4411, %v1686_v4   ;;  %v5140_v4 = vld [vmem:[#allocation2 + $0x58] sm:$0xff]  ;;  %6716 = vst [vmem:[#allocation37_spill] sm:$0xff] %v5145_v0 }
  0x7e   :  { %1613 = vmatprep.subr.mxu1 %v5107_v5  ;;  %1693 = vmatprep.subr.mxu0 %v4926_v14  ;;  %6715 = vst [vmem:[#allocation36_spill] sm:$0xff] %v5140_v4 }
  0x7f   :  { %1614 = vmatpush1.msra.mxu1 %v5111_v6  ;;  %1694 = vmatpush1.msra.mxu0 %v4934_v16 }
  0x80   :  { %1615 = vmatprep.subr.mxu1 %v5115_v7  ;;  %1695 = vmatprep.subr.mxu0 %v4938_v17 }
  0x81   :  { %1616 = vmatpush1.msra.mxu1 %v5118_v8  ;;  %1857 = vperm.xlu0 %4411, %v1855_v9   ;;  %v5149_v9 = vld [vmem:[#allocation2 + $0x38] sm:$0xff] }
  0x82   :  { %1617 = vmatprep.subr.mxu1 %v5123_v10  ;;  %1696 = vmatpush1.msra.mxu0 %v4942_v18  ;;  %6717 = vst [vmem:[#allocation38_spill] sm:$0xff] %v5149_v9  ;;  %v6719_v18 = vmov 0  }
  0x83   :  { %1618 = vmatpush1.msra.mxu1 %v5128_v11  ;;  %1697 = vmatprep.subr.mxu0 %v4946_v19  ;;  %v2700_v17 = vsel %vm2699_vm4, 1, %v6719_v18  ;;  %v5157_v19 = vld [vmem:[#allocation2 + $0x18] sm:$0xff]  ;;  %vm4198_vm4 = vcmask 1040384  }
  0x84   :  { %1619 = vmatprep.subr.mxu1 %v5132_v12  ;;  %1698 = vmatpush1.msra.mxu0 %v4950_v20  ;;  %6720 = vst [vmem:[#allocation40_spill] sm:$0xff] %v5157_v19  ;;  %v5162_v20 = vld [vmem:[#allocation2 + $0x10] sm:$0xff] }
  0x85   :  { %1620 = vmatpush1.msra.mxu1 %v5135_v13  ;;  %2364 = vperm.xlu0 %4411, %v2362_v15   ;;  %6721 = vst [vmem:[#allocation41_spill] sm:$0xff] %v5162_v20  ;;  %v3038_v15 = vsel %vm3037_vm5, 1, %v6719_v18  ;;  %vm4200_vm5 = vcmask 1041408  }
  0x86   :  { %1621 = vmatprep.subr.mxu1 %v5140_v4  ;;  %1699 = vmatprep.subr.mxu0 %v4954_v21 }
  0x87   :  { %1622 = vmatpush1.msra.mxu1 %v5145_v0  ;;  %1700 = vmatpush1.msra.mxu0 %v4958_v22 }
  0x88   :  { %1623 = vmatprep.subr.mxu1 %v5149_v9  ;;  %1701 = vmatprep.subr.mxu0 %v4962_v23 }
  0x89   :  { %1624 = vmatpush1.msra.mxu1 %v5152_v1  ;;  %2702 = vperm.xlu0 %4411, %v2700_v17   ;;  %v182_v17 = vlaneseq }
  0x8a   :  { %1625 = vmatprep.subr.mxu1 %v5157_v19  ;;  %1702 = vmatpush1.msra.mxu0 %v4966_v24 }
  0x8b   :  { %1626 = vmatpush1.msra.mxu1 %v5162_v20  ;;  %1703 = vmatprep.subr.mxu0 %v4970_v25 }
  0x8c   :  { %1660 = vmatmul.mubr.f32.vlgmr.msra.gmra.mxu1 %v6722_v57  ;;  %1764 = vmatprep.subr.mxu1 %v4992_v31 }
  0x8d   :  { %3040 = vperm.xlu0 %4411, %v3038_v15   ;;  %1765 = vmatpush1.msra.mxu1 %v5002_v34  ;;  %v5229_v15 = vshrl.u32 %v182_v17, 7 }
  0x8e   :  { %1766 = vmatprep.subr.mxu1 %v5008_v36  ;;  %1704 = vmatpush1.msra.mxu0 %v4974_v26 }
  0x8f   :  { %1767 = vmatpush1.msra.mxu1 %v5014_v38  ;;  %1705 = vmatprep.subr.mxu0 %v4978_v27  ;;  %6723 = vst [vmem:[#allocation42_spill] sm:$0xff] %v5229_v15  ;;  %v6572_v18 = vsub.s32 0, %v5229_v15 }
  0x90   :  { %1768 = vmatprep.subr.mxu1 %v5020_v40  ;;  %1706 = vmatpush1.msra.mxu0 %v4982_v28 }
  0x91   :  { %1769 = vmatpush1.msra.mxu1 %v5026_v42  ;;  %1707 = vmatprep.subr.mxu0 %v4986_v29 }
  0x92   :  { %1770 = vmatprep.subr.mxu1 %v5032_v44  ;;  %1708 = vmatpush1.msra.mxu0 %v4990_v30 }
  0x93   :  { %1771 = vmatpush1.msra.mxu1 %v5038_v46  ;;  %1709 = vmatprep.subr.mxu0 %v4996_v32 }
  0x94   :  { %1772 = vmatprep.subr.mxu1 %v5044_v48  ;;  %1710 = vmatpush1.msra.mxu0 %v5000_v33 }
  0x95   :  { %1773 = vmatpush1.msra.mxu1 %v5050_v50  ;;  %1711 = vmatprep.subr.mxu0 %v5006_v35 }
  0x96   :  { %1774 = vmatprep.subr.mxu1 %v5056_v52  ;;  %1712 = vmatpush1.msra.mxu0 %v5012_v37 }
  0x97   :  { %1775 = vmatpush1.msra.mxu1 %v5062_v54  ;;  %1713 = vmatprep.subr.mxu0 %v5018_v39 }
  0x98   :  { %1776 = vmatprep.subr.mxu1 %v5068_v56  ;;  %1714 = vmatpush1.msra.mxu0 %v5024_v41 }
  0x99   :  { %1777 = vmatpush1.msra.mxu1 %v5079_v59  ;;  %1715 = vmatprep.subr.mxu0 %v5030_v43 }
  0x9a   :  { %1778 = vmatprep.subr.mxu1 %v5085_v61  ;;  %1716 = vmatpush1.msra.mxu0 %v5036_v45 }
  0x9b   :  { %1779 = vmatpush1.msra.mxu1 %v5094_v63  ;;  %1717 = vmatprep.subr.mxu0 %v5042_v47 }
  0x9c   :  { %1780 = vmatprep.subr.mxu1 %v5098_v2  ;;  %1718 = vmatpush1.msra.mxu0 %v5048_v49 }
  0x9d   :  { %1781 = vmatpush1.msra.mxu1 %v5102_v3  ;;  %1719 = vmatprep.subr.mxu0 %v5054_v51 }
  0x9e   :  { %1782 = vmatprep.subr.mxu1 %v5107_v5  ;;  %1720 = vmatpush1.msra.mxu0 %v5060_v53 }
  0x9f   :  { %1783 = vmatpush1.msra.mxu1 %v5111_v6  ;;  %1721 = vmatprep.subr.mxu0 %v5066_v55 }
  0xa0   :  { %1784 = vmatprep.subr.mxu1 %v5115_v7  ;;  %1722 = vmatpush1.msra.mxu0 %v5077_v58 }
  0xa1   :  { %1785 = vmatpush1.msra.mxu1 %v5118_v8  ;;  %1723 = vmatprep.subr.mxu0 %v5083_v60 }
  0xa2   :  { %1786 = vmatprep.subr.mxu1 %v5123_v10  ;;  %1724 = vmatpush1.msra.mxu0 %v5089_v62 }
  0xa3   :  { %1787 = vmatpush1.msra.mxu1 %v5128_v11  ;;  %1757 = vmatprep.mubr.f32.mxu0 %v6722_v57 }
  0xa4   :  { %1788 = vmatprep.subr.mxu1 %v5132_v12  ;;  %1828 = vmatprep.mubr.f32.mxu1 %v6722_v57  ;;  %v6577_v57 = vsub.s32 1, %v5229_v15 }
  0xa5   :  { %1789 = vmatpush1.msra.mxu1 %v5135_v13  ;;  %1862 = vmatprep.subr.mxu0 %v4926_v14  ;;  %v178_v14 = vld [vmem:[%s6531_s5] sm:$0xf] }
  0xa6   :  { %1790 = vmatprep.subr.mxu1 %v5140_v4  ;;  %v5238_v62 = vrot.slane %v178_v14, %v6572_v18 }
  0xa7   :  { %1791 = vmatpush1.msra.mxu1 %v5145_v0 }
  0xa8   :  { %1792 = vmatprep.subr.mxu1 %v5149_v9 }
  0xa9   :  { %1793 = vmatpush1.msra.mxu1 %v5152_v1 }
  0xaa   :  { %1794 = vmatprep.subr.mxu1 %v5157_v19 }
  0xab   :  { %1795 = vmatpush1.msra.mxu1 %v5162_v20 }
  0xac   :  { %1933 = vmatprep.subr.mxu1 %v4992_v31  ;;  %v5244_v31 = vrot.slane %v178_v14, %v6577_v57  ;;  %v6592_v57 = vsub.s32 2, %v5229_v15 }
 0x102   :  { %v5240_v19 = vpop.f32.mrf.mxu1 }
 0x103   :  { %v566_v20 = vpop.f32.mrf.mxu0 }
 0x104   :  { %v5246_v17 = vpop.f32.mrf.mxu1  ;;  %v5249_v60 = vadd.f32 %v566_v20, %v5238_v62  ;;  %v6595_v20 = vsub.s32 3, %v5229_v15 }
 0x105   :  { %v568_v1 = vpop.f32.mrf.mxu0 }
 0x106   :  { %6724 = vst [vmem:[#allocation43_spill] sm:$0xff] %v5249_v60  ;;  %v5251_v58 = vpop.f32.mrf.mxu1  ;;  %v5254_v9 = vadd.f32 %v568_v1, %v5244_v31 }
 0x107   :  { %v713_v18 = vpop.f32.mrf.mxu0 }
 0x108   :  { %6725 = vst [vmem:[#allocation44_spill] sm:$0xff] %v5254_v9  ;;  %v5256_v55 = vpop.f32.mrf.mxu1  ;;  %v5259_v0 = vadd.f32 %v713_v18, %v5238_v62  ;;  %v193_v18 = vrot.slane %v178_v14, %v6592_v57 }
 0x109   :  { %v715_v53 = vpop.f32.mrf.mxu0 }
 0x10a   :  { %6726 = vst [vmem:[#allocation45_spill] sm:$0xff] %v5259_v0  ;;  %v419_v4 = vpop.f32.mrf.mxu1  ;;  %v5263_v51 = vadd.f32 %v715_v53, %v5244_v31 }
 0x10b   :  { %v5267_v60 = vadd.f32 %v419_v4, %v5238_v62  ;;  %v860_v1 = vpop.f32.mrf.mxu0  ;;  %v197_v4 = vrot.slane %v178_v14, %v6595_v20 }
 0x10c   :  { %6727 = vst [vmem:[#allocation46_spill] sm:$0xff] %v5263_v51  ;;  %v421_v9 = vpop.f32.mrf.mxu1  ;;  %v5270_v13 = vadd.f32 %v860_v1, %v5238_v62 }
 0x10d   :  { %6728 = vst [vmem:[#allocation47_spill] sm:$0xff] %v5267_v60  ;;  %v5275_v0 = vadd.f32 %v421_v9, %v5244_v31  ;;  %v862_v49 = vpop.f32.mrf.mxu0 }
 0x10e   :  { %6729 = vst [vmem:[#allocation48_spill] sm:$0xff] %v5270_v13  ;;  %v490_v12 = vpop.f32.mrf.mxu1  ;;  %v5278_v53 = vadd.f32 %v862_v49, %v5244_v31 }
 0x10f   :  { %6730 = vst [vmem:[#allocation49_spill] sm:$0xff] %v5275_v0  ;;  %v5282_v51 = vadd.f32 %v490_v12, %v193_v18  ;;  %v1007_v60 = vpop.f32.mrf.mxu0 }
 0x110   :  { %6731 = vst [vmem:[#allocation50_spill] sm:$0xff] %v5278_v53  ;;  %v492_v47 = vpop.f32.mrf.mxu1  ;;  %v5285_v1 = vadd.f32 %v1007_v60, %v5238_v62 }
 0x111   :  { %6732 = vst [vmem:[#allocation51_spill] sm:$0xff] %v5282_v51  ;;  %v5287_v13 = vadd.f32 %v492_v47, %v197_v4  ;;  %v1009_v57 = vpop.f32.mrf.mxu0 }
 0x112   :  { %6733 = vst [vmem:[#allocation52_spill] sm:$0xff] %v5285_v1  ;;  %v637_v9 = vpop.f32.mrf.mxu1  ;;  %v5290_v0 = vadd.f32 %v1009_v57, %v5244_v31 }
 0x113   :  { %6734 = vst [vmem:[#allocation53_spill] sm:$0xff] %v5287_v13  ;;  %v5292_v11 = vadd.f32 %v637_v9, %v193_v18  ;;  %v1154_v49 = vpop.f32.mrf.mxu0 }
 0x114   :  { %6735 = vst [vmem:[#allocation54_spill] sm:$0xff] %v5290_v0  ;;  %v639_v53 = vpop.f32.mrf.mxu1  ;;  %v5295_v14 = vadd.f32 %v1154_v49, %v5238_v62 }
 0x115   :  { %6736 = vst [vmem:[#allocation55_spill] sm:$0xff] %v5292_v11  ;;  %v5297_v12 = vadd.f32 %v639_v53, %v197_v4  ;;  %v1156_v20 = vpop.f32.mrf.mxu0 }
 0x116   :  { %6737 = vst [vmem:[#allocation56_spill] sm:$0xff] %v5295_v14  ;;  %v784_v15 = vpop.f32.mrf.mxu1  ;;  %v5300_v60 = vadd.f32 %v1156_v20, %v5244_v31 }
 0x117   :  { %6738 = vst [vmem:[#allocation57_spill] sm:$0xff] %v5297_v12  ;;  %v5302_v47 = vadd.f32 %v784_v15, %v193_v18  ;;  %v1301_v1 = vpop.f32.mrf.mxu0 }
 0x118   :  { %6739 = vst [vmem:[#allocation58_spill] sm:$0xff] %v5300_v60  ;;  %v786_v13 = vpop.f32.mrf.mxu1  ;;  %v5305_v57 = vadd.f32 %v1301_v1, %v5238_v62 }
 0x119   :  { %6740 = vst [vmem:[#allocation59_spill] sm:$0xff] %v5302_v47  ;;  %v5307_v9 = vadd.f32 %v786_v13, %v197_v4  ;;  %v1303_v0 = vpop.f32.mrf.mxu0 }
 0x11a   :  { %6741 = vst [vmem:[#allocation60_spill] sm:$0xff] %v5305_v57  ;;  %v931_v11 = vpop.f32.mrf.mxu1  ;;  %v5310_v49 = vadd.f32 %v1303_v0, %v5244_v31 }
 0x11b   :  { %6742 = vst [vmem:[#allocation61_spill] sm:$0xff] %v5307_v9  ;;  %v5312_v53 = vadd.f32 %v931_v11, %v193_v18  ;;  %v1448_v14 = vpop.f32.mrf.mxu0 }
 0x11c   :  { %6743 = vst [vmem:[#allocation62_spill] sm:$0xff] %v5310_v49  ;;  %v933_v12 = vpop.f32.mrf.mxu1  ;;  %v5315_v20 = vadd.f32 %v1448_v14, %v5238_v62 }
 0x11d   :  { %6744 = vst [vmem:[#allocation63_spill] sm:$0xff] %v5312_v53  ;;  %v5317_v15 = vadd.f32 %v933_v12, %v197_v4  ;;  %v1450_v60 = vpop.f32.mrf.mxu0 }
 0x11e   :  { %6745 = vst [vmem:[#allocation64_spill] sm:$0xff] %v5315_v20  ;;  %v1078_v47 = vpop.f32.mrf.mxu1  ;;  %v5320_v1 = vadd.f32 %v1450_v60, %v5244_v31 }
 0x11f   :  { %6746 = vst [vmem:[#allocation65_spill] sm:$0xff] %v5317_v15  ;;  %v5322_v13 = vadd.f32 %v1078_v47, %v193_v18 }
 0x120   :  { %6747 = vst [vmem:[#allocation66_spill] sm:$0xff] %v5320_v1  ;;  %v1080_v57 = vpop.f32.mrf.mxu1 }
 0x121   :  { %6748 = vst [vmem:[#allocation67_spill] sm:$0xff] %v5322_v13  ;;  %v5324_v9 = vadd.f32 %v1080_v57, %v197_v4 }
 0x122   :  { %v1225_v0 = vpop.f32.mrf.mxu1 }
 0x123   :  { %6749 = vst [vmem:[#allocation68_spill] sm:$0xff] %v5324_v9  ;;  %v5326_v11 = vadd.f32 %v1225_v0, %v193_v18  ;;  %v275_v0 = vadd.f32 %v5246_v17, %v5244_v31 }
 0x124   :  { %v1227_v49 = vpop.f32.mrf.mxu1 }
 0x125   :  { %6750 = vst [vmem:[#allocation69_spill] sm:$0xff] %v5326_v11  ;;  %v5328_v53 = vadd.f32 %v1227_v49, %v197_v4  ;;  %v273_v49 = vadd.f32 %v5240_v19, %v5238_v62  ;;  %v1689_v62 = vpop.permute.xlu0 %1688 }
 0x126   :  { %v1372_v14 = vpop.f32.mrf.mxu1  ;;  %vm1690_vm6 = vcmp.eq.s32.totalorder %v1689_v62, 1  ;;  %v6767_v62 = vld [vmem:[#allocation26_spill] sm:$0xff] }
 0x127   :  { %6751 = vst [vmem:[#allocation70_spill] sm:$0xff] %v5328_v53  ;;  %v5330_v20 = vadd.f32 %v1372_v14, %v193_v18 }
 0x128   :  { %v1374_v12 = vpop.f32.mrf.mxu1 }
 0x129   :  { %6752 = vst [vmem:[#allocation71_spill] sm:$0xff] %v5330_v20  ;;  %v5332_v15 = vadd.f32 %v1374_v12, %v197_v4  ;;  %v344_v12 = vadd.f32 %v5251_v58, %v193_v18 }
 0x12b   :  { %6753 = vst [vmem:[#allocation72_spill] sm:$0xff] %v5332_v15  ;;  %v1519_v51 = vpop.f32.mrf.mxu1 }
 0x12c   :  { %v5334_v60 = vadd.f32 %v1519_v51, %v193_v18 }
 0x12d   :  { %v1521_v47 = vpop.f32.mrf.mxu1 }
 0x12e   :  { %6754 = vst [vmem:[#allocation73_spill] sm:$0xff] %v5334_v60  ;;  %v5336_v1 = vadd.f32 %v1521_v47, %v197_v4 }
 0x130   :  { %6755 = vst [vmem:[#allocation74_spill] sm:$0xff] %v5336_v1  ;;  %v346_v1 = vadd.f32 %v5256_v55, %v197_v4 }
 0x13b   :  { %v1590_v57 = vpop.f32.mrf.mxu0 }
 0x13c   :  { %v1666_v14 = vadd.f32 %v1590_v57, %v273_v49 }
 0x13d   :  { %v1592_v9 = vpop.f32.mrf.mxu0 }
 0x13e   :  { %v1667_v53 = vadd.f32 %v1592_v9, %v275_v0 }
 0x140   :  { %4413 = vtanh.f32 %v1667_v53 }
 0x141   :  { %4415 = vtanh.f32 %v1666_v14  ;;  %v6760_v14 = vld [vmem:[#allocation33_spill] sm:$0xff] }
 0x14c   :  { %v1661_v15 = vpop.f32.mrf.mxu1 }
 0x14d   :  { %v1668_v51 = vadd.f32 %v1661_v15, %v344_v12  ;;  %v4414_v60 = vpop.eup %4413  ;;  %v6761_v12 = vld [vmem:[#allocation23_spill] sm:$0xff] }
 0x14e   :  { %v1663_v47 = vpop.f32.mrf.mxu1  ;;  %v4416_v20 = vpop.eup %4415  ;;  %v1676_v11 = vadd.f32 1.0, %v4414_v60 }
 0x14f   :  { %4417 = vtanh.f32 %v1668_v51  ;;  %v1669_v13 = vadd.f32 %v1663_v47, %v346_v1  ;;  %v1674_v31 = vadd.f32 1.0, %v4416_v20  ;;  %v6756_v20 = vld [vmem:[#allocation17_spill] sm:$0xff]  ;;  %v6757_v1 = vld [vmem:[#allocation18_spill] sm:$0xff]  ;;  %v6763_v47 = vld [vmem:[#allocation24_spill] sm:$0xff] }
 0x150   :  { %v1677_v17 = vmul.f32 0.5, %v1676_v11  ;;  %v6759_v11 = vld [vmem:[#allocation20_spill] sm:$0xff]  ;;  %v6762_v51 = vld [vmem:[#allocation34_spill] sm:$0xff] }
 0x151   :  { %4419 = vtanh.f32 %v1669_v13  ;;  %v1675_v19 = vmul.f32 0.5, %v1674_v31  ;;  %v6758_v13 = vld [vmem:[#allocation19_spill] sm:$0xff] }
 0x152   :  { %v1680_v53 = vmul.f32 0.0, %v1677_v17  ;;  %v6764_v31 = vld [vmem:[#allocation35_spill] sm:$0xff]  ;;  %v6765_v17 = vld [vmem:[#allocation25_spill] sm:$0xff] }
 0x15c   :  { %v4418_v9 = vpop.eup %4417 }
 0x15d   :  { %v1681_v57 = vmul.f32 %v4418_v9, %v1675_v19  ;;  %v6766_v19 = vld [vmem:[#allocation36_spill] sm:$0xff]  ;;  %v6768_v9 = vld [vmem:[#allocation37_spill] sm:$0xff] }
 0x15e   :  { %v4420_v15 = vpop.eup %4419 }
 0x15f   :  { %v1682_v58 = vadd.f32 %v1681_v57, %v1680_v53  ;;  %v1678_v0 = vadd.f32 1.0, %v4420_v15  ;;  %v6769_v53 = vld [vmem:[#allocation27_spill] sm:$0xff]  ;;  %v6770_v57 = vld [vmem:[#allocation38_spill] sm:$0xff] }
 0x160   :  { %v6772_v15 = vld [vmem:[#allocation39_spill] sm:$0xff] }
 0x161   :  { %4421 = vtanh.f32 %v1682_v58  ;;  %v5344_v18 = vsel %vm1690_vm6, %v1682_v58, 0.0  ;;  %v1679_v49 = vmul.f32 0.5, %v1678_v0  ;;  %v6771_v58 = vld [vmem:[#allocation29_spill] sm:$0xff]  ;;  %v6773_v0 = vld [vmem:[#allocation30_spill] sm:$0xff] }
 0x16e   :  { %v4422_v55 = vpop.eup %4421 }
 0x16f   :  { %v1684_v4 = vmul.f32 %v4422_v55, %v1679_v49  ;;  %v6774_v49 = vld [vmem:[#allocation40_spill] sm:$0xff]  ;;  %v6775_v55 = vld [vmem:[#allocation31_spill] sm:$0xff] }
 0x171   :  { %v5346_v60 = vsel %vm1690_vm6, %v1684_v4, 0.0  ;;  %4341 = vmatmul.mubr.msk.f32.vlgmr.msra.gmra.mxu0 %vm1690_vm6, %v1684_v4  ;;  %4342 = vmatmul.mubr.msk.f32.vlgmr.msra.gmra.mxu1 %vm1690_vm6, %v1684_v4  ;;  %v6776_v4 = vmov 0.0   ;;  %vm4746_vm6 = vmmov 0  }
 0x172   :  { %1863 = vmatpush1.msra.mxu0 %v4934_v16  ;;  %1934 = vmatpush1.msra.mxu1 %v5002_v34 }
 0x173   :  { %1864 = vmatprep.subr.mxu0 %v6756_v20  ;;  %1935 = vmatprep.subr.mxu1 %v5008_v36 }
 0x174   :  { %1865 = vmatpush1.msra.mxu0 %v6757_v1  ;;  %1936 = vmatpush1.msra.mxu1 %v5014_v38 }
 0x175   :  { %1866 = vmatprep.subr.mxu0 %v6758_v13  ;;  %1937 = vmatprep.subr.mxu1 %v5020_v40 }
 0x176   :  { %1867 = vmatpush1.msra.mxu0 %v6759_v11  ;;  %1938 = vmatpush1.msra.mxu1 %v5026_v42 }
 0x177   :  { %1868 = vmatprep.subr.mxu0 %v4954_v21  ;;  %1939 = vmatprep.subr.mxu1 %v5032_v44 }
 0x178   :  { %1869 = vmatpush1.msra.mxu0 %v4958_v22  ;;  %1940 = vmatpush1.msra.mxu1 %v5038_v46 }
 0x179   :  { %1870 = vmatprep.subr.mxu0 %v4962_v23  ;;  %1941 = vmatprep.subr.mxu1 %v5044_v48 }
 0x17a   :  { %1871 = vmatpush1.msra.mxu0 %v4966_v24  ;;  %1942 = vmatpush1.msra.mxu1 %v5050_v50 }
 0x17b   :  { %1872 = vmatprep.subr.mxu0 %v4970_v25  ;;  %1943 = vmatprep.subr.mxu1 %v5056_v52 }
 0x17c   :  { %1873 = vmatpush1.msra.mxu0 %v4974_v26  ;;  %1944 = vmatpush1.msra.mxu1 %v5062_v54 }
 0x17d   :  { %1874 = vmatprep.subr.mxu0 %v4978_v27  ;;  %1945 = vmatprep.subr.mxu1 %v5068_v56 }
 0x17e   :  { %1875 = vmatpush1.msra.mxu0 %v4982_v28  ;;  %1946 = vmatpush1.msra.mxu1 %v5079_v59 }
 0x17f   :  { %1876 = vmatprep.subr.mxu0 %v4986_v29  ;;  %1947 = vmatprep.subr.mxu1 %v5085_v61 }
 0x180   :  { %1877 = vmatpush1.msra.mxu0 %v4990_v30  ;;  %1948 = vmatpush1.msra.mxu1 %v5094_v63 }
 0x181   :  { %1878 = vmatprep.subr.mxu0 %v4996_v32  ;;  %1949 = vmatprep.subr.mxu1 %v5098_v2 }
 0x182   :  { %1879 = vmatpush1.msra.mxu0 %v5000_v33  ;;  %1950 = vmatpush1.msra.mxu1 %v5102_v3 }
 0x183   :  { %1880 = vmatprep.subr.mxu0 %v5006_v35  ;;  %1951 = vmatprep.subr.mxu1 %v5107_v5 }
 0x184   :  { %1881 = vmatpush1.msra.mxu0 %v5012_v37  ;;  %1952 = vmatpush1.msra.mxu1 %v5111_v6 }
 0x185   :  { %1882 = vmatprep.subr.mxu0 %v5018_v39  ;;  %1953 = vmatprep.subr.mxu1 %v5115_v7 }
 0x186   :  { %1883 = vmatpush1.msra.mxu0 %v5024_v41  ;;  %1954 = vmatpush1.msra.mxu1 %v5118_v8 }
 0x187   :  { %1884 = vmatprep.subr.mxu0 %v5030_v43  ;;  %1955 = vmatprep.subr.mxu1 %v5123_v10 }
 0x188   :  { %1885 = vmatpush1.msra.mxu0 %v5036_v45  ;;  %1956 = vmatpush1.msra.mxu1 %v6760_v14 }
 0x189   :  { %1886 = vmatprep.subr.mxu0 %v6761_v12  ;;  %1957 = vmatprep.subr.mxu1 %v6762_v51  ;;  %v6785_v51 = vld [vmem:[#allocation53_spill] sm:$0xff] }
 0x18a   :  { %1887 = vmatpush1.msra.mxu0 %v6763_v47  ;;  %1958 = vmatpush1.msra.mxu1 %v6764_v31  ;;  %v6784_v31 = vld [vmem:[#allocation49_spill] sm:$0xff] }
 0x18b   :  { %1888 = vmatprep.subr.mxu0 %v6765_v17  ;;  %1959 = vmatprep.subr.mxu1 %v6766_v19  ;;  %v6777_v19 = vld [vmem:[#allocation41_spill] sm:$0xff] }
 0x18c   :  { %1889 = vmatpush1.msra.mxu0 %v6767_v62  ;;  %1960 = vmatpush1.msra.mxu1 %v6768_v9  ;;  %v6778_v9 = vld [vmem:[#allocation16_spill] sm:$0xff] }
 0x18d   :  { %1890 = vmatprep.subr.mxu0 %v6769_v53  ;;  %1961 = vmatprep.subr.mxu1 %v6770_v57  ;;  %v6779_v53 = vld [vmem:[#allocation21_spill] sm:$0xff]  ;;  %v6780_v57 = vld [vmem:[#allocation28_spill] sm:$0xff] }
 0x18e   :  { %1891 = vmatpush1.msra.mxu0 %v6771_v58  ;;  %1962 = vmatpush1.msra.mxu1 %v6772_v15  ;;  %vm2023_vm7 = vcmp.gt.s32.totalorder %v6780_v57, 2  ;;  %vm2192_vm8 = vcmp.gt.s32.totalorder %v6780_v57, 3  ;;  %v6781_v15 = vmov 0   ;;  %vm2530_vm9 = vcmp.gt.s32.totalorder %v6780_v57, 5 }
 0x18f   :  { %1892 = vmatprep.subr.mxu0 %v6773_v0  ;;  %1963 = vmatprep.subr.mxu1 %v6774_v49  ;;  %v2024_v0 = vsel %vm2023_vm7, 1, %v6781_v15  ;;  %v2193_v49 = vsel %vm2192_vm8, 1, %v6781_v15  ;;  %vm2868_vm10 = vcmp.gt.s32.totalorder %v6780_v57, 7  ;;  %vm4202_vm7 = vcmask 1042432  }
 0x190   :  { %1893 = vmatpush1.msra.mxu0 %v6775_v55  ;;  %1926 = vmatprep.mubr.f32.mxu0 %v6776_v4  ;;  %v6782_v55 = vld [vmem:[#allocation47_spill] sm:$0xff] }
 0x191   :  { %1964 = vmatpush1.msra.mxu1 %v6777_v19  ;;  %1997 = vmatprep.mubr.f32.mxu1 %v6776_v4  ;;  %v2531_v19 = vsel %vm2530_vm9, 1, %v6781_v15 }
 0x192   :  { %2031 = vmatprep.subr.mxu0 %v6778_v9  ;;  %2102 = vmatprep.subr.mxu1 %v6779_v53  ;;  %v2869_v9 = vsel %vm2868_vm10, 1, %v6781_v15 }
 0x193   :  { %2026 = vperm.xlu1 %4412, %v2024_v0   ;;  %v6783_v0 = vld [vmem:[#allocation51_spill] sm:$0xff] }
 0x197   :  { %2195 = vperm.xlu1 %4412, %v2193_v49  }
 0x19b   :  { %2533 = vperm.xlu1 %4412, %v2531_v19  }
 0x19f   :  { %2871 = vperm.xlu1 %4412, %v2869_v9  }
 0x231   :  { %v1759_v53 = vpop.f32.mrf.mxu0  ;;  %v1830_v4 = vpop.f32.mrf.mxu1 }
 0x232   :  { %v1835_v58 = vadd.f32 %v1759_v53, %v6782_v55  ;;  %v1837_v17 = vadd.f32 %v1830_v4, %v6783_v0  ;;  %v1858_v55 = vpop.permute.xlu0 %1857 }
 0x233   :  { %v1761_v62 = vpop.f32.mrf.mxu0  ;;  %v1832_v49 = vpop.f32.mrf.mxu1  ;;  %vm1859_vm11 = vcmp.eq.s32.totalorder %v1858_v55, 1 }
 0x234   :  { %4423 = vtanh.f32 %v1835_v58  ;;  %v1836_v47 = vadd.f32 %v1761_v62, %v6784_v31  ;;  %v1838_v12 = vadd.f32 %v1832_v49, %v6785_v51 }
 0x236   :  { %4425 = vtanh.f32 %v1836_v47 }
 0x237   :  { %4427 = vtanh.f32 %v1837_v17 }
 0x238   :  { %4429 = vtanh.f32 %v1838_v12  ;;  %v6809_v12 = vld [vmem:[#allocation55_spill] sm:$0xff] }
 0x241   :  { %v4424_v57 = vpop.eup %4423 }
 0x242   :  { %v1843_v19 = vadd.f32 1.0, %v4424_v57  ;;  %v6810_v57 = vld [vmem:[#allocation44_spill] sm:$0xff] }
 0x243   :  { %v4426_v14 = vpop.eup %4425 }
 0x244   :  { %v1844_v15 = vmul.f32 0.5, %v1843_v19  ;;  %v1845_v9 = vadd.f32 1.0, %v4426_v14  ;;  %v4428_v45 = vpop.eup %4427 }
 0x245   :  { %v4430_v31 = vpop.eup %4429 }
 0x246   :  { %v1846_v10 = vmul.f32 0.5, %v1845_v9  ;;  %v1850_v53 = vmul.f32 %v4428_v45, %v1844_v15  ;;  %v1847_v51 = vadd.f32 1.0, %v4430_v31  ;;  %v6805_v45 = vld [vmem:[#allocation41_spill] sm:$0xff] }
 0x247   :  { %v6811_v9 = vld [vmem:[#allocation57_spill] sm:$0xff] }
 0x248   :  { %v1849_v58 = vmul.f32 %v1846_v10, %v5344_v18  ;;  %v1848_v17 = vmul.f32 0.5, %v1847_v51  ;;  %v5499_v10 = vld [vmem:[#allocation2 + $0x1e8] sm:$0xff] }
 0x249   :  { %6806 = vst [vmem:[#allocation17_spill] sm:$0xff] %v5499_v10 }
 0x24a   :  { %v1851_v4 = vadd.f32 %v1850_v53, %v1849_v58 }
 0x24c   :  { %4431 = vtanh.f32 %v1851_v4  ;;  %v5428_v47 = vsel %vm1859_vm11, %v1851_v4, %v5344_v18  ;;  %v6807_v18 = vld [vmem:[#allocation21_spill] sm:$0xff] }
 0x259   :  { %v4432_v62 = vpop.eup %4431 }
 0x25a   :  { %v1853_v0 = vmul.f32 %v4432_v62, %v1848_v17 }
 0x25c   :  { %v5431_v14 = vsel %vm1859_vm11, %v1853_v0, %v5346_v60  ;;  %v2027_v0 = vpop.permute.xlu1 %2026 }
 0x25d   :  { %1927 = vmatmul.mubr.f32.vlgmr.msra.gmra.mxu0 %v5431_v14  ;;  %1998 = vmatmul.mubr.f32.vlgmr.msra.gmra.mxu1 %v5431_v14  ;;  %vm2028_vm12 = vcmp.eq.s32.totalorder %v2027_v0, 1 }
 0x25e   :  { %2032 = vmatpush1.msra.mxu0 %v4934_v16  ;;  %2103 = vmatpush1.msra.mxu1 %v5002_v34  ;;  %v6786_v16 = vld [vmem:[#allocation32_spill] sm:$0xff]  ;;  %v6799_v34 = vld [vmem:[#allocation29_spill] sm:$0xff] }
 0x25f   :  { %2033 = vmatprep.subr.mxu0 %v6756_v20  ;;  %2104 = vmatprep.subr.mxu1 %v5008_v36 }
 0x260   :  { %2034 = vmatpush1.msra.mxu0 %v6757_v1  ;;  %2105 = vmatpush1.msra.mxu1 %v5014_v38  ;;  %v6808_v1 = vld [vmem:[#allocation43_spill] sm:$0xff] }
 0x261   :  { %2035 = vmatprep.subr.mxu0 %v6758_v13  ;;  %2106 = vmatprep.subr.mxu1 %v5020_v40 }
 0x262   :  { %2036 = vmatpush1.msra.mxu0 %v6759_v11  ;;  %2107 = vmatpush1.msra.mxu1 %v5026_v42 }
 0x263   :  { %2037 = vmatprep.subr.mxu0 %v4954_v21  ;;  %2108 = vmatprep.subr.mxu1 %v5032_v44  ;;  %v6787_v21 = vld [vmem:[#allocation22_spill] sm:$0xff] }
 0x264   :  { %2038 = vmatpush1.msra.mxu0 %v4958_v22  ;;  %2109 = vmatpush1.msra.mxu1 %v5038_v46  ;;  %v6788_v22 = vld [vmem:[#allocation33_spill] sm:$0xff] }
 0x265   :  { %2039 = vmatprep.subr.mxu0 %v4962_v23  ;;  %2110 = vmatprep.subr.mxu1 %v5044_v48  ;;  %v6789_v23 = vld [vmem:[#allocation23_spill] sm:$0xff] }
 0x266   :  { %2040 = vmatpush1.msra.mxu0 %v4966_v24  ;;  %2111 = vmatpush1.msra.mxu1 %v5050_v50  ;;  %v6790_v24 = vld [vmem:[#allocation34_spill] sm:$0xff] }
 0x267   :  { %2041 = vmatprep.subr.mxu0 %v4970_v25  ;;  %2112 = vmatprep.subr.mxu1 %v5056_v52  ;;  %v6791_v25 = vld [vmem:[#allocation24_spill] sm:$0xff] }
 0x268   :  { %2042 = vmatpush1.msra.mxu0 %v4974_v26  ;;  %2113 = vmatpush1.msra.mxu1 %v5062_v54  ;;  %v6792_v26 = vld [vmem:[#allocation35_spill] sm:$0xff] }
 0x269   :  { %2043 = vmatprep.subr.mxu0 %v4978_v27  ;;  %2114 = vmatprep.subr.mxu1 %v5068_v56  ;;  %v6793_v27 = vld [vmem:[#allocation25_spill] sm:$0xff] }
 0x26a   :  { %2044 = vmatpush1.msra.mxu0 %v4982_v28  ;;  %2115 = vmatpush1.msra.mxu1 %v5079_v59  ;;  %v6794_v28 = vld [vmem:[#allocation36_spill] sm:$0xff] }
 0x26b   :  { %2045 = vmatprep.subr.mxu0 %v4986_v29  ;;  %2116 = vmatprep.subr.mxu1 %v5085_v61  ;;  %v6795_v29 = vld [vmem:[#allocation26_spill] sm:$0xff] }
 0x26c   :  { %2046 = vmatpush1.msra.mxu0 %v4990_v30  ;;  %2117 = vmatpush1.msra.mxu1 %v5094_v63  ;;  %v6796_v30 = vld [vmem:[#allocation37_spill] sm:$0xff] }
 0x26d   :  { %2047 = vmatprep.subr.mxu0 %v4996_v32  ;;  %2118 = vmatprep.subr.mxu1 %v5098_v2  ;;  %v6797_v32 = vld [vmem:[#allocation27_spill] sm:$0xff] }
 0x26e   :  { %2048 = vmatpush1.msra.mxu0 %v5000_v33  ;;  %2119 = vmatpush1.msra.mxu1 %v5102_v3  ;;  %v6798_v33 = vld [vmem:[#allocation38_spill] sm:$0xff] }
 0x26f   :  { %2049 = vmatprep.subr.mxu0 %v5006_v35  ;;  %2120 = vmatprep.subr.mxu1 %v5107_v5  ;;  %v6800_v35 = vld [vmem:[#allocation39_spill] sm:$0xff] }
 0x270   :  { %2050 = vmatpush1.msra.mxu0 %v5012_v37  ;;  %2121 = vmatpush1.msra.mxu1 %v5111_v6  ;;  %v6801_v37 = vld [vmem:[#allocation30_spill] sm:$0xff] }
 0x271   :  { %2051 = vmatprep.subr.mxu0 %v5018_v39  ;;  %2122 = vmatprep.subr.mxu1 %v5115_v7  ;;  %v6802_v39 = vld [vmem:[#allocation40_spill] sm:$0xff] }
 0x272   :  { %2052 = vmatpush1.msra.mxu0 %v5024_v41  ;;  %2123 = vmatpush1.msra.mxu1 %v5118_v8  ;;  %v6803_v41 = vld [vmem:[#allocation31_spill] sm:$0xff] }
 0x273   :  { %2053 = vmatprep.subr.mxu0 %v5030_v43  ;;  %2124 = vmatprep.subr.mxu1 %v6786_v16  ;;  %v6804_v43 = vmov 0.0  }
 0x274   :  { %2054 = vmatpush1.msra.mxu0 %v6787_v21  ;;  %2125 = vmatpush1.msra.mxu1 %v6788_v22 }
 0x275   :  { %2055 = vmatprep.subr.mxu0 %v6789_v23  ;;  %2126 = vmatprep.subr.mxu1 %v6790_v24 }
 0x276   :  { %2056 = vmatpush1.msra.mxu0 %v6791_v25  ;;  %2127 = vmatpush1.msra.mxu1 %v6792_v26 }
 0x277   :  { %2057 = vmatprep.subr.mxu0 %v6793_v27  ;;  %2128 = vmatprep.subr.mxu1 %v6794_v28 }
 0x278   :  { %2058 = vmatpush1.msra.mxu0 %v6795_v29  ;;  %2129 = vmatpush1.msra.mxu1 %v6796_v30 }
 0x279   :  { %2059 = vmatprep.subr.mxu0 %v6797_v32  ;;  %2130 = vmatprep.subr.mxu1 %v6798_v33 }
 0x27a   :  { %2060 = vmatpush1.msra.mxu0 %v6799_v34  ;;  %2131 = vmatpush1.msra.mxu1 %v6800_v35 }
 0x27b   :  { %2061 = vmatprep.subr.mxu0 %v6801_v37  ;;  %2132 = vmatprep.subr.mxu1 %v6802_v39 }
 0x27c   :  { %2062 = vmatpush1.msra.mxu0 %v6803_v41  ;;  %2095 = vmatprep.mubr.f32.mxu0 %v6804_v43 }
 0x27d   :  { %2133 = vmatpush1.msra.mxu1 %v6805_v45  ;;  %2166 = vmatprep.mubr.f32.mxu1 %v6804_v43 }
 0x27e   :  { %2200 = vmatprep.subr.mxu0 %v5499_v10  ;;  %2271 = vmatprep.subr.mxu1 %v6807_v18 }
 0x31d   :  { %v1928_v60 = vpop.f32.mrf.mxu0  ;;  %v1999_v20 = vpop.f32.mrf.mxu1 }
 0x31e   :  { %v2004_v13 = vadd.f32 %v1928_v60, %v6808_v1  ;;  %v2006_v49 = vadd.f32 %v1999_v20, %v6809_v12  ;;  %v5516_v60 = vld [vmem:[#allocation2 + $0x1e0] sm:$0xff]  ;;  %v5519_v20 = vld [vmem:[#allocation2 + $0x1f0] sm:$0xff]  ;;  %v5530_v1 = vld [vmem:[#allocation2 + $0x1a8] sm:$0xff] }
 0x31f   :  { %v1930_v11 = vpop.f32.mrf.mxu0  ;;  %v2001_v15 = vpop.f32.mrf.mxu1  ;;  %v6822_v12 = vld [vmem:[#allocation45_spill] sm:$0xff] }
 0x320   :  { %4433 = vtanh.f32 %v2004_v13  ;;  %v2005_v19 = vadd.f32 %v1930_v11, %v6810_v57  ;;  %v2007_v53 = vadd.f32 %v2001_v15, %v6811_v9  ;;  %v5534_v13 = vld [vmem:[#allocation2 + $0x1a0] sm:$0xff]  ;;  %v5538_v11 = vld [vmem:[#allocation2 + $0x188] sm:$0xff]  ;;  %v6824_v15 = vld [vmem:[#allocation46_spill] sm:$0xff] }
 0x321   :  { %v6823_v57 = vld [vmem:[#allocation59_spill] sm:$0xff] }
 0x322   :  { %4435 = vtanh.f32 %v2005_v19 }
 0x323   :  { %4437 = vtanh.f32 %v2006_v49 }
 0x324   :  { %4439 = vtanh.f32 %v2007_v53  ;;  %v6825_v53 = vld [vmem:[#allocation61_spill] sm:$0xff] }
 0x32d   :  { %v4434_v58 = vpop.eup %4433 }
 0x32e   :  { %v2012_v55 = vadd.f32 1.0, %v4434_v58 }
 0x32f   :  { %v4436_v4 = vpop.eup %4435 }
 0x330   :  { %v2013_v31 = vmul.f32 0.5, %v2012_v55  ;;  %v2014_v51 = vadd.f32 1.0, %v4436_v4  ;;  %v4438_v17 = vpop.eup %4437 }
 0x331   :  { %v4440_v29 = vpop.eup %4439 }
 0x332   :  { %v2015_v62 = vmul.f32 0.5, %v2014_v51  ;;  %v2019_v21 = vmul.f32 %v4438_v17, %v2013_v31  ;;  %v2016_v32 = vadd.f32 1.0, %v4440_v29 }
 0x334   :  { %v2018_v23 = vmul.f32 %v2015_v62, %v5428_v47  ;;  %v2017_v34 = vmul.f32 0.5, %v2016_v32 }
 0x336   :  { %v2020_v25 = vadd.f32 %v2019_v21, %v2018_v23 }
 0x338   :  { %4441 = vtanh.f32 %v2020_v25  ;;  %v5509_v27 = vsel %vm2028_vm12, %v2020_v25, %v5428_v47  ;;  %v5522_v47 = vld [vmem:[#allocation2 + $0x1c8] sm:$0xff]  ;;  %v2196_v25 = vpop.permute.xlu1 %2195 }
 0x339   :  { %vm2197_vm13 = vcmp.eq.s32.totalorder %v2196_v25, 1  ;;  %v5744_v25 = vld [vmem:[#allocation2 + $0x98] sm:$0xff] }
 0x33a   :  { %6826 = vst [vmem:[#allocation22_spill] sm:$0xff] %v5744_v25 }
 0x345   :  { %v4442_v37 = vpop.eup %4441 }
 0x346   :  { %v2022_v41 = vmul.f32 %v4442_v37, %v2017_v34 }
 0x348   :  { %v5512_v18 = vsel %vm2028_vm12, %v2022_v41, %v5431_v14  ;;  %v5526_v14 = vld [vmem:[#allocation2 + $0x1c0] sm:$0xff] }
 0x349   :  { %2096 = vmatmul.mubr.f32.vlgmr.msra.gmra.mxu0 %v5512_v18  ;;  %2167 = vmatmul.mubr.f32.vlgmr.msra.gmra.mxu1 %v5512_v18 }
 0x34a   :  { %2201 = vmatpush1.msra.mxu0 %v5516_v60  ;;  %2272 = vmatpush1.msra.mxu1 %v5519_v20 }
 0x34b   :  { %2202 = vmatprep.subr.mxu0 %v5522_v47  ;;  %2273 = vmatprep.subr.mxu1 %v5008_v36  ;;  %v5542_v36 = vld [vmem:[#allocation2 + $0x180] sm:$0xff] }
 0x34c   :  { %2203 = vmatpush1.msra.mxu0 %v5526_v14  ;;  %2274 = vmatpush1.msra.mxu1 %v5014_v38  ;;  %v5546_v38 = vld [vmem:[#allocation2 + $0x168] sm:$0xff] }
 0x34d   :  { %2204 = vmatprep.subr.mxu0 %v5530_v1  ;;  %2275 = vmatprep.subr.mxu1 %v5020_v40  ;;  %v5550_v40 = vld [vmem:[#allocation2 + $0x160] sm:$0xff] }
 0x34e   :  { %2205 = vmatpush1.msra.mxu0 %v5534_v13  ;;  %2276 = vmatpush1.msra.mxu1 %v5026_v42  ;;  %v5554_v42 = vld [vmem:[#allocation2 + $0x148] sm:$0xff] }
 0x34f   :  { %2206 = vmatprep.subr.mxu0 %v5538_v11  ;;  %2277 = vmatprep.subr.mxu1 %v5032_v44  ;;  %v5558_v44 = vld [vmem:[#allocation2 + $0x140] sm:$0xff] }
 0x350   :  { %2207 = vmatpush1.msra.mxu0 %v5542_v36  ;;  %2278 = vmatpush1.msra.mxu1 %v5038_v46  ;;  %v5562_v46 = vld [vmem:[#allocation2 + $0x128] sm:$0xff] }
 0x351   :  { %2208 = vmatprep.subr.mxu0 %v5546_v38  ;;  %2279 = vmatprep.subr.mxu1 %v5044_v48  ;;  %v5566_v48 = vld [vmem:[#allocation2 + $0x120] sm:$0xff] }
 0x352   :  { %2209 = vmatpush1.msra.mxu0 %v5550_v40  ;;  %2280 = vmatpush1.msra.mxu1 %v5050_v50  ;;  %v5570_v50 = vld [vmem:[#allocation2 + $0x108] sm:$0xff] }
 0x353   :  { %2210 = vmatprep.subr.mxu0 %v5554_v42  ;;  %2281 = vmatprep.subr.mxu1 %v5056_v52  ;;  %v5574_v52 = vld [vmem:[#allocation2 + $0x100] sm:$0xff] }
 0x354   :  { %2211 = vmatpush1.msra.mxu0 %v5558_v44  ;;  %2282 = vmatpush1.msra.mxu1 %v5062_v54  ;;  %v5578_v54 = vld [vmem:[#allocation2 + $0xe8] sm:$0xff] }
 0x355   :  { %2212 = vmatprep.subr.mxu0 %v5562_v46  ;;  %2283 = vmatprep.subr.mxu1 %v5068_v56  ;;  %v5582_v56 = vld [vmem:[#allocation2 + $0xe0] sm:$0xff] }
 0x356   :  { %2213 = vmatpush1.msra.mxu0 %v5566_v48  ;;  %2284 = vmatpush1.msra.mxu1 %v5079_v59  ;;  %v5586_v59 = vld [vmem:[#allocation2 + $0xc8] sm:$0xff] }
 0x357   :  { %2214 = vmatprep.subr.mxu0 %v5570_v50  ;;  %2285 = vmatprep.subr.mxu1 %v5085_v61  ;;  %v5590_v61 = vld [vmem:[#allocation2 + $0xc0] sm:$0xff] }
 0x358   :  { %2215 = vmatpush1.msra.mxu0 %v5574_v52  ;;  %2286 = vmatpush1.msra.mxu1 %v5094_v63  ;;  %v5594_v63 = vld [vmem:[#allocation2 + $0xa8] sm:$0xff] }
 0x359   :  { %2216 = vmatprep.subr.mxu0 %v5578_v54  ;;  %2287 = vmatprep.subr.mxu1 %v5098_v2  ;;  %v5598_v2 = vld [vmem:[#allocation2 + $0xa0] sm:$0xff] }
 0x35a   :  { %2217 = vmatpush1.msra.mxu0 %v5582_v56  ;;  %2288 = vmatpush1.msra.mxu1 %v5102_v3  ;;  %v5602_v3 = vld [vmem:[#allocation2 + $0x88] sm:$0xff] }
 0x35b   :  { %2218 = vmatprep.subr.mxu0 %v5586_v59  ;;  %2289 = vmatprep.subr.mxu1 %v5107_v5  ;;  %v5606_v5 = vld [vmem:[#allocation2 + $0x80] sm:$0xff] }
 0x35c   :  { %2219 = vmatpush1.msra.mxu0 %v5590_v61  ;;  %2290 = vmatpush1.msra.mxu1 %v5111_v6  ;;  %6812 = vst [vmem:[#allocation18_spill] sm:$0xff] %v5606_v5  ;;  %v5610_v6 = vld [vmem:[#allocation2 + $0x68] sm:$0xff] }
 0x35d   :  { %2220 = vmatprep.subr.mxu0 %v5594_v63  ;;  %2291 = vmatprep.subr.mxu1 %v5115_v7  ;;  %6813 = vst [vmem:[#allocation19_spill] sm:$0xff] %v5610_v6  ;;  %v5614_v7 = vld [vmem:[#allocation2 + $0x60] sm:$0xff] }
 0x35e   :  { %2221 = vmatpush1.msra.mxu0 %v5598_v2  ;;  %2292 = vmatpush1.msra.mxu1 %v5118_v8  ;;  %6814 = vst [vmem:[#allocation20_spill] sm:$0xff] %v5614_v7  ;;  %v5618_v8 = vld [vmem:[#allocation2 + $0x48] sm:$0xff] }
 0x35f   :  { %2222 = vmatprep.subr.mxu0 %v5602_v3  ;;  %2293 = vmatprep.subr.mxu1 %v6786_v16  ;;  %6815 = vst [vmem:[#allocation16_spill] sm:$0xff] %v5618_v8  ;;  %v5622_v16 = vld [vmem:[#allocation2 + $0x40] sm:$0xff] }
 0x360   :  { %2223 = vmatpush1.msra.mxu0 %v5606_v5  ;;  %2294 = vmatpush1.msra.mxu1 %v6788_v22  ;;  %6816 = vst [vmem:[#allocation28_spill] sm:$0xff] %v5622_v16  ;;  %v5626_v22 = vld [vmem:[#allocation2 + $0x28] sm:$0xff] }
 0x361   :  { %2224 = vmatprep.subr.mxu0 %v5610_v6  ;;  %2295 = vmatprep.subr.mxu1 %v6790_v24  ;;  %6817 = vst [vmem:[#allocation47_spill] sm:$0xff] %v5626_v22  ;;  %v5630_v24 = vld [vmem:[#allocation2 + $0x20] sm:$0xff] }
 0x362   :  { %2225 = vmatpush1.msra.mxu0 %v5614_v7  ;;  %2296 = vmatpush1.msra.mxu1 %v6792_v26  ;;  %6818 = vst [vmem:[#allocation51_spill] sm:$0xff] %v5630_v24  ;;  %v5634_v26 = vld [vmem:[#allocation2 + $0x8] sm:$0xff] }
 0x363   :  { %2226 = vmatprep.subr.mxu0 %v5618_v8  ;;  %2297 = vmatprep.subr.mxu1 %v6794_v28  ;;  %6819 = vst [vmem:[#allocation49_spill] sm:$0xff] %v5634_v26  ;;  %v5638_v28 = vld [vmem:[#allocation2] sm:$0xff] }
 0x364   :  { %2227 = vmatpush1.msra.mxu0 %v5622_v16  ;;  %2298 = vmatpush1.msra.mxu1 %v6796_v30  ;;  %6820 = vst [vmem:[#allocation53_spill] sm:$0xff] %v5638_v28  ;;  %v5645_v30 = vld [vmem:[#allocation2 + $0x1f8] sm:$0xff] }
 0x365   :  { %2228 = vmatprep.subr.mxu0 %v5626_v22  ;;  %2299 = vmatprep.subr.mxu1 %v6798_v33  ;;  %6821 = vst [vmem:[#allocation32_spill] sm:$0xff] %v5645_v30 }
 0x366   :  { %2229 = vmatpush1.msra.mxu0 %v5630_v24  ;;  %2300 = vmatpush1.msra.mxu1 %v6800_v35 }
 0x367   :  { %2230 = vmatprep.subr.mxu0 %v5634_v26  ;;  %2301 = vmatprep.subr.mxu1 %v6802_v39 }
 0x368   :  { %2231 = vmatpush1.msra.mxu0 %v5638_v28  ;;  %2264 = vmatprep.mubr.f32.mxu0 %v6804_v43 }
 0x369   :  { %2302 = vmatpush1.msra.mxu1 %v6805_v45  ;;  %2335 = vmatprep.mubr.f32.mxu1 %v6804_v43 }
 0x36a   :  { %2369 = vmatprep.subr.mxu0 %v5499_v10  ;;  %2440 = vmatprep.subr.mxu1 %v5645_v30 }
 0x409   :  { %v2097_v33 = vpop.f32.mrf.mxu0  ;;  %v2168_v35 = vpop.f32.mrf.mxu1 }
 0x40a   :  { %v2173_v39 = vadd.f32 %v2097_v33, %v6822_v12  ;;  %v2175_v19 = vadd.f32 %v2168_v35, %v6823_v57  ;;  %v5680_v57 = vld [vmem:[#allocation2 + $0x198] sm:$0xff] }
 0x40b   :  { %v2099_v49 = vpop.f32.mrf.mxu0  ;;  %v2170_v45 = vpop.f32.mrf.mxu1 }
 0x40c   :  { %4443 = vtanh.f32 %v2173_v39  ;;  %v2174_v9 = vadd.f32 %v2099_v49, %v6824_v15  ;;  %v2176_v58 = vadd.f32 %v2170_v45, %v6825_v53  ;;  %v5668_v39 = vld [vmem:[#allocation2 + $0x1d0] sm:$0xff]  ;;  %v5688_v15 = vld [vmem:[#allocation2 + $0x178] sm:$0xff] }
 0x40d   :  { %v5676_v49 = vld [vmem:[#allocation2 + $0x1b0] sm:$0xff]  ;;  %v5696_v45 = vld [vmem:[#allocation2 + $0x158] sm:$0xff] }
 0x40e   :  { %4445 = vtanh.f32 %v2174_v9  ;;  %v5692_v9 = vld [vmem:[#allocation2 + $0x170] sm:$0xff] }
 0x40f   :  { %4447 = vtanh.f32 %v2175_v19  ;;  %v5684_v19 = vld [vmem:[#allocation2 + $0x190] sm:$0xff] }
 0x410   :  { %4449 = vtanh.f32 %v2176_v58  ;;  %v5700_v53 = vld [vmem:[#allocation2 + $0x150] sm:$0xff]  ;;  %v5704_v58 = vld [vmem:[#allocation2 + $0x138] sm:$0xff] }
 0x419   :  { %v4444_v55 = vpop.eup %4443 }
 0x41a   :  { %v2181_v4 = vadd.f32 1.0, %v4444_v55  ;;  %v5708_v55 = vld [vmem:[#allocation2 + $0x130] sm:$0xff] }
 0x41b   :  { %v4446_v31 = vpop.eup %4445 }
 0x41c   :  { %v2182_v51 = vmul.f32 0.5, %v2181_v4  ;;  %v2183_v17 = vadd.f32 1.0, %v4446_v31  ;;  %v4448_v62 = vpop.eup %4447  ;;  %v5712_v4 = vld [vmem:[#allocation2 + $0x118] sm:$0xff]  ;;  %v5716_v31 = vld [vmem:[#allocation2 + $0x110] sm:$0xff] }
 0x41d   :  { %v4450_v34 = vpop.eup %4449 }
 0x41e   :  { %v2184_v0 = vmul.f32 0.5, %v2183_v17  ;;  %v2188_v21 = vmul.f32 %v4448_v62, %v2182_v51  ;;  %v2185_v37 = vadd.f32 1.0, %v4450_v34  ;;  %v5720_v51 = vld [vmem:[#allocation2 + $0xf8] sm:$0xff]  ;;  %v5724_v17 = vld [vmem:[#allocation2 + $0xf0] sm:$0xff] }
 0x41f   :  { %v5728_v62 = vld [vmem:[#allocation2 + $0xd8] sm:$0xff] }
 0x420   :  { %v2187_v23 = vmul.f32 %v2184_v0, %v5509_v27  ;;  %v2186_v41 = vmul.f32 0.5, %v2185_v37  ;;  %v5732_v0 = vld [vmem:[#allocation2 + $0xd0] sm:$0xff]  ;;  %v5752_v34 = vld [vmem:[#allocation2 + $0x78] sm:$0xff] }
 0x421   :  { %6828 = vst [vmem:[#allocation23_spill] sm:$0xff] %v5752_v34  ;;  %v5756_v37 = vld [vmem:[#allocation2 + $0x70] sm:$0xff] }
 0x422   :  { %v2189_v29 = vadd.f32 %v2188_v21, %v2187_v23  ;;  %v5736_v21 = vld [vmem:[#allocation2 + $0xb8] sm:$0xff]  ;;  %v5740_v23 = vld [vmem:[#allocation2 + $0xb0] sm:$0xff]  ;;  %6829 = vst [vmem:[#allocation34_spill] sm:$0xff] %v5756_v37 }
 0x424   :  { %4451 = vtanh.f32 %v2189_v29  ;;  %v5654_v32 = vsel %vm2197_vm13, %v2189_v29, %v5509_v27  ;;  %v5664_v27 = vld [vmem:[#allocation2 + $0x1d8] sm:$0xff]  ;;  %v5748_v29 = vld [vmem:[#allocation2 + $0x90] sm:$0xff] }
 0x425   :  { %6827 = vst [vmem:[#allocation33_spill] sm:$0xff] %v5748_v29 }
 0x431   :  { %v4452_v33 = vpop.eup %4451 }
 0x432   :  { %v2191_v35 = vmul.f32 %v4452_v33, %v2186_v41  ;;  %v5760_v41 = vld [vmem:[#allocation2 + $0x58] sm:$0xff]  ;;  %v5764_v33 = vld [vmem:[#allocation2 + $0x50] sm:$0xff] }
 0x433   :  { %6830 = vst [vmem:[#allocation24_spill] sm:$0xff] %v5760_v41  ;;  %6831 = vst [vmem:[#allocation35_spill] sm:$0xff] %v5764_v33 }
 0x434   :  { %v5657_v12 = vsel %vm2197_vm13, %v2191_v35, %v5512_v18  ;;  %v5672_v18 = vld [vmem:[#allocation2 + $0x1b8] sm:$0xff] }
 0x435   :  { %2265 = vmatmul.mubr.f32.vlgmr.msra.gmra.mxu0 %v5657_v12  ;;  %2336 = vmatmul.mubr.f32.vlgmr.msra.gmra.mxu1 %v5657_v12  ;;  %v5768_v35 = vld [vmem:[#allocation2 + $0x38] sm:$0xff] }
 0x436   :  { %2370 = vmatpush1.msra.mxu0 %v5516_v60  ;;  %2441 = vmatpush1.msra.mxu1 %v5519_v20  ;;  %6832 = vst [vmem:[#allocation25_spill] sm:$0xff] %v5768_v35 }
 0x437   :  { %2371 = vmatprep.subr.mxu0 %v5522_v47  ;;  %2442 = vmatprep.subr.mxu1 %v5664_v27 }
 0x438   :  { %2372 = vmatpush1.msra.mxu0 %v5526_v14  ;;  %2443 = vmatpush1.msra.mxu1 %v5668_v39 }
 0x439   :  { %2373 = vmatprep.subr.mxu0 %v5530_v1  ;;  %2444 = vmatprep.subr.mxu1 %v5672_v18 }
 0x43a   :  { %2374 = vmatpush1.msra.mxu0 %v5534_v13  ;;  %2445 = vmatpush1.msra.mxu1 %v5676_v49 }
 0x43b   :  { %2375 = vmatprep.subr.mxu0 %v5538_v11  ;;  %2446 = vmatprep.subr.mxu1 %v5680_v57 }
 0x43c   :  { %2376 = vmatpush1.msra.mxu0 %v5542_v36  ;;  %2447 = vmatpush1.msra.mxu1 %v5684_v19 }
 0x43d   :  { %2377 = vmatprep.subr.mxu0 %v5546_v38  ;;  %2448 = vmatprep.subr.mxu1 %v5688_v15 }
 0x43e   :  { %2378 = vmatpush1.msra.mxu0 %v5550_v40  ;;  %2449 = vmatpush1.msra.mxu1 %v5692_v9 }
 0x43f   :  { %2379 = vmatprep.subr.mxu0 %v5554_v42  ;;  %2450 = vmatprep.subr.mxu1 %v5696_v45 }
 0x440   :  { %2380 = vmatpush1.msra.mxu0 %v5558_v44  ;;  %2451 = vmatpush1.msra.mxu1 %v5700_v53 }
 0x441   :  { %2381 = vmatprep.subr.mxu0 %v5562_v46  ;;  %2452 = vmatprep.subr.mxu1 %v5704_v58 }
 0x442   :  { %2382 = vmatpush1.msra.mxu0 %v5566_v48  ;;  %2453 = vmatpush1.msra.mxu1 %v5708_v55 }
 0x443   :  { %2383 = vmatprep.subr.mxu0 %v5570_v50  ;;  %2454 = vmatprep.subr.mxu1 %v5712_v4 }
 0x444   :  { %2384 = vmatpush1.msra.mxu0 %v5574_v52  ;;  %2455 = vmatpush1.msra.mxu1 %v5716_v31 }
 0x445   :  { %2385 = vmatprep.subr.mxu0 %v5578_v54  ;;  %2456 = vmatprep.subr.mxu1 %v5720_v51 }
 0x446   :  { %2386 = vmatpush1.msra.mxu0 %v5582_v56  ;;  %2457 = vmatpush1.msra.mxu1 %v5724_v17 }
 0x447   :  { %2387 = vmatprep.subr.mxu0 %v5586_v59  ;;  %2458 = vmatprep.subr.mxu1 %v5728_v62 }
 0x448   :  { %2388 = vmatpush1.msra.mxu0 %v5590_v61  ;;  %2459 = vmatpush1.msra.mxu1 %v5732_v0 }
 0x449   :  { %2389 = vmatprep.subr.mxu0 %v5594_v63  ;;  %2460 = vmatprep.subr.mxu1 %v5736_v21 }
 0x44a   :  { %2390 = vmatpush1.msra.mxu0 %v5598_v2  ;;  %2461 = vmatpush1.msra.mxu1 %v5740_v23 }
 0x44b   :  { %2391 = vmatprep.subr.mxu0 %v5602_v3  ;;  %2462 = vmatprep.subr.mxu1 %v5744_v25 }
 0x44c   :  { %2392 = vmatpush1.msra.mxu0 %v5606_v5  ;;  %2463 = vmatpush1.msra.mxu1 %v5748_v29 }
 0x44d   :  { %2393 = vmatprep.subr.mxu0 %v5610_v6  ;;  %2464 = vmatprep.subr.mxu1 %v5752_v34 }
 0x44e   :  { %2394 = vmatpush1.msra.mxu0 %v5614_v7  ;;  %2465 = vmatpush1.msra.mxu1 %v5756_v37  ;;  %v5772_v37 = vld [vmem:[#allocation2 + $0x30] sm:$0xff] }
 0x44f   :  { %2395 = vmatprep.subr.mxu0 %v5618_v8  ;;  %2466 = vmatprep.subr.mxu1 %v5760_v41  ;;  %6833 = vst [vmem:[#allocation36_spill] sm:$0xff] %v5772_v37  ;;  %v5776_v41 = vld [vmem:[#allocation2 + $0x18] sm:$0xff] }
 0x450   :  { %2396 = vmatpush1.msra.mxu0 %v5622_v16  ;;  %2467 = vmatpush1.msra.mxu1 %v5764_v33  ;;  %6834 = vst [vmem:[#allocation26_spill] sm:$0xff] %v5776_v41  ;;  %v6838_v16 = vld [vmem:[#allocation50_spill] sm:$0xff] }
 0x451   :  { %2397 = vmatprep.subr.mxu0 %v5626_v22  ;;  %2468 = vmatprep.subr.mxu1 %v5768_v35  ;;  %v5781_v22 = vld [vmem:[#allocation2 + $0x10] sm:$0xff] }
 0x452   :  { %2398 = vmatpush1.msra.mxu0 %v5630_v24  ;;  %2469 = vmatpush1.msra.mxu1 %v5772_v37  ;;  %6835 = vst [vmem:[#allocation37_spill] sm:$0xff] %v5781_v22  ;;  %v6836_v24 = vld [vmem:[#allocation48_spill] sm:$0xff] }
 0x453   :  { %2399 = vmatprep.subr.mxu0 %v5634_v26  ;;  %2470 = vmatprep.subr.mxu1 %v5776_v41  ;;  %v6837_v41 = vld [vmem:[#allocation63_spill] sm:$0xff] }
 0x454   :  { %2400 = vmatpush1.msra.mxu0 %v5638_v28  ;;  %2433 = vmatprep.mubr.f32.mxu0 %v6804_v43 }
 0x455   :  { %2471 = vmatpush1.msra.mxu1 %v5781_v22  ;;  %2504 = vmatprep.mubr.f32.mxu1 %v6804_v43  ;;  %v6839_v22 = vld [vmem:[#allocation65_spill] sm:$0xff] }
 0x456   :  { %2538 = vmatprep.subr.mxu0 %v5499_v10  ;;  %2609 = vmatprep.subr.mxu1 %v5645_v30 }
 0x4f5   :  { %v2266_v37 = vpop.f32.mrf.mxu0  ;;  %v2337_v26 = vpop.f32.mrf.mxu1 }
 0x4f6   :  { %v2342_v35 = vadd.f32 %v2266_v37, %v6836_v24  ;;  %v2344_v28 = vadd.f32 %v2337_v26, %v6837_v41  ;;  %v6848_v41 = vld [vmem:[#allocation24_spill] sm:$0xff] }
 0x4f7   :  { %v2268_v33 = vpop.f32.mrf.mxu0  ;;  %v2339_v7 = vpop.f32.mrf.mxu1 }
 0x4f8   :  { %4453 = vtanh.f32 %v2342_v35  ;;  %v2343_v8 = vadd.f32 %v2268_v33, %v6838_v16  ;;  %v2345_v34 = vadd.f32 %v2339_v7, %v6839_v22  ;;  %v2365_v35 = vpop.permute.xlu0 %2364  ;;  %v6849_v33 = vld [vmem:[#allocation28_spill] sm:$0xff] }
 0x4f9   :  { %vm2366_vm14 = vcmp.eq.s32.totalorder %v2365_v35, 1  ;;  %v6852_v35 = vld [vmem:[#allocation25_spill] sm:$0xff] }
 0x4fa   :  { %4455 = vtanh.f32 %v2343_v8 }
 0x4fb   :  { %4457 = vtanh.f32 %v2344_v28 }
 0x4fc   :  { %4459 = vtanh.f32 %v2345_v34  ;;  %v6847_v34 = vld [vmem:[#allocation16_spill] sm:$0xff] }
 0x505   :  { %v4454_v43 = vpop.eup %4453 }
 0x506   :  { %v2350_v6 = vadd.f32 1.0, %v4454_v43 }
 0x507   :  { %v4456_v10 = vpop.eup %4455 }
 0x508   :  { %v2351_v29 = vmul.f32 0.5, %v2350_v6  ;;  %v2352_v30 = vadd.f32 1.0, %v4456_v10  ;;  %v4458_v5 = vpop.eup %4457  ;;  %v6841_v6 = vld [vmem:[#allocation18_spill] sm:$0xff] }
 0x509   :  { %v4460_v16 = vpop.eup %4459 }
 0x50a   :  { %v2353_v25 = vmul.f32 0.5, %v2352_v30  ;;  %v2357_v24 = vmul.f32 %v4458_v5, %v2351_v29  ;;  %v2354_v7 = vadd.f32 1.0, %v4460_v16  ;;  %v6840_v5 = vld [vmem:[#allocation22_spill] sm:$0xff]  ;;  %v6842_v30 = vld [vmem:[#allocation33_spill] sm:$0xff]  ;;  %v6854_v16 = vld [vmem:[#allocation36_spill] sm:$0xff] }
 0x50b   :  { %v6846_v29 = vld [vmem:[#allocation34_spill] sm:$0xff] }
 0x50c   :  { %v2356_v37 = vmul.f32 %v2353_v25, %v5654_v32  ;;  %v2355_v22 = vmul.f32 0.5, %v2354_v7  ;;  %v6845_v25 = vld [vmem:[#allocation20_spill] sm:$0xff]  ;;  %v6855_v7 = vld [vmem:[#allocation49_spill] sm:$0xff] }
 0x50e   :  { %v2358_v26 = vadd.f32 %v2357_v24, %v2356_v37  ;;  %v6850_v24 = vld [vmem:[#allocation35_spill] sm:$0xff] }
 0x50f   :  { %v6851_v37 = vld [vmem:[#allocation47_spill] sm:$0xff] }
 0x510   :  { %4461 = vtanh.f32 %v2358_v26  ;;  %v5793_v8 = vsel %vm2366_vm14, %v2358_v26, %v5654_v32  ;;  %v6843_v32 = vld [vmem:[#allocation19_spill] sm:$0xff] }
 0x511   :  { %v6853_v26 = vld [vmem:[#allocation51_spill] sm:$0xff] }
 0x51d   :  { %v4462_v43 = vpop.eup %4461 }
 0x51e   :  { %v2360_v28 = vmul.f32 %v4462_v43, %v2355_v22  ;;  %v6856_v22 = vld [vmem:[#allocation26_spill] sm:$0xff]  ;;  %v6857_v43 = vld [vmem:[#allocation53_spill] sm:$0xff] }
 0x520   :  { %v5796_v10 = vsel %vm2366_vm14, %v2360_v28, %v5657_v12  ;;  %v6844_v12 = vld [vmem:[#allocation23_spill] sm:$0xff]  ;;  %v6858_v28 = vmov 0.0  }
 0x521   :  { %2434 = vmatmul.mubr.f32.vlgmr.msra.gmra.mxu0 %v5796_v10  ;;  %2505 = vmatmul.mubr.f32.vlgmr.msra.gmra.mxu1 %v5796_v10 }
 0x522   :  { %2539 = vmatpush1.msra.mxu0 %v5516_v60  ;;  %2610 = vmatpush1.msra.mxu1 %v5519_v20 }
 0x523   :  { %2540 = vmatprep.subr.mxu0 %v5522_v47  ;;  %2611 = vmatprep.subr.mxu1 %v5664_v27 }
 0x524   :  { %2541 = vmatpush1.msra.mxu0 %v5526_v14  ;;  %2612 = vmatpush1.msra.mxu1 %v5668_v39 }
 0x525   :  { %2542 = vmatprep.subr.mxu0 %v5530_v1  ;;  %2613 = vmatprep.subr.mxu1 %v5672_v18 }
 0x526   :  { %2543 = vmatpush1.msra.mxu0 %v5534_v13  ;;  %2614 = vmatpush1.msra.mxu1 %v5676_v49 }
 0x527   :  { %2544 = vmatprep.subr.mxu0 %v5538_v11  ;;  %2615 = vmatprep.subr.mxu1 %v5680_v57 }
 0x528   :  { %2545 = vmatpush1.msra.mxu0 %v5542_v36  ;;  %2616 = vmatpush1.msra.mxu1 %v5684_v19 }
 0x529   :  { %2546 = vmatprep.subr.mxu0 %v5546_v38  ;;  %2617 = vmatprep.subr.mxu1 %v5688_v15 }
 0x52a   :  { %2547 = vmatpush1.msra.mxu0 %v5550_v40  ;;  %2618 = vmatpush1.msra.mxu1 %v5692_v9 }
 0x52b   :  { %2548 = vmatprep.subr.mxu0 %v5554_v42  ;;  %2619 = vmatprep.subr.mxu1 %v5696_v45 }
 0x52c   :  { %2549 = vmatpush1.msra.mxu0 %v5558_v44  ;;  %2620 = vmatpush1.msra.mxu1 %v5700_v53 }
 0x52d   :  { %2550 = vmatprep.subr.mxu0 %v5562_v46  ;;  %2621 = vmatprep.subr.mxu1 %v5704_v58 }
 0x52e   :  { %2551 = vmatpush1.msra.mxu0 %v5566_v48  ;;  %2622 = vmatpush1.msra.mxu1 %v5708_v55 }
 0x52f   :  { %2552 = vmatprep.subr.mxu0 %v5570_v50  ;;  %2623 = vmatprep.subr.mxu1 %v5712_v4 }
 0x530   :  { %2553 = vmatpush1.msra.mxu0 %v5574_v52  ;;  %2624 = vmatpush1.msra.mxu1 %v5716_v31 }
 0x531   :  { %2554 = vmatprep.subr.mxu0 %v5578_v54  ;;  %2625 = vmatprep.subr.mxu1 %v5720_v51 }
 0x532   :  { %2555 = vmatpush1.msra.mxu0 %v5582_v56  ;;  %2626 = vmatpush1.msra.mxu1 %v5724_v17 }
 0x533   :  { %2556 = vmatprep.subr.mxu0 %v5586_v59  ;;  %2627 = vmatprep.subr.mxu1 %v5728_v62 }
 0x534   :  { %2557 = vmatpush1.msra.mxu0 %v5590_v61  ;;  %2628 = vmatpush1.msra.mxu1 %v5732_v0 }
 0x535   :  { %2558 = vmatprep.subr.mxu0 %v5594_v63  ;;  %2629 = vmatprep.subr.mxu1 %v5736_v21 }
 0x536   :  { %2559 = vmatpush1.msra.mxu0 %v5598_v2  ;;  %2630 = vmatpush1.msra.mxu1 %v5740_v23 }
 0x537   :  { %2560 = vmatprep.subr.mxu0 %v5602_v3  ;;  %2631 = vmatprep.subr.mxu1 %v6840_v5 }
 0x538   :  { %2561 = vmatpush1.msra.mxu0 %v6841_v6  ;;  %2632 = vmatpush1.msra.mxu1 %v6842_v30 }
 0x539   :  { %2562 = vmatprep.subr.mxu0 %v6843_v32  ;;  %2633 = vmatprep.subr.mxu1 %v6844_v12 }
 0x53a   :  { %2563 = vmatpush1.msra.mxu0 %v6845_v25  ;;  %2634 = vmatpush1.msra.mxu1 %v6846_v29  ;;  %v6864_v29 = vld [vmem:[#allocation54_spill] sm:$0xff] }
 0x53b   :  { %2564 = vmatprep.subr.mxu0 %v6847_v34  ;;  %2635 = vmatprep.subr.mxu1 %v6848_v41  ;;  %v6859_v41 = vld [vmem:[#allocation37_spill] sm:$0xff] }
 0x53c   :  { %2565 = vmatpush1.msra.mxu0 %v6849_v33  ;;  %2636 = vmatpush1.msra.mxu1 %v6850_v24  ;;  %v6860_v24 = vld [vmem:[#allocation17_spill] sm:$0xff]  ;;  %v6862_v33 = vld [vmem:[#allocation52_spill] sm:$0xff] }
 0x53d   :  { %2566 = vmatprep.subr.mxu0 %v6851_v37  ;;  %2637 = vmatprep.subr.mxu1 %v6852_v35  ;;  %v6861_v37 = vld [vmem:[#allocation32_spill] sm:$0xff] }
 0x53e   :  { %2567 = vmatpush1.msra.mxu0 %v6853_v26  ;;  %2638 = vmatpush1.msra.mxu1 %v6854_v16 }
 0x53f   :  { %2568 = vmatprep.subr.mxu0 %v6855_v7  ;;  %2639 = vmatprep.subr.mxu1 %v6856_v22  ;;  %v6863_v7 = vld [vmem:[#allocation67_spill] sm:$0xff] }
 0x540   :  { %2569 = vmatpush1.msra.mxu0 %v6857_v43  ;;  %2602 = vmatprep.mubr.f32.mxu0 %v6858_v28 }
 0x541   :  { %2640 = vmatpush1.msra.mxu1 %v6859_v41  ;;  %2673 = vmatprep.mubr.f32.mxu1 %v6858_v28  ;;  %v6865_v41 = vld [vmem:[#allocation68_spill] sm:$0xff] }
 0x542   :  { %2707 = vmatprep.subr.mxu0 %v6860_v24  ;;  %2778 = vmatprep.subr.mxu1 %v6861_v37 }
 0x5e1   :  { %v2435_v35 = vpop.f32.mrf.mxu0  ;;  %v2506_v26 = vpop.f32.mrf.mxu1 }
 0x5e2   :  { %v2511_v16 = vadd.f32 %v2435_v35, %v6862_v33  ;;  %v2513_v22 = vadd.f32 %v2506_v26, %v6863_v7 }
 0x5e3   :  { %v2437_v34 = vpop.f32.mrf.mxu0  ;;  %v2508_v25 = vpop.f32.mrf.mxu1 }
 0x5e4   :  { %4463 = vtanh.f32 %v2511_v16  ;;  %v2512_v43 = vadd.f32 %v2437_v34, %v6864_v29  ;;  %v2514_v12 = vadd.f32 %v2508_v25, %v6865_v41  ;;  %v2534_v16 = vpop.permute.xlu1 %2533 }
 0x5e5   :  { %vm2535_vm15 = vcmp.eq.s32.totalorder %v2534_v16, 1  ;;  %v6878_v16 = vld [vmem:[#allocation25_spill] sm:$0xff] }
 0x5e6   :  { %4465 = vtanh.f32 %v2512_v43  ;;  %v6874_v43 = vld [vmem:[#allocation24_spill] sm:$0xff] }
 0x5e7   :  { %4467 = vtanh.f32 %v2513_v22 }
 0x5e8   :  { %4469 = vtanh.f32 %v2514_v12  ;;  %v6871_v12 = vld [vmem:[#allocation20_spill] sm:$0xff] }
 0x5f1   :  { %v4464_v28 = vpop.eup %4463 }
 0x5f2   :  { %v2519_v32 = vadd.f32 1.0, %v4464_v28  ;;  %v6875_v28 = vld [vmem:[#allocation28_spill] sm:$0xff] }
 0x5f3   :  { %v4466_v24 = vpop.eup %4465 }
 0x5f4   :  { %v2520_v30 = vmul.f32 0.5, %v2519_v32  ;;  %v2521_v37 = vadd.f32 1.0, %v4466_v24  ;;  %v4468_v6 = vpop.eup %4467  ;;  %v6872_v24 = vld [vmem:[#allocation34_spill] sm:$0xff] }
 0x5f5   :  { %v4470_v34 = vpop.eup %4469 }
 0x5f6   :  { %v2522_v5 = vmul.f32 0.5, %v2521_v37  ;;  %v2526_v33 = vmul.f32 %v4468_v6, %v2520_v30  ;;  %v2523_v25 = vadd.f32 1.0, %v4470_v34  ;;  %v6869_v6 = vld [vmem:[#allocation19_spill] sm:$0xff]  ;;  %v6873_v37 = vld [vmem:[#allocation16_spill] sm:$0xff] }
 0x5f7   :  { %v6870_v30 = vld [vmem:[#allocation23_spill] sm:$0xff]  ;;  %v6880_v34 = vld [vmem:[#allocation36_spill] sm:$0xff] }
 0x5f8   :  { %v2525_v35 = vmul.f32 %v2522_v5, %v5793_v8  ;;  %v2524_v41 = vmul.f32 0.5, %v2523_v25  ;;  %v6868_v5 = vld [vmem:[#allocation33_spill] sm:$0xff] }
 0x5f9   :  { %v6881_v25 = vld [vmem:[#allocation49_spill] sm:$0xff] }
 0x5fa   :  { %v2527_v26 = vadd.f32 %v2526_v33, %v2525_v35  ;;  %v6876_v33 = vld [vmem:[#allocation35_spill] sm:$0xff] }
 0x5fb   :  { %v6877_v35 = vld [vmem:[#allocation47_spill] sm:$0xff] }
 0x5fc   :  { %4471 = vtanh.f32 %v2527_v26  ;;  %v5872_v29 = vsel %vm2535_vm15, %v2527_v26, %v5793_v8  ;;  %v6866_v8 = vld [vmem:[#allocation22_spill] sm:$0xff]  ;;  %v6879_v26 = vld [vmem:[#allocation51_spill] sm:$0xff] }
 0x609   :  { %v4472_v7 = vpop.eup %4471 }
 0x60a   :  { %v2529_v22 = vmul.f32 %v4472_v7, %v2524_v41  ;;  %v6882_v41 = vld [vmem:[#allocation26_spill] sm:$0xff]  ;;  %v6883_v7 = vld [vmem:[#allocation53_spill] sm:$0xff] }
 0x60c   :  { %v5875_v32 = vsel %vm2535_vm15, %v2529_v22, %v5796_v10  ;;  %v6867_v10 = vld [vmem:[#allocation18_spill] sm:$0xff]  ;;  %v6884_v22 = vmov 0.0  }
 0x60d   :  { %2603 = vmatmul.mubr.f32.vlgmr.msra.gmra.mxu0 %v5875_v32  ;;  %2674 = vmatmul.mubr.f32.vlgmr.msra.gmra.mxu1 %v5875_v32 }
 0x60e   :  { %2708 = vmatpush1.msra.mxu0 %v5516_v60  ;;  %2779 = vmatpush1.msra.mxu1 %v5519_v20 }
 0x60f   :  { %2709 = vmatprep.subr.mxu0 %v5522_v47  ;;  %2780 = vmatprep.subr.mxu1 %v5664_v27 }
 0x610   :  { %2710 = vmatpush1.msra.mxu0 %v5526_v14  ;;  %2781 = vmatpush1.msra.mxu1 %v5668_v39 }
 0x611   :  { %2711 = vmatprep.subr.mxu0 %v5530_v1  ;;  %2782 = vmatprep.subr.mxu1 %v5672_v18 }
 0x612   :  { %2712 = vmatpush1.msra.mxu0 %v5534_v13  ;;  %2783 = vmatpush1.msra.mxu1 %v5676_v49 }
 0x613   :  { %2713 = vmatprep.subr.mxu0 %v5538_v11  ;;  %2784 = vmatprep.subr.mxu1 %v5680_v57 }
 0x614   :  { %2714 = vmatpush1.msra.mxu0 %v5542_v36  ;;  %2785 = vmatpush1.msra.mxu1 %v5684_v19 }
 0x615   :  { %2715 = vmatprep.subr.mxu0 %v5546_v38  ;;  %2786 = vmatprep.subr.mxu1 %v5688_v15 }
 0x616   :  { %2716 = vmatpush1.msra.mxu0 %v5550_v40  ;;  %2787 = vmatpush1.msra.mxu1 %v5692_v9 }
 0x617   :  { %2717 = vmatprep.subr.mxu0 %v5554_v42  ;;  %2788 = vmatprep.subr.mxu1 %v5696_v45 }
 0x618   :  { %2718 = vmatpush1.msra.mxu0 %v5558_v44  ;;  %2789 = vmatpush1.msra.mxu1 %v5700_v53 }
 0x619   :  { %2719 = vmatprep.subr.mxu0 %v5562_v46  ;;  %2790 = vmatprep.subr.mxu1 %v5704_v58 }
 0x61a   :  { %2720 = vmatpush1.msra.mxu0 %v5566_v48  ;;  %2791 = vmatpush1.msra.mxu1 %v5708_v55 }
 0x61b   :  { %2721 = vmatprep.subr.mxu0 %v5570_v50  ;;  %2792 = vmatprep.subr.mxu1 %v5712_v4 }
 0x61c   :  { %2722 = vmatpush1.msra.mxu0 %v5574_v52  ;;  %2793 = vmatpush1.msra.mxu1 %v5716_v31 }
 0x61d   :  { %2723 = vmatprep.subr.mxu0 %v5578_v54  ;;  %2794 = vmatprep.subr.mxu1 %v5720_v51 }
 0x61e   :  { %2724 = vmatpush1.msra.mxu0 %v5582_v56  ;;  %2795 = vmatpush1.msra.mxu1 %v5724_v17 }
 0x61f   :  { %2725 = vmatprep.subr.mxu0 %v5586_v59  ;;  %2796 = vmatprep.subr.mxu1 %v5728_v62 }
 0x620   :  { %2726 = vmatpush1.msra.mxu0 %v5590_v61  ;;  %2797 = vmatpush1.msra.mxu1 %v5732_v0 }
 0x621   :  { %2727 = vmatprep.subr.mxu0 %v5594_v63  ;;  %2798 = vmatprep.subr.mxu1 %v5736_v21 }
 0x622   :  { %2728 = vmatpush1.msra.mxu0 %v5598_v2  ;;  %2799 = vmatpush1.msra.mxu1 %v5740_v23 }
 0x623   :  { %2729 = vmatprep.subr.mxu0 %v5602_v3  ;;  %2800 = vmatprep.subr.mxu1 %v6866_v8 }
 0x624   :  { %2730 = vmatpush1.msra.mxu0 %v6867_v10  ;;  %2801 = vmatpush1.msra.mxu1 %v6868_v5 }
 0x625   :  { %2731 = vmatprep.subr.mxu0 %v6869_v6  ;;  %2802 = vmatprep.subr.mxu1 %v6870_v30 }
 0x626   :  { %2732 = vmatpush1.msra.mxu0 %v6871_v12  ;;  %2803 = vmatpush1.msra.mxu1 %v6872_v24  ;;  %v6890_v24 = vld [vmem:[#allocation58_spill] sm:$0xff] }
 0x627   :  { %2733 = vmatprep.subr.mxu0 %v6873_v37  ;;  %2804 = vmatprep.subr.mxu1 %v6874_v43  ;;  %v6885_v43 = vld [vmem:[#allocation37_spill] sm:$0xff] }
 0x628   :  { %2734 = vmatpush1.msra.mxu0 %v6875_v28  ;;  %2805 = vmatpush1.msra.mxu1 %v6876_v33  ;;  %v6886_v33 = vld [vmem:[#allocation17_spill] sm:$0xff]  ;;  %v6888_v28 = vld [vmem:[#allocation56_spill] sm:$0xff] }
 0x629   :  { %2735 = vmatprep.subr.mxu0 %v6877_v35  ;;  %2806 = vmatprep.subr.mxu1 %v6878_v16  ;;  %v6887_v35 = vld [vmem:[#allocation32_spill] sm:$0xff] }
 0x62a   :  { %2736 = vmatpush1.msra.mxu0 %v6879_v26  ;;  %2807 = vmatpush1.msra.mxu1 %v6880_v34 }
 0x62b   :  { %2737 = vmatprep.subr.mxu0 %v6881_v25  ;;  %2808 = vmatprep.subr.mxu1 %v6882_v41  ;;  %v6889_v25 = vld [vmem:[#allocation69_spill] sm:$0xff] }
 0x62c   :  { %2738 = vmatpush1.msra.mxu0 %v6883_v7  ;;  %2771 = vmatprep.mubr.f32.mxu0 %v6884_v22 }
 0x62d   :  { %2809 = vmatpush1.msra.mxu1 %v6885_v43  ;;  %2842 = vmatprep.mubr.f32.mxu1 %v6884_v22  ;;  %v6891_v43 = vld [vmem:[#allocation70_spill] sm:$0xff] }
 0x62e   :  { %2876 = vmatprep.subr.mxu0 %v6886_v33  ;;  %2947 = vmatprep.subr.mxu1 %v6887_v35 }
 0x6cd   :  { %v2604_v16 = vpop.f32.mrf.mxu0  ;;  %v2675_v26 = vpop.f32.mrf.mxu1 }
 0x6ce   :  { %v2680_v34 = vadd.f32 %v2604_v16, %v6888_v28  ;;  %v2682_v41 = vadd.f32 %v2675_v26, %v6889_v25 }
 0x6cf   :  { %v2606_v37 = vpop.f32.mrf.mxu0  ;;  %v2677_v12 = vpop.f32.mrf.mxu1 }
 0x6d0   :  { %4473 = vtanh.f32 %v2680_v34  ;;  %v2681_v7 = vadd.f32 %v2606_v37, %v6890_v24  ;;  %v2683_v30 = vadd.f32 %v2677_v12, %v6891_v43  ;;  %v2703_v34 = vpop.permute.xlu0 %2702 }
 0x6d1   :  { %vm2704_vm0 = vcmp.eq.s32.totalorder %v2703_v34, 1  ;;  %v3185_v34 = vld [vmem:[#allocation7 + $0x1d8] sm:$0xff] }
 0x6d2   :  { %4475 = vtanh.f32 %v2681_v7 }
 0x6d3   :  { %4477 = vtanh.f32 %v2682_v41 }
 0x6d4   :  { %4479 = vtanh.f32 %v2683_v30 }
 0x6dd   :  { %v4474_v22 = vpop.eup %4473 }
 0x6de   :  { %v2688_v6 = vadd.f32 1.0, %v4474_v22  ;;  %v3187_v22 = vld [vmem:[#allocation7 + $0x1e8] sm:$0xff] }
 0x6df   :  { %v4476_v33 = vpop.eup %4475 }
 0x6e0   :  { %v2689_v5 = vmul.f32 0.5, %v2688_v6  ;;  %v2690_v35 = vadd.f32 1.0, %v4476_v33  ;;  %v4478_v10 = vpop.eup %4477  ;;  %v3189_v33 = vld [vmem:[#allocation7 + $0x1f8] sm:$0xff] }
 0x6e1   :  { %v4480_v37 = vpop.eup %4479 }
 0x6e2   :  { %v2691_v8 = vmul.f32 0.5, %v2690_v35  ;;  %v2695_v28 = vmul.f32 %v4478_v10, %v2689_v5  ;;  %v2692_v12 = vadd.f32 1.0, %v4480_v37  ;;  %v3186_v35 = vld [vmem:[#allocation7 + $0x1e0] sm:$0xff]  ;;  %v3179_v37 = vld [vmem:[#allocation7 + $0x1a8] sm:$0xff] }
 0x6e4   :  { %v2694_v16 = vmul.f32 %v2691_v8, %v5872_v29  ;;  %v2693_v43 = vmul.f32 0.5, %v2692_v12  ;;  %v3181_v12 = vld [vmem:[#allocation7 + $0x1b8] sm:$0xff] }
 0x6e6   :  { %v2696_v26 = vadd.f32 %v2695_v28, %v2694_v16  ;;  %v3188_v28 = vld [vmem:[#allocation7 + $0x1f0] sm:$0xff]  ;;  %v3183_v16 = vld [vmem:[#allocation7 + $0x1c8] sm:$0xff] }
 0x6e8   :  { %4481 = vtanh.f32 %v2696_v26  ;;  %v5951_v24 = vsel %vm2704_vm0, %v2696_v26, %v5872_v29  ;;  %v3182_v26 = vld [vmem:[#allocation7 + $0x1c0] sm:$0xff] }
 0x6f5   :  { %v4482_v25 = vpop.eup %4481 }
 0x6f6   :  { %v2698_v41 = vmul.f32 %v4482_v25, %v2693_v43  ;;  %v3178_v43 = vld [vmem:[#allocation7 + $0x1a0] sm:$0xff]  ;;  %v3180_v25 = vld [vmem:[#allocation7 + $0x1b0] sm:$0xff] }
 0x6f8   :  { %v5954_v6 = vsel %vm2704_vm0, %v2698_v41, %v5875_v32  ;;  %v3175_v41 = vld [vmem:[#allocation7 + $0x188] sm:$0xff] }
 0x6f9   :  { %2772 = vmatmul.mubr.f32.vlgmr.msra.gmra.mxu0 %v5954_v6  ;;  %2843 = vmatmul.mubr.f32.vlgmr.msra.gmra.mxu1 %v5954_v6 }
 0x6fa   :  { %2877 = vmatpush1.msra.mxu0 %v5516_v60  ;;  %2948 = vmatpush1.msra.mxu1 %v5519_v20  ;;  %v6892_v60 = vld [vmem:[#allocation22_spill] sm:$0xff] }
 0x6fb   :  { %2878 = vmatprep.subr.mxu0 %v5522_v47  ;;  %2949 = vmatprep.subr.mxu1 %v5664_v27  ;;  %v6893_v20 = vld [vmem:[#allocation18_spill] sm:$0xff]  ;;  %v6894_v47 = vld [vmem:[#allocation33_spill] sm:$0xff] }
 0x6fc   :  { %2879 = vmatpush1.msra.mxu0 %v5526_v14  ;;  %2950 = vmatpush1.msra.mxu1 %v5668_v39  ;;  %v6895_v14 = vld [vmem:[#allocation19_spill] sm:$0xff] }
 0x6fd   :  { %2880 = vmatprep.subr.mxu0 %v5530_v1  ;;  %2951 = vmatprep.subr.mxu1 %v5672_v18  ;;  %v6896_v1 = vld [vmem:[#allocation23_spill] sm:$0xff] }
 0x6fe   :  { %2881 = vmatpush1.msra.mxu0 %v5534_v13  ;;  %2952 = vmatpush1.msra.mxu1 %v5676_v49  ;;  %v6897_v13 = vld [vmem:[#allocation20_spill] sm:$0xff]  ;;  %v6913_v18 = vld [vmem:[#allocation71_spill] sm:$0xff] }
 0x6ff   :  { %2882 = vmatprep.subr.mxu0 %v5538_v11  ;;  %2953 = vmatprep.subr.mxu1 %v5680_v57  ;;  %v6898_v11 = vld [vmem:[#allocation34_spill] sm:$0xff] }
 0x700   :  { %2883 = vmatpush1.msra.mxu0 %v5542_v36  ;;  %2954 = vmatpush1.msra.mxu1 %v5684_v19  ;;  %v6899_v36 = vld [vmem:[#allocation16_spill] sm:$0xff]  ;;  %v6914_v57 = vld [vmem:[#allocation62_spill] sm:$0xff] }
 0x701   :  { %2884 = vmatprep.subr.mxu0 %v5546_v38  ;;  %2955 = vmatprep.subr.mxu1 %v5688_v15  ;;  %v6900_v38 = vld [vmem:[#allocation24_spill] sm:$0xff] }
 0x702   :  { %2885 = vmatpush1.msra.mxu0 %v5550_v40  ;;  %2956 = vmatpush1.msra.mxu1 %v5692_v9  ;;  %v6901_v40 = vld [vmem:[#allocation28_spill] sm:$0xff] }
 0x703   :  { %2886 = vmatprep.subr.mxu0 %v5554_v42  ;;  %2957 = vmatprep.subr.mxu1 %v5696_v45  ;;  %v6902_v42 = vld [vmem:[#allocation35_spill] sm:$0xff]  ;;  %v6915_v9 = vld [vmem:[#allocation72_spill] sm:$0xff] }
 0x704   :  { %2887 = vmatpush1.msra.mxu0 %v5558_v44  ;;  %2958 = vmatpush1.msra.mxu1 %v5700_v53  ;;  %v6903_v44 = vld [vmem:[#allocation47_spill] sm:$0xff] }
 0x705   :  { %2888 = vmatprep.subr.mxu0 %v5562_v46  ;;  %2959 = vmatprep.subr.mxu1 %v5704_v58  ;;  %v6904_v46 = vld [vmem:[#allocation25_spill] sm:$0xff] }
 0x706   :  { %2889 = vmatpush1.msra.mxu0 %v5566_v48  ;;  %2960 = vmatpush1.msra.mxu1 %v5708_v55  ;;  %v6905_v48 = vld [vmem:[#allocation51_spill] sm:$0xff] }
 0x707   :  { %2890 = vmatprep.subr.mxu0 %v5570_v50  ;;  %2961 = vmatprep.subr.mxu1 %v5712_v4  ;;  %v6906_v50 = vld [vmem:[#allocation36_spill] sm:$0xff] }
 0x708   :  { %2891 = vmatpush1.msra.mxu0 %v5574_v52  ;;  %2962 = vmatpush1.msra.mxu1 %v5716_v31  ;;  %v6907_v52 = vld [vmem:[#allocation49_spill] sm:$0xff] }
 0x709   :  { %2892 = vmatprep.subr.mxu0 %v5578_v54  ;;  %2963 = vmatprep.subr.mxu1 %v5720_v51  ;;  %v6908_v54 = vld [vmem:[#allocation26_spill] sm:$0xff] }
 0x70a   :  { %2893 = vmatpush1.msra.mxu0 %v5582_v56  ;;  %2964 = vmatpush1.msra.mxu1 %v5724_v17  ;;  %v6909_v56 = vld [vmem:[#allocation53_spill] sm:$0xff] }
 0x70b   :  { %2894 = vmatprep.subr.mxu0 %v5586_v59  ;;  %2965 = vmatprep.subr.mxu1 %v5728_v62  ;;  %v6910_v59 = vmov 0.0  }
 0x70c   :  { %2895 = vmatpush1.msra.mxu0 %v5590_v61  ;;  %2966 = vmatpush1.msra.mxu1 %v5732_v0  ;;  %v6911_v61 = vld [vmem:[#allocation37_spill] sm:$0xff]  ;;  %v2872_v0 = vpop.permute.xlu1 %2871 }
 0x70d   :  { %2896 = vmatprep.subr.mxu0 %v5594_v63  ;;  %2967 = vmatprep.subr.mxu1 %v5736_v21  ;;  %vm2873_vm1 = vcmp.eq.s32.totalorder %v2872_v0, 1  ;;  %v3137_v0 = vld [vmem:[#allocation7 + $0x58] sm:$0xff] }
 0x70e   :  { %2897 = vmatpush1.msra.mxu0 %v5598_v2  ;;  %2968 = vmatpush1.msra.mxu1 %v5740_v23 }
 0x70f   :  { %2898 = vmatprep.subr.mxu0 %v5602_v3  ;;  %2969 = vmatprep.subr.mxu1 %v6892_v60  ;;  %v6912_v3 = vld [vmem:[#allocation60_spill] sm:$0xff] }
 0x710   :  { %2899 = vmatpush1.msra.mxu0 %v6893_v20  ;;  %2970 = vmatpush1.msra.mxu1 %v6894_v47  ;;  %v3174_v60 = vld [vmem:[#allocation7 + $0x180] sm:$0xff]  ;;  %v3176_v20 = vld [vmem:[#allocation7 + $0x190] sm:$0xff]  ;;  %v3171_v47 = vld [vmem:[#allocation7 + $0x168] sm:$0xff] }
 0x711   :  { %2900 = vmatprep.subr.mxu0 %v6895_v14  ;;  %2971 = vmatprep.subr.mxu1 %v6896_v1  ;;  %v3173_v14 = vld [vmem:[#allocation7 + $0x178] sm:$0xff]  ;;  %v3170_v1 = vld [vmem:[#allocation7 + $0x160] sm:$0xff] }
 0x712   :  { %2901 = vmatpush1.msra.mxu0 %v6897_v13  ;;  %2972 = vmatpush1.msra.mxu1 %v6898_v11  ;;  %v3172_v13 = vld [vmem:[#allocation7 + $0x170] sm:$0xff]  ;;  %v3167_v11 = vld [vmem:[#allocation7 + $0x148] sm:$0xff] }
 0x713   :  { %2902 = vmatprep.subr.mxu0 %v6899_v36  ;;  %2973 = vmatprep.subr.mxu1 %v6900_v38  ;;  %v3169_v36 = vld [vmem:[#allocation7 + $0x158] sm:$0xff]  ;;  %v3166_v38 = vld [vmem:[#allocation7 + $0x140] sm:$0xff] }
 0x714   :  { %2903 = vmatpush1.msra.mxu0 %v6901_v40  ;;  %2974 = vmatpush1.msra.mxu1 %v6902_v42  ;;  %v3168_v40 = vld [vmem:[#allocation7 + $0x150] sm:$0xff]  ;;  %v3163_v42 = vld [vmem:[#allocation7 + $0x128] sm:$0xff] }
 0x715   :  { %2904 = vmatprep.subr.mxu0 %v6903_v44  ;;  %2975 = vmatprep.subr.mxu1 %v6904_v46  ;;  %v3165_v44 = vld [vmem:[#allocation7 + $0x138] sm:$0xff]  ;;  %v3162_v46 = vld [vmem:[#allocation7 + $0x120] sm:$0xff] }
 0x716   :  { %2905 = vmatpush1.msra.mxu0 %v6905_v48  ;;  %2976 = vmatpush1.msra.mxu1 %v6906_v50  ;;  %v3164_v48 = vld [vmem:[#allocation7 + $0x130] sm:$0xff]  ;;  %v3159_v50 = vld [vmem:[#allocation7 + $0x108] sm:$0xff] }
 0x717   :  { %2906 = vmatprep.subr.mxu0 %v6907_v52  ;;  %2977 = vmatprep.subr.mxu1 %v6908_v54  ;;  %v3161_v52 = vld [vmem:[#allocation7 + $0x118] sm:$0xff]  ;;  %v3158_v54 = vld [vmem:[#allocation7 + $0x100] sm:$0xff] }
 0x718   :  { %2907 = vmatpush1.msra.mxu0 %v6909_v56  ;;  %2940 = vmatprep.mubr.f32.mxu0 %v6910_v59  ;;  %v3160_v56 = vld [vmem:[#allocation7 + $0x110] sm:$0xff] }
 0x719   :  { %2978 = vmatpush1.msra.mxu1 %v6911_v61  ;;  %3011 = vmatprep.mubr.f32.mxu1 %v6910_v59  ;;  %v3155_v61 = vld [vmem:[#allocation7 + $0xe8] sm:$0xff] }
 0x71a   :  { %3190 = vmatprep.subr.mxu0 %v3187_v22  ;;  %3261 = vmatprep.subr.mxu1 %v3189_v33  ;;  %v3129_v22 = vld [vmem:[#allocation7 + $0x18] sm:$0xff]  ;;  %v3126_v33 = vld [vmem:[#allocation7] sm:$0xff] }
 0x7b9   :  { %v2773_v63 = vpop.f32.mrf.mxu0  ;;  %v2844_v2 = vpop.f32.mrf.mxu1 }
 0x7ba   :  { %v2849_v27 = vadd.f32 %v2773_v63, %v6912_v3  ;;  %v2851_v49 = vadd.f32 %v2844_v2, %v6913_v18  ;;  %v3157_v63 = vld [vmem:[#allocation7 + $0xf8] sm:$0xff]  ;;  %v3154_v2 = vld [vmem:[#allocation7 + $0xe0] sm:$0xff]  ;;  %v3156_v3 = vld [vmem:[#allocation7 + $0xf0] sm:$0xff] }
 0x7bb   :  { %v2775_v39 = vpop.f32.mrf.mxu0  ;;  %v2846_v15 = vpop.f32.mrf.mxu1  ;;  %v3150_v18 = vld [vmem:[#allocation7 + $0xc0] sm:$0xff] }
 0x7bc   :  { %4483 = vtanh.f32 %v2849_v27  ;;  %v2850_v19 = vadd.f32 %v2775_v39, %v6914_v57  ;;  %v2852_v45 = vadd.f32 %v2846_v15, %v6915_v9  ;;  %v3151_v27 = vld [vmem:[#allocation7 + $0xc8] sm:$0xff]  ;;  %v3153_v39 = vld [vmem:[#allocation7 + $0xd8] sm:$0xff]  ;;  %v3146_v15 = vld [vmem:[#allocation7 + $0xa0] sm:$0xff] }
 0x7bd   :  { %v3147_v57 = vld [vmem:[#allocation7 + $0xa8] sm:$0xff]  ;;  %v3148_v9 = vld [vmem:[#allocation7 + $0xb0] sm:$0xff] }
 0x7be   :  { %4485 = vtanh.f32 %v2850_v19  ;;  %v3149_v19 = vld [vmem:[#allocation7 + $0xb8] sm:$0xff] }
 0x7bf   :  { %4487 = vtanh.f32 %v2851_v49  ;;  %v3152_v49 = vld [vmem:[#allocation7 + $0xd0] sm:$0xff] }
 0x7c0   :  { %4489 = vtanh.f32 %v2852_v45  ;;  %v3143_v45 = vld [vmem:[#allocation7 + $0x88] sm:$0xff] }
 0x7c9   :  { %v4484_v53 = vpop.eup %4483 }
 0x7ca   :  { %v2857_v58 = vadd.f32 1.0, %v4484_v53  ;;  %v3145_v53 = vld [vmem:[#allocation7 + $0x98] sm:$0xff] }
 0x7cb   :  { %v4486_v55 = vpop.eup %4485 }
 0x7cc   :  { %v2858_v4 = vmul.f32 0.5, %v2857_v58  ;;  %v2859_v31 = vadd.f32 1.0, %v4486_v55  ;;  %v4488_v51 = vpop.eup %4487  ;;  %v3142_v58 = vld [vmem:[#allocation7 + $0x80] sm:$0xff]  ;;  %v3144_v55 = vld [vmem:[#allocation7 + $0x90] sm:$0xff] }
 0x7cd   :  { %v4490_v32 = vpop.eup %4489 }
 0x7ce   :  { %v2860_v17 = vmul.f32 0.5, %v2859_v31  ;;  %v2864_v62 = vmul.f32 %v4488_v51, %v2858_v4  ;;  %v2861_v8 = vadd.f32 1.0, %v4490_v32  ;;  %v3139_v4 = vld [vmem:[#allocation7 + $0x68] sm:$0xff]  ;;  %v3141_v31 = vld [vmem:[#allocation7 + $0x78] sm:$0xff]  ;;  %v3138_v51 = vld [vmem:[#allocation7 + $0x60] sm:$0xff] }
 0x7cf   :  { %v3131_v32 = vld [vmem:[#allocation7 + $0x28] sm:$0xff] }
 0x7d0   :  { %v2863_v21 = vmul.f32 %v2860_v17, %v5951_v24  ;;  %v2862_v10 = vmul.f32 0.5, %v2861_v8  ;;  %v3140_v17 = vld [vmem:[#allocation7 + $0x70] sm:$0xff]  ;;  %v3133_v8 = vld [vmem:[#allocation7 + $0x38] sm:$0xff] }
 0x7d2   :  { %v2865_v23 = vadd.f32 %v2864_v62, %v2863_v21  ;;  %v3135_v62 = vld [vmem:[#allocation7 + $0x48] sm:$0xff]  ;;  %v3134_v21 = vld [vmem:[#allocation7 + $0x40] sm:$0xff] }
 0x7d4   :  { %4491 = vtanh.f32 %v2865_v23  ;;  %v6028_v29 = vsel %vm2873_vm1, %v2865_v23, %v5951_v24  ;;  %v3184_v24 = vld [vmem:[#allocation7 + $0x1d0] sm:$0xff] }
 0x7d5   :  { %v3136_v23 = vld [vmem:[#allocation7 + $0x50] sm:$0xff] }
 0x7e1   :  { %v4492_v5 = vpop.eup %4491 }
 0x7e2   :  { %v2867_v30 = vmul.f32 %v4492_v5, %v2862_v10  ;;  %v3130_v10 = vld [vmem:[#allocation7 + $0x20] sm:$0xff]  ;;  %v3132_v5 = vld [vmem:[#allocation7 + $0x30] sm:$0xff] }
 0x7e4   :  { %v6031_v7 = vsel %vm2873_vm1, %v2867_v30, %v5954_v6  ;;  %v3177_v6 = vld [vmem:[#allocation7 + $0x198] sm:$0xff]  ;;  %v3127_v30 = vld [vmem:[#allocation7 + $0x8] sm:$0xff] }
 0x7e5   :  { %2941 = vmatmul.mubr.f32.vlgmr.msra.gmra.mxu0 %v6031_v7  ;;  %3012 = vmatmul.mubr.f32.vlgmr.msra.gmra.mxu1 %v6031_v7 }
 0x7e6   :  { %3254 = vmatprep.mubr.f32.mxu0 %v6910_v59  ;;  %3325 = vmatprep.mubr.f32.mxu1 %v6910_v59 }
 0x7e7   :  { %3191 = vmatpush1.msra.mxu0 %v3186_v35  ;;  %3262 = vmatpush1.msra.mxu1 %v3188_v28  ;;  %v3128_v35 = vld [vmem:[#allocation7 + $0x10] sm:$0xff]  ;;  %v3123_v28 = vld [vmem:[#allocation5 + $0x68] sm:$0xff] }
 0x7e8   :  { %3192 = vmatprep.subr.mxu0 %v3183_v16  ;;  %3263 = vmatprep.subr.mxu1 %v3185_v34  ;;  %v6037_v16 = vld [vmem:[#allocation8 + $0x1e8] sm:$0xff] }
 0x7e9   :  { %3193 = vmatpush1.msra.mxu0 %v3182_v26  ;;  %3264 = vmatpush1.msra.mxu1 %v3184_v24  ;;  %6916 = vst [vmem:[#allocation27_spill] sm:$0xff] %v6037_v16  ;;  %v6917_v24 = vld [vmem:[#allocation64_spill] sm:$0xff] }
 0x7ea   :  { %3194 = vmatprep.subr.mxu0 %v3179_v37  ;;  %3265 = vmatprep.subr.mxu1 %v3181_v12 }
 0x7eb   :  { %3195 = vmatpush1.msra.mxu0 %v3178_v43  ;;  %3266 = vmatpush1.msra.mxu1 %v3180_v25  ;;  %v6918_v43 = vld [vmem:[#allocation73_spill] sm:$0xff] }
 0x7ec   :  { %3196 = vmatprep.subr.mxu0 %v3175_v41  ;;  %3267 = vmatprep.subr.mxu1 %v3177_v6  ;;  %v6919_v41 = vld [vmem:[#allocation66_spill] sm:$0xff] }
 0x7ed   :  { %3197 = vmatpush1.msra.mxu0 %v3174_v60  ;;  %3268 = vmatpush1.msra.mxu1 %v3176_v20  ;;  %v6920_v20 = vld [vmem:[#allocation74_spill] sm:$0xff] }
 0x7ee   :  { %3198 = vmatprep.subr.mxu0 %v3171_v47  ;;  %3269 = vmatprep.subr.mxu1 %v3173_v14 }
 0x7ef   :  { %3199 = vmatpush1.msra.mxu0 %v3170_v1  ;;  %3270 = vmatpush1.msra.mxu1 %v3172_v13 }
 0x7f0   :  { %3200 = vmatprep.subr.mxu0 %v3167_v11  ;;  %3271 = vmatprep.subr.mxu1 %v3169_v36 }
 0x7f1   :  { %3201 = vmatpush1.msra.mxu0 %v3166_v38  ;;  %3272 = vmatpush1.msra.mxu1 %v3168_v40 }
 0x7f2   :  { %3202 = vmatprep.subr.mxu0 %v3163_v42  ;;  %3273 = vmatprep.subr.mxu1 %v3165_v44 }
 0x7f3   :  { %3203 = vmatpush1.msra.mxu0 %v3162_v46  ;;  %3274 = vmatpush1.msra.mxu1 %v3164_v48 }
 0x7f4   :  { %3204 = vmatprep.subr.mxu0 %v3159_v50  ;;  %3275 = vmatprep.subr.mxu1 %v3161_v52  ;;  %v3041_v52 = vpop.permute.xlu0 %3040 }
 0x7f5   :  { %3205 = vmatpush1.msra.mxu0 %v3158_v54  ;;  %3276 = vmatpush1.msra.mxu1 %v3160_v56  ;;  %vm3042_vm2 = vcmp.eq.s32.totalorder %v3041_v52, 1  ;;  %v6172_v52 = vld [vmem:[#allocation8 + $0x20] sm:$0xff] }
 0x7f6   :  { %3206 = vmatprep.subr.mxu0 %v3155_v61  ;;  %3277 = vmatprep.subr.mxu1 %v3157_v63  ;;  %v3122_v63 = vld [vmem:[#allocation5 + $0x60] sm:$0xff]  ;;  %6929 = vst [vmem:[#allocation43_spill] sm:$0xff] %v6172_v52 }
 0x7f7   :  { %3207 = vmatpush1.msra.mxu0 %v3154_v2  ;;  %3278 = vmatpush1.msra.mxu1 %v3156_v3  ;;  %v6045_v2 = vld [vmem:[#allocation8 + $0x1e0] sm:$0xff] }
 0x7f8   :  { %3208 = vmatprep.subr.mxu0 %v3151_v27  ;;  %3279 = vmatprep.subr.mxu1 %v3153_v39  ;;  %v3119_v27 = vld [vmem:[#allocation5 + $0x48] sm:$0xff] }
 0x7f9   :  { %3209 = vmatpush1.msra.mxu0 %v3150_v18  ;;  %3280 = vmatpush1.msra.mxu1 %v3152_v49  ;;  %v6048_v39 = vld [vmem:[#allocation8 + $0x1c8] sm:$0xff]  ;;  %v6050_v18 = vld [vmem:[#allocation8 + $0x1c0] sm:$0xff] }
 0x7fa   :  { %3210 = vmatprep.subr.mxu0 %v3147_v57  ;;  %3281 = vmatprep.subr.mxu1 %v3149_v19  ;;  %v3115_v49 = vld [vmem:[#allocation5 + $0x28] sm:$0xff]  ;;  %v3114_v19 = vld [vmem:[#allocation5 + $0x20] sm:$0xff] }
 0x7fb   :  { %3211 = vmatpush1.msra.mxu0 %v3146_v15  ;;  %3282 = vmatpush1.msra.mxu1 %v3148_v9  ;;  %v6053_v57 = vld [vmem:[#allocation8 + $0x1a8] sm:$0xff]  ;;  %v6056_v15 = vld [vmem:[#allocation8 + $0x1a0] sm:$0xff] }
 0x7fc   :  { %3212 = vmatprep.subr.mxu0 %v3143_v45  ;;  %3283 = vmatprep.subr.mxu1 %v3145_v53  ;;  %v6059_v9 = vld [vmem:[#allocation8 + $0x188] sm:$0xff]  ;;  %v3110_v45 = vld [vmem:[#allocation5] sm:$0xff] }
 0x7fd   :  { %3213 = vmatpush1.msra.mxu0 %v3142_v58  ;;  %3284 = vmatpush1.msra.mxu1 %v3144_v55  ;;  %v6063_v53 = vld [vmem:[#allocation8 + $0x180] sm:$0xff]  ;;  %v3125_v55 = vld [vmem:[#allocation5 + $0x78] sm:$0xff] }
 0x7fe   :  { %3214 = vmatprep.subr.mxu0 %v3139_v4  ;;  %3285 = vmatprep.subr.mxu1 %v3141_v31  ;;  %6921 = vst [vmem:[#allocation38_spill] sm:$0xff] %v6063_v53  ;;  %v3109_v58 = vld [vmem:[%s6528_s2] sm:$0xf]  ;;  %v6069_v4 = vld [vmem:[#allocation8 + $0x168] sm:$0xff]  ;;  %v3124_v31 = vld [vmem:[#allocation5 + $0x70] sm:$0xff] }
 0x7ff   :  { %3215 = vmatpush1.msra.mxu0 %v3138_v51  ;;  %3286 = vmatpush1.msra.mxu1 %v3140_v17  ;;  %v6072_v51 = vld [vmem:[#allocation8 + $0x160] sm:$0xff]  ;;  %v3121_v17 = vld [vmem:[#allocation5 + $0x58] sm:$0xff] }
 0x800   :  { %3216 = vmatprep.subr.mxu0 %v3135_v62  ;;  %3287 = vmatprep.subr.mxu1 %v3137_v0  ;;  %v6076_v62 = vld [vmem:[#allocation8 + $0x148] sm:$0xff]  ;;  %v3120_v0 = vld [vmem:[#allocation5 + $0x50] sm:$0xff] }
 0x801   :  { %3217 = vmatpush1.msra.mxu0 %v3134_v21  ;;  %3288 = vmatpush1.msra.mxu1 %v3136_v23  ;;  %v6079_v21 = vld [vmem:[#allocation8 + $0x140] sm:$0xff]  ;;  %v3117_v23 = vld [vmem:[#allocation5 + $0x38] sm:$0xff] }
 0x802   :  { %3218 = vmatprep.subr.mxu0 %v3131_v32  ;;  %3289 = vmatprep.subr.mxu1 %v3133_v8  ;;  %v6082_v32 = vld [vmem:[#allocation8 + $0x128] sm:$0xff]  ;;  %v3116_v8 = vld [vmem:[#allocation5 + $0x30] sm:$0xff] }
 0x803   :  { %3219 = vmatpush1.msra.mxu0 %v3130_v10  ;;  %3290 = vmatpush1.msra.mxu1 %v3132_v5  ;;  %v6085_v10 = vld [vmem:[#allocation8 + $0x120] sm:$0xff]  ;;  %v3113_v5 = vld [vmem:[#allocation5 + $0x18] sm:$0xff] }
 0x804   :  { %3220 = vmatprep.subr.mxu0 %v3127_v30  ;;  %3291 = vmatprep.subr.mxu1 %v3129_v22  ;;  %v6088_v30 = vld [vmem:[#allocation8 + $0x108] sm:$0xff]  ;;  %v3112_v22 = vld [vmem:[#allocation5 + $0x10] sm:$0xff] }
 0x805   :  { %3221 = vmatpush1.msra.mxu0 %v3126_v33  ;;  %3292 = vmatpush1.msra.mxu1 %v3128_v35  ;;  %v6092_v33 = vld [vmem:[#allocation8 + $0x100] sm:$0xff]  ;;  %v6095_v35 = vld [vmem:[#allocation8 + $0xe8] sm:$0xff] }
 0x806   :  { %3360 = vmatprep.subr.mxu1 %v3123_v28  ;;  %3503 = vmatprep.subr.mxu0 %v6037_v16  ;;  %v6097_v28 = vld [vmem:[#allocation8 + $0x1f8] sm:$0xff] }
 0x807   :  { %6922 = vst [vmem:[#allocation29_spill] sm:$0xff] %v6097_v28 }
 0x8a5   :  { %v2942_v34 = vpop.f32.mrf.mxu0  ;;  %v3013_v26 = vpop.f32.mrf.mxu1 }
 0x8a6   :  { %v3018_v37 = vadd.f32 %v2942_v34, %v6917_v24  ;;  %v3020_v25 = vadd.f32 %v3013_v26, %v6918_v43  ;;  %v6100_v34 = vld [vmem:[#allocation8 + $0xe0] sm:$0xff]  ;;  %v6102_v26 = vld [vmem:[#allocation8 + $0x1f0] sm:$0xff]  ;;  %v6106_v24 = vld [vmem:[#allocation8 + $0xc8] sm:$0xff] }
 0x8a7   :  { %v2944_v12 = vpop.f32.mrf.mxu0  ;;  %v3015_v60 = vpop.f32.mrf.mxu1  ;;  %v6114_v43 = vld [vmem:[#allocation8 + $0x1d0] sm:$0xff] }
 0x8a8   :  { %4493 = vtanh.f32 %v3018_v37  ;;  %v3019_v6 = vadd.f32 %v2944_v12, %v6919_v41  ;;  %v3021_v47 = vadd.f32 %v3015_v60, %v6920_v20  ;;  %v6108_v37 = vld [vmem:[#allocation8 + $0x1d8] sm:$0xff]  ;;  %v6112_v12 = vld [vmem:[#allocation8 + $0xc0] sm:$0xff]  ;;  %v6126_v60 = vld [vmem:[#allocation8 + $0x1b0] sm:$0xff] }
 0x8a9   :  { %v6120_v41 = vld [vmem:[#allocation8 + $0x1b8] sm:$0xff]  ;;  %v6130_v20 = vld [vmem:[#allocation8 + $0x88] sm:$0xff] }
 0x8aa   :  { %4495 = vtanh.f32 %v3019_v6  ;;  %v6124_v6 = vld [vmem:[#allocation8 + $0xa0] sm:$0xff] }
 0x8ab   :  { %4497 = vtanh.f32 %v3020_v25  ;;  %v6118_v25 = vld [vmem:[#allocation8 + $0xa8] sm:$0xff] }
 0x8ac   :  { %4499 = vtanh.f32 %v3021_v47  ;;  %v6132_v47 = vld [vmem:[#allocation8 + $0x198] sm:$0xff] }
 0x8b5   :  { %v4494_v14 = vpop.eup %4493 }
 0x8b6   :  { %v3026_v1 = vadd.f32 1.0, %v4494_v14  ;;  %v6136_v14 = vld [vmem:[#allocation8 + $0x80] sm:$0xff] }
 0x8b7   :  { %v4496_v13 = vpop.eup %4495  ;;  %6923 = vst [vmem:[#allocation39_spill] sm:$0xff] %v6136_v14 }
 0x8b8   :  { %v3027_v11 = vmul.f32 0.5, %v3026_v1  ;;  %v3028_v36 = vadd.f32 1.0, %v4496_v13  ;;  %v4498_v38 = vpop.eup %4497  ;;  %v6138_v1 = vld [vmem:[#allocation8 + $0x190] sm:$0xff]  ;;  %v6142_v13 = vld [vmem:[#allocation8 + $0x68] sm:$0xff] }
 0x8b9   :  { %v4500_v48 = vpop.eup %4499  ;;  %6924 = vst [vmem:[#allocation30_spill] sm:$0xff] %v6142_v13 }
 0x8ba   :  { %v3029_v40 = vmul.f32 0.5, %v3028_v36  ;;  %v3033_v42 = vmul.f32 %v4498_v38, %v3027_v11  ;;  %v3030_v50 = vadd.f32 1.0, %v4500_v48  ;;  %v6144_v11 = vld [vmem:[#allocation8 + $0x178] sm:$0xff]  ;;  %v6148_v36 = vld [vmem:[#allocation8 + $0x60] sm:$0xff]  ;;  %v6150_v38 = vld [vmem:[#allocation8 + $0x170] sm:$0xff] }
 0x8bb   :  { %6925 = vst [vmem:[#allocation40_spill] sm:$0xff] %v6148_v36  ;;  %v6166_v48 = vld [vmem:[#allocation8 + $0x28] sm:$0xff] }
 0x8bc   :  { %v3032_v44 = vmul.f32 %v3029_v40, %v6028_v29  ;;  %v3031_v54 = vmul.f32 0.5, %v3030_v50  ;;  %v3118_v29 = vld [vmem:[#allocation5 + $0x40] sm:$0xff]  ;;  %v6154_v40 = vld [vmem:[#allocation8 + $0x48] sm:$0xff]  ;;  %6928 = vst [vmem:[#allocation21_spill] sm:$0xff] %v6166_v48  ;;  %v6168_v50 = vld [vmem:[#allocation8 + $0x138] sm:$0xff] }
 0x8bd   :  { %6926 = vst [vmem:[#allocation31_spill] sm:$0xff] %v6154_v40 }
 0x8be   :  { %v3034_v46 = vadd.f32 %v3033_v42, %v3032_v44  ;;  %v6156_v42 = vld [vmem:[#allocation8 + $0x158] sm:$0xff]  ;;  %v6160_v44 = vld [vmem:[#allocation8 + $0x40] sm:$0xff] }
 0x8bf   :  { %6927 = vst [vmem:[#allocation41_spill] sm:$0xff] %v6160_v44 }
 0x8c0   :  { %4501 = vtanh.f32 %v3034_v46  ;;  %v6162_v46 = vld [vmem:[#allocation8 + $0x150] sm:$0xff] }
 0x8cd   :  { %v4502_v56 = vpop.eup %4501 }
 0x8ce   :  { %v3036_v61 = vmul.f32 %v4502_v56, %v3031_v54  ;;  %v6174_v54 = vld [vmem:[#allocation8 + $0x130] sm:$0xff]  ;;  %v6178_v56 = vld [vmem:[#allocation8 + $0x8] sm:$0xff] }
 0x8cf   :  { %6930 = vst [vmem:[#allocation55_spill] sm:$0xff] %v6178_v56 }
 0x8d0   :  { %v3043_v3 = vsel %vm3042_vm2, %v3036_v61, %v6031_v7  ;;  %v3111_v7 = vld [vmem:[#allocation5 + $0x8] sm:$0xff]  ;;  %v6180_v61 = vld [vmem:[#allocation8 + $0x118] sm:$0xff] }
 0x8d1   :  { %3255 = vmatmul.mubr.f32.vlgmr.msra.gmra.mxu0 %v3043_v3  ;;  %3326 = vmatmul.mubr.f32.vlgmr.msra.gmra.mxu1 %v3043_v3  ;;  %v6188_v3 = vld [vmem:[#allocation8 + $0x110] sm:$0xff] }
 0x8d2   :  { %3361 = vmatpush1.msra.mxu1 %v3122_v63  ;;  %3504 = vmatpush1.msra.mxu0 %v6045_v2  ;;  %v6184_v63 = vld [vmem:[#allocation8] sm:$0xff] }
 0x8d3   :  { %3362 = vmatprep.subr.mxu1 %v3119_v27  ;;  %3505 = vmatprep.subr.mxu0 %v6048_v39  ;;  %6931 = vst [vmem:[#allocation44_spill] sm:$0xff] %v6184_v63  ;;  %v6192_v27 = vld [vmem:[#allocation8 + $0xf8] sm:$0xff] }
 0x8d4   :  { %3363 = vmatpush1.msra.mxu1 %v3118_v29  ;;  %3506 = vmatpush1.msra.mxu0 %v6050_v18  ;;  %v6196_v29 = vld [vmem:[#allocation8 + $0xf0] sm:$0xff] }
 0x8d5   :  { %3364 = vmatprep.subr.mxu1 %v3115_v49  ;;  %3507 = vmatprep.subr.mxu0 %v6053_v57  ;;  %v6200_v49 = vld [vmem:[#allocation8 + $0xd8] sm:$0xff] }
 0x8d6   :  { %3365 = vmatpush1.msra.mxu1 %v3114_v19  ;;  %3508 = vmatpush1.msra.mxu0 %v6056_v15  ;;  %v6203_v19 = vld [vmem:[#allocation8 + $0xd0] sm:$0xff] }
 0x8d7   :  { %3366 = vmatprep.subr.mxu1 %v3111_v7  ;;  %3509 = vmatprep.subr.mxu0 %v6059_v9  ;;  %v6207_v7 = vld [vmem:[#allocation8 + $0xb8] sm:$0xff] }
 0x8d8   :  { %3367 = vmatpush1.msra.mxu1 %v3110_v45  ;;  %3400 = vmatprep.mubr.f32.mxu1 %v6910_v59  ;;  %v6211_v45 = vld [vmem:[#allocation8 + $0xb0] sm:$0xff] }
 0x8d9   :  { %3510 = vmatpush1.msra.mxu0 %v6063_v53  ;;  %4343 = vmatmul.mubr.msk.f32.vlgmr.msra.gmra.mxu1 %vm3332_vm3, %v3109_v58 }
 0x8da   :  { %3431 = vmatprep.subr.mxu1 %v3125_v55  ;;  %3511 = vmatprep.subr.mxu0 %v6069_v4  ;;  %v6219_v55 = vld [vmem:[#allocation8 + $0x90] sm:$0xff] }
 0x8db   :  { %3432 = vmatpush1.msra.mxu1 %v3124_v31  ;;  %3512 = vmatpush1.msra.mxu0 %v6072_v51  ;;  %6933 = vst [vmem:[#allocation45_spill] sm:$0xff] %v6219_v55  ;;  %v6223_v31 = vld [vmem:[#allocation8 + $0x78] sm:$0xff] }
 0x8dc   :  { %3433 = vmatprep.subr.mxu1 %v3121_v17  ;;  %3513 = vmatprep.subr.mxu0 %v6076_v62  ;;  %6934 = vst [vmem:[#allocation59_spill] sm:$0xff] %v6223_v31  ;;  %v6227_v17 = vld [vmem:[#allocation8 + $0x70] sm:$0xff] }
 0x8dd   :  { %3434 = vmatpush1.msra.mxu1 %v3120_v0  ;;  %3514 = vmatpush1.msra.mxu0 %v6079_v21  ;;  %6935 = vst [vmem:[#allocation46_spill] sm:$0xff] %v6227_v17  ;;  %v6231_v0 = vld [vmem:[#allocation8 + $0x58] sm:$0xff] }
 0x8de   :  { %3435 = vmatprep.subr.mxu1 %v3117_v23  ;;  %3515 = vmatprep.subr.mxu0 %v6082_v32  ;;  %6936 = vst [vmem:[#allocation61_spill] sm:$0xff] %v6231_v0  ;;  %v6235_v23 = vld [vmem:[#allocation8 + $0x50] sm:$0xff] }
 0x8df   :  { %3436 = vmatpush1.msra.mxu1 %v3116_v8  ;;  %3516 = vmatpush1.msra.mxu0 %v6085_v10  ;;  %6937 = vst [vmem:[#allocation48_spill] sm:$0xff] %v6235_v23  ;;  %v6239_v8 = vld [vmem:[#allocation8 + $0x38] sm:$0xff] }
 0x8e0   :  { %3437 = vmatprep.subr.mxu1 %v3113_v5  ;;  %3517 = vmatprep.subr.mxu0 %v6088_v30  ;;  %6938 = vst [vmem:[#allocation63_spill] sm:$0xff] %v6239_v8  ;;  %v6243_v5 = vld [vmem:[#allocation8 + $0x30] sm:$0xff] }
 0x8e1   :  { %3438 = vmatpush1.msra.mxu1 %v3112_v22  ;;  %3471 = vmatprep.mubr.f32.mxu1 %v6910_v59  ;;  %6939 = vst [vmem:[#allocation50_spill] sm:$0xff] %v6243_v5  ;;  %v6247_v22 = vld [vmem:[#allocation8 + $0x18] sm:$0xff] }
 0x8e2   :  { %3518 = vmatpush1.msra.mxu0 %v6092_v33  ;;  %4344 = vmatmul.mubr.msk.f32.vlgmr.msra.gmra.mxu1 %vm3332_vm3, %v3109_v58  ;;  %v6215_v58 = vld [vmem:[#allocation8 + $0x98] sm:$0xff]  ;;  %6940 = vst [vmem:[#allocation65_spill] sm:$0xff] %v6247_v22 }
 0x8e3   :  { %3519 = vmatprep.subr.mxu0 %v6095_v35  ;;  %3574 = vmatprep.subr.mxu1 %v6097_v28  ;;  %6932 = vst [vmem:[#allocation57_spill] sm:$0xff] %v6215_v58 }
 0x8e4   :  { %3520 = vmatpush1.msra.mxu0 %v6100_v34  ;;  %3575 = vmatpush1.msra.mxu1 %v6102_v26 }
 0x8e5   :  { %3521 = vmatprep.subr.mxu0 %v6106_v24  ;;  %3576 = vmatprep.subr.mxu1 %v6108_v37 }
 0x8e6   :  { %3522 = vmatpush1.msra.mxu0 %v6112_v12  ;;  %3577 = vmatpush1.msra.mxu1 %v6114_v43 }
 0x8e7   :  { %3523 = vmatprep.subr.mxu0 %v6118_v25  ;;  %3578 = vmatprep.subr.mxu1 %v6120_v41 }
 0x8e8   :  { %3524 = vmatpush1.msra.mxu0 %v6124_v6  ;;  %3579 = vmatpush1.msra.mxu1 %v6126_v60 }
 0x8e9   :  { %3525 = vmatprep.subr.mxu0 %v6130_v20  ;;  %3580 = vmatprep.subr.mxu1 %v6132_v47 }
 0x8ea   :  { %3526 = vmatpush1.msra.mxu0 %v6136_v14  ;;  %3581 = vmatpush1.msra.mxu1 %v6138_v1 }
 0x8eb   :  { %3527 = vmatprep.subr.mxu0 %v6142_v13  ;;  %3582 = vmatprep.subr.mxu1 %v6144_v11 }
 0x8ec   :  { %3528 = vmatpush1.msra.mxu0 %v6148_v36  ;;  %3583 = vmatpush1.msra.mxu1 %v6150_v38 }
 0x8ed   :  { %3529 = vmatprep.subr.mxu0 %v6154_v40  ;;  %3584 = vmatprep.subr.mxu1 %v6156_v42 }
 0x8ee   :  { %3530 = vmatpush1.msra.mxu0 %v6160_v44  ;;  %3585 = vmatpush1.msra.mxu1 %v6162_v46 }
 0x8ef   :  { %3531 = vmatprep.subr.mxu0 %v6166_v48  ;;  %3586 = vmatprep.subr.mxu1 %v6168_v50 }
 0x8f0   :  { %3532 = vmatpush1.msra.mxu0 %v6172_v52  ;;  %3587 = vmatpush1.msra.mxu1 %v6174_v54 }
 0x8f1   :  { %3533 = vmatprep.subr.mxu0 %v6178_v56  ;;  %3588 = vmatprep.subr.mxu1 %v6180_v61 }
 0x8f2   :  { %3534 = vmatpush1.msra.mxu0 %v6184_v63  ;;  %3567 = vmatprep.mubr.f32.mxu0 %v6910_v59 }
 0x8f3   :  { %3589 = vmatpush1.msra.mxu1 %v6188_v3  ;;  %3568 = vmatmul.mubr.f32.vlgmr.msra.gmra.mxu0 %v6910_v59 }
 0x8f4   :  { %3590 = vmatprep.subr.mxu1 %v6192_v27  ;;  %3638 = vmatprep.mubr.f32.mxu1 %v6910_v59 }
 0x8f5   :  { %3591 = vmatpush1.msra.mxu1 %v6196_v29  ;;  %3664 = vmatprep.subr.mxu0 %v6037_v16 }
 0x8f6   :  { %3592 = vmatprep.subr.mxu1 %v6200_v49  ;;  %3665 = vmatpush1.msra.mxu0 %v6045_v2 }
 0x8f7   :  { %3593 = vmatpush1.msra.mxu1 %v6203_v19  ;;  %3666 = vmatprep.subr.mxu0 %v6048_v39 }
 0x8f8   :  { %3594 = vmatprep.subr.mxu1 %v6207_v7  ;;  %3667 = vmatpush1.msra.mxu0 %v6050_v18 }
 0x8f9   :  { %3595 = vmatpush1.msra.mxu1 %v6211_v45  ;;  %3668 = vmatprep.subr.mxu0 %v6053_v57 }
 0x8fa   :  { %3596 = vmatprep.subr.mxu1 %v6215_v58  ;;  %3669 = vmatpush1.msra.mxu0 %v6056_v15 }
 0x8fb   :  { %3597 = vmatpush1.msra.mxu1 %v6219_v55  ;;  %3670 = vmatprep.subr.mxu0 %v6059_v9 }
 0x8fc   :  { %3598 = vmatprep.subr.mxu1 %v6223_v31  ;;  %3671 = vmatpush1.msra.mxu0 %v6063_v53  ;;  %v6251_v53 = vld [vmem:[#allocation8 + $0x10] sm:$0xff] }
 0x8fd   :  { %3599 = vmatpush1.msra.mxu1 %v6227_v17  ;;  %3672 = vmatprep.subr.mxu0 %v6069_v4  ;;  %6941 = vst [vmem:[#allocation52_spill] sm:$0xff] %v6251_v53 }
 0x8fe   :  { %3600 = vmatprep.subr.mxu1 %v6231_v0  ;;  %3673 = vmatpush1.msra.mxu0 %v6072_v51 }
 0x8ff   :  { %3601 = vmatpush1.msra.mxu1 %v6235_v23  ;;  %3674 = vmatprep.subr.mxu0 %v6076_v62 }
 0x900   :  { %3602 = vmatprep.subr.mxu1 %v6239_v8  ;;  %3675 = vmatpush1.msra.mxu0 %v6079_v21 }
 0x901   :  { %3603 = vmatpush1.msra.mxu1 %v6243_v5  ;;  %3676 = vmatprep.subr.mxu0 %v6082_v32 }
 0x902   :  { %3604 = vmatprep.subr.mxu1 %v6247_v22  ;;  %3677 = vmatpush1.msra.mxu0 %v6085_v10 }
 0x903   :  { %3605 = vmatpush1.msra.mxu1 %v6251_v53  ;;  %3678 = vmatprep.subr.mxu0 %v6088_v30 }
 0x904   :  { %3639 = vmatmul.mubr.f32.vlgmr.msra.gmra.mxu1 %v6910_v59  ;;  %3735 = vmatprep.subr.mxu1 %v6097_v28 }
 0x905   :  { %3736 = vmatpush1.msra.mxu1 %v6102_v26  ;;  %3679 = vmatpush1.msra.mxu0 %v6092_v33 }
 0x906   :  { %3737 = vmatprep.subr.mxu1 %v6108_v37  ;;  %3680 = vmatprep.subr.mxu0 %v6095_v35 }
 0x907   :  { %3738 = vmatpush1.msra.mxu1 %v6114_v43  ;;  %3681 = vmatpush1.msra.mxu0 %v6100_v34 }
 0x908   :  { %3739 = vmatprep.subr.mxu1 %v6120_v41  ;;  %3682 = vmatprep.subr.mxu0 %v6106_v24 }
 0x909   :  { %3740 = vmatpush1.msra.mxu1 %v6126_v60  ;;  %3683 = vmatpush1.msra.mxu0 %v6112_v12 }
 0x90a   :  { %3741 = vmatprep.subr.mxu1 %v6132_v47  ;;  %3684 = vmatprep.subr.mxu0 %v6118_v25 }
 0x90b   :  { %3742 = vmatpush1.msra.mxu1 %v6138_v1  ;;  %3685 = vmatpush1.msra.mxu0 %v6124_v6 }
 0x90c   :  { %3743 = vmatprep.subr.mxu1 %v6144_v11  ;;  %3686 = vmatprep.subr.mxu0 %v6130_v20 }
 0x90d   :  { %3744 = vmatpush1.msra.mxu1 %v6150_v38  ;;  %3687 = vmatpush1.msra.mxu0 %v6136_v14 }
 0x90e   :  { %3745 = vmatprep.subr.mxu1 %v6156_v42  ;;  %3688 = vmatprep.subr.mxu0 %v6142_v13 }
 0x90f   :  { %3746 = vmatpush1.msra.mxu1 %v6162_v46  ;;  %3689 = vmatpush1.msra.mxu0 %v6148_v36 }
 0x910   :  { %3747 = vmatprep.subr.mxu1 %v6168_v50  ;;  %3690 = vmatprep.subr.mxu0 %v6154_v40 }
 0x911   :  { %3748 = vmatpush1.msra.mxu1 %v6174_v54  ;;  %3691 = vmatpush1.msra.mxu0 %v6160_v44 }
 0x912   :  { %3749 = vmatprep.subr.mxu1 %v6180_v61  ;;  %3692 = vmatprep.subr.mxu0 %v6166_v48 }
 0x913   :  { %3750 = vmatpush1.msra.mxu1 %v6188_v3  ;;  %3693 = vmatpush1.msra.mxu0 %v6172_v52 }
 0x914   :  { %3751 = vmatprep.subr.mxu1 %v6192_v27  ;;  %3694 = vmatprep.subr.mxu0 %v6178_v56 }
 0x915   :  { %3752 = vmatpush1.msra.mxu1 %v6196_v29  ;;  %3695 = vmatpush1.msra.mxu0 %v6184_v63 }
 0x916   :  { %3753 = vmatprep.subr.mxu1 %v6200_v49  ;;  %3728 = vmatprep.mubr.f32.mxu0 %v6910_v59 }
 0x917   :  { %3754 = vmatpush1.msra.mxu1 %v6203_v19  ;;  %3799 = vmatprep.mubr.f32.mxu1 %v6910_v59 }
 0x918   :  { %3755 = vmatprep.subr.mxu1 %v6207_v7  ;;  %3843 = vmatprep.subr.mxu0 %v6037_v16 }
 0x919   :  { %3756 = vmatpush1.msra.mxu1 %v6211_v45 }
 0x91a   :  { %3757 = vmatprep.subr.mxu1 %v6215_v58 }
 0x91b   :  { %3758 = vmatpush1.msra.mxu1 %v6219_v55 }
 0x91c   :  { %3759 = vmatprep.subr.mxu1 %v6223_v31 }
 0x91d   :  { %3760 = vmatpush1.msra.mxu1 %v6227_v17 }
 0x91e   :  { %3761 = vmatprep.subr.mxu1 %v6231_v0 }
 0x91f   :  { %3762 = vmatpush1.msra.mxu1 %v6235_v23  ;;  %v3108_v23 = vld [vmem:[%s6535_s9] sm:$0xf] }
 0x920   :  { %3763 = vmatprep.subr.mxu1 %v6239_v8  ;;  %v6942_v8 = vld [vmem:[#allocation42_spill] sm:$0xff] }
 0x921   :  { %3764 = vmatpush1.msra.mxu1 %v6243_v5  ;;  %v6943_v0 = vsub.s32 1, %v6942_v8 }
 0x922   :  { %3765 = vmatprep.subr.mxu1 %v6247_v22 }
 0x923   :  { %3766 = vmatpush1.msra.mxu1 %v6251_v53  ;;  %v3486_v5 = vrot.slane %v3108_v23, %v6943_v0  ;;  %v6944_v53 = vsub.s32 0, %v6942_v8 }
 0x924   :  { %3914 = vmatprep.subr.mxu1 %v6097_v28 }
 0x925   :  { %v3482_v17 = vrot.slane %v3108_v23, %v6944_v53 }
 0x991   :  { %v3327_v16 = vpop.f32.mrf.mxu1  ;;  %v3256_v56 = vpop.f32.mrf.mxu0 }
 0x993   :  { %v3329_v59 = vpop.f32.mrf.mxu1  ;;  %v3258_v48 = vpop.f32.mrf.mxu0 }
 0x999   :  { %v3402_v63 = vpop.f32.mrf.mxu1 }
 0x99a   :  { %v3403_v22 = vadd.f32 %v3402_v63, %v3256_v56 }
 0x99b   :  { %v3404_v52 = vpop.f32.mrf.mxu1 }
 0x99c   :  { %v3405_v44 = vadd.f32 %v3404_v52, %v3258_v48  ;;  %v6323_v31 = vadd.f32 %v3482_v17, %v3403_v22  ;;  %v6947_v52 = vsub.s32 2, %v6942_v8  ;;  %v6948_v17 = vsub.s32 3, %v6942_v8 }
 0x99e   :  { %v6321_v36 = vadd.f32 %v3486_v5, %v3405_v44  ;;  %6946 = vst [vmem:[#allocation54_spill] sm:$0xff] %v6323_v31  ;;  %v3490_v0 = vrot.slane %v3108_v23, %v6947_v52  ;;  %v3494_v22 = vrot.slane %v3108_v23, %v6948_v17  ;;  %v6951_v17 = vld [vmem:[#allocation39_spill] sm:$0xff] }
 0x9a0   :  { %6945 = vst [vmem:[#allocation67_spill] sm:$0xff] %v6321_v36 }
 0x9a2   :  { %v3473_v14 = vpop.f32.mrf.mxu1 }
 0x9a3   :  { %v3474_v48 = vadd.f32 %v3473_v14, %v3327_v16 }
 0x9a4   :  { %v3475_v56 = vpop.f32.mrf.mxu1 }
 0x9a5   :  { %v6329_v63 = vadd.f32 %v3490_v0, %v3474_v48  ;;  %v3476_v5 = vadd.f32 %v3475_v56, %v3329_v59 }
 0x9b3   :  { %v3569_v40 = vpop.f32.mrf.mxu0 }
 0x9b4   :  { %v3645_v55 = vadd.f32 %v3569_v40, %v6323_v31 }
 0x9b5   :  { %v3571_v28 = vpop.f32.mrf.mxu0 }
 0x9b6   :  { %v3646_v13 = vadd.f32 %v3571_v28, %v6321_v36  ;;  %v6334_v36 = vadd.f32 %v3494_v22, %v3476_v5  ;;  %v6952_v22 = vld [vmem:[#allocation45_spill] sm:$0xff] }
 0x9b8   :  { %4503 = vtanh.f32 %v3646_v13 }
 0x9b9   :  { %4505 = vtanh.f32 %v3645_v55 }
 0x9c4   :  { %v3640_v53 = vpop.f32.mrf.mxu1 }
 0x9c5   :  { %v3647_v44 = vadd.f32 %v3640_v53, %v6329_v63  ;;  %v4504_v28 = vpop.eup %4503 }
 0x9c6   :  { %v3642_v40 = vpop.f32.mrf.mxu1  ;;  %v4506_v16 = vpop.eup %4505  ;;  %v3655_v14 = vadd.f32 1.0, %v4504_v28  ;;  %v6953_v28 = vld [vmem:[#allocation30_spill] sm:$0xff] }
 0x9c7   :  { %4507 = vtanh.f32 %v3647_v44  ;;  %v3648_v13 = vadd.f32 %v3642_v40, %v6334_v36  ;;  %v3653_v55 = vadd.f32 1.0, %v4506_v16  ;;  %v6954_v40 = vld [vmem:[#allocation59_spill] sm:$0xff]  ;;  %v6955_v16 = vld [vmem:[#allocation40_spill] sm:$0xff] }
 0x9c8   :  { %v3656_v52 = vmul.f32 0.5, %v3655_v14  ;;  %v6956_v14 = vld [vmem:[#allocation46_spill] sm:$0xff] }
 0x9c9   :  { %4509 = vtanh.f32 %v3648_v13  ;;  %v3654_v48 = vmul.f32 0.5, %v3653_v55  ;;  %v6957_v13 = vld [vmem:[#allocation31_spill] sm:$0xff]  ;;  %v6958_v55 = vld [vmem:[#allocation61_spill] sm:$0xff] }
 0x9ca   :  { %v3659_v31 = vmul.f32 0.0, %v3656_v52  ;;  %v6959_v52 = vld [vmem:[#allocation41_spill] sm:$0xff] }
 0x9d4   :  { %v4508_v0 = vpop.eup %4507 }
 0x9d5   :  { %v3660_v53 = vmul.f32 %v4508_v0, %v3654_v48  ;;  %v6960_v48 = vld [vmem:[#allocation48_spill] sm:$0xff]  ;;  %v6961_v0 = vld [vmem:[#allocation21_spill] sm:$0xff] }
 0x9d6   :  { %v4510_v23 = vpop.eup %4509 }
 0x9d7   :  { %v6337_v59 = vadd.f32 %v3660_v53, %v3659_v31  ;;  %v3657_v8 = vadd.f32 1.0, %v4510_v23  ;;  %v6950_v31 = vld [vmem:[#allocation38_spill] sm:$0xff]  ;;  %v6962_v53 = vld [vmem:[#allocation63_spill] sm:$0xff] }
 0x9d8   :  { %v6963_v23 = vld [vmem:[#allocation43_spill] sm:$0xff] }
 0x9d9   :  { %4511 = vtanh.f32 %v6337_v59  ;;  %v3658_v56 = vmul.f32 0.5, %v3657_v8  ;;  %v6964_v8 = vld [vmem:[#allocation50_spill] sm:$0xff] }
 0x9e6   :  { %v4512_v44 = vpop.eup %4511 }
 0x9e7   :  { %v6340_v5 = vmul.f32 %v4512_v44, %v3658_v56  ;;  %v6965_v56 = vld [vmem:[#allocation55_spill] sm:$0xff]  ;;  %v6966_v44 = vld [vmem:[#allocation65_spill] sm:$0xff] }
 0x9e9   :  { %6949 = vst [vmem:[#allocation68_spill] sm:$0xff] %v6340_v5  ;;  %3729 = vmatmul.mubr.f32.vlgmr.msra.gmra.mxu0 %v6340_v5  ;;  %3800 = vmatmul.mubr.f32.vlgmr.msra.gmra.mxu1 %v6340_v5  ;;  %v6967_v5 = vld [vmem:[#allocation44_spill] sm:$0xff] }
 0x9ea   :  { %3844 = vmatpush1.msra.mxu0 %v6045_v2  ;;  %3915 = vmatpush1.msra.mxu1 %v6102_v26 }
 0x9eb   :  { %3845 = vmatprep.subr.mxu0 %v6048_v39  ;;  %3916 = vmatprep.subr.mxu1 %v6108_v37 }
 0x9ec   :  { %3846 = vmatpush1.msra.mxu0 %v6050_v18  ;;  %3917 = vmatpush1.msra.mxu1 %v6114_v43 }
 0x9ed   :  { %3847 = vmatprep.subr.mxu0 %v6053_v57  ;;  %3918 = vmatprep.subr.mxu1 %v6120_v41 }
 0x9ee   :  { %3848 = vmatpush1.msra.mxu0 %v6056_v15  ;;  %3919 = vmatpush1.msra.mxu1 %v6126_v60 }
 0x9ef   :  { %3849 = vmatprep.subr.mxu0 %v6059_v9  ;;  %3920 = vmatprep.subr.mxu1 %v6132_v47 }
 0x9f0   :  { %3850 = vmatpush1.msra.mxu0 %v6950_v31  ;;  %3921 = vmatpush1.msra.mxu1 %v6138_v1 }
 0x9f1   :  { %3851 = vmatprep.subr.mxu0 %v6069_v4  ;;  %3922 = vmatprep.subr.mxu1 %v6144_v11 }
 0x9f2   :  { %3852 = vmatpush1.msra.mxu0 %v6072_v51  ;;  %3923 = vmatpush1.msra.mxu1 %v6150_v38 }
 0x9f3   :  { %3853 = vmatprep.subr.mxu0 %v6076_v62  ;;  %3924 = vmatprep.subr.mxu1 %v6156_v42 }
 0x9f4   :  { %3854 = vmatpush1.msra.mxu0 %v6079_v21  ;;  %3925 = vmatpush1.msra.mxu1 %v6162_v46 }
 0x9f5   :  { %3855 = vmatprep.subr.mxu0 %v6082_v32  ;;  %3926 = vmatprep.subr.mxu1 %v6168_v50 }
 0x9f6   :  { %3856 = vmatpush1.msra.mxu0 %v6085_v10  ;;  %3927 = vmatpush1.msra.mxu1 %v6174_v54 }
 0x9f7   :  { %3857 = vmatprep.subr.mxu0 %v6088_v30  ;;  %3928 = vmatprep.subr.mxu1 %v6180_v61 }
 0x9f8   :  { %3858 = vmatpush1.msra.mxu0 %v6092_v33  ;;  %3929 = vmatpush1.msra.mxu1 %v6188_v3 }
 0x9f9   :  { %3859 = vmatprep.subr.mxu0 %v6095_v35  ;;  %3930 = vmatprep.subr.mxu1 %v6192_v27 }
 0x9fa   :  { %3860 = vmatpush1.msra.mxu0 %v6100_v34  ;;  %3931 = vmatpush1.msra.mxu1 %v6196_v29 }
 0x9fb   :  { %3861 = vmatprep.subr.mxu0 %v6106_v24  ;;  %3932 = vmatprep.subr.mxu1 %v6200_v49 }
 0x9fc   :  { %3862 = vmatpush1.msra.mxu0 %v6112_v12  ;;  %3933 = vmatpush1.msra.mxu1 %v6203_v19 }
 0x9fd   :  { %3863 = vmatprep.subr.mxu0 %v6118_v25  ;;  %3934 = vmatprep.subr.mxu1 %v6207_v7 }
 0x9fe   :  { %3864 = vmatpush1.msra.mxu0 %v6124_v6  ;;  %3935 = vmatpush1.msra.mxu1 %v6211_v45 }
 0x9ff   :  { %3865 = vmatprep.subr.mxu0 %v6130_v20  ;;  %3936 = vmatprep.subr.mxu1 %v6215_v58 }
 0xa00   :  { %3866 = vmatpush1.msra.mxu0 %v6951_v17  ;;  %3937 = vmatpush1.msra.mxu1 %v6952_v22 }
 0xa01   :  { %3867 = vmatprep.subr.mxu0 %v6953_v28  ;;  %3938 = vmatprep.subr.mxu1 %v6954_v40 }
 0xa02   :  { %3868 = vmatpush1.msra.mxu0 %v6955_v16  ;;  %3939 = vmatpush1.msra.mxu1 %v6956_v14  ;;  %v6972_v14 = vld [vmem:[#allocation54_spill] sm:$0xff] }
 0xa03   :  { %3869 = vmatprep.subr.mxu0 %v6957_v13  ;;  %3940 = vmatprep.subr.mxu1 %v6958_v55  ;;  %v6968_v13 = vmov 0.0   ;;  %v6969_v55 = vld [vmem:[#allocation52_spill] sm:$0xff] }
 0xa04   :  { %3870 = vmatpush1.msra.mxu0 %v6959_v52  ;;  %3941 = vmatpush1.msra.mxu1 %v6960_v48  ;;  %v6970_v48 = vld [vmem:[#allocation27_spill] sm:$0xff] }
 0xa05   :  { %3871 = vmatprep.subr.mxu0 %v6961_v0  ;;  %3942 = vmatprep.subr.mxu1 %v6962_v53  ;;  %v6971_v0 = vld [vmem:[#allocation29_spill] sm:$0xff] }
 0xa06   :  { %3872 = vmatpush1.msra.mxu0 %v6963_v23  ;;  %3943 = vmatpush1.msra.mxu1 %v6964_v8 }
 0xa07   :  { %3873 = vmatprep.subr.mxu0 %v6965_v56  ;;  %3944 = vmatprep.subr.mxu1 %v6966_v44 }
 0xa08   :  { %3874 = vmatpush1.msra.mxu0 %v6967_v5  ;;  %3907 = vmatprep.mubr.f32.mxu0 %v6968_v13  ;;  %v6973_v5 = vld [vmem:[#allocation67_spill] sm:$0xff] }
 0xa09   :  { %3945 = vmatpush1.msra.mxu1 %v6969_v55  ;;  %3978 = vmatprep.mubr.f32.mxu1 %v6968_v13 }
 0xa0a   :  { %4022 = vmatprep.subr.mxu0 %v6970_v48  ;;  %4093 = vmatprep.subr.mxu1 %v6971_v0 }
 0xaa9   :  { %v3730_v53 = vpop.f32.mrf.mxu0  ;;  %v3801_v23 = vpop.f32.mrf.mxu1 }
 0xaaa   :  { %v3810_v52 = vrot.slane %v3730_v53, 7  ;;  %v3812_v16 = vrot.slane %v3801_v23, 7  ;;  %v3833_v23 = vrot.slane %v6337_v59, 7 }
 0xaab   :  { %v3732_v8 = vpop.f32.mrf.mxu0  ;;  %v3803_v55 = vpop.f32.mrf.mxu1 }
 0xaac   :  { %v3818_v56 = vadd.f32 %v3810_v52, %v6972_v14  ;;  %v3811_v44 = vrot.slane %v3732_v8, 7  ;;  %v3820_v28 = vadd.f32 %v3812_v16, %v6329_v63  ;;  %v3813_v13 = vrot.slane %v3803_v55, 7 }
 0xaae   :  { %4513 = vtanh.f32 %v3818_v56  ;;  %v3819_v40 = vadd.f32 %v3811_v44, %v6973_v5  ;;  %v3821_v48 = vadd.f32 %v3813_v13, %v6334_v36 }
 0xab0   :  { %4515 = vtanh.f32 %v3819_v40 }
 0xab1   :  { %4517 = vtanh.f32 %v3820_v28 }
 0xab2   :  { %4519 = vtanh.f32 %v3821_v48 }
 0xabb   :  { %v4514_v0 = vpop.eup %4513 }
 0xabc   :  { %v3826_v22 = vadd.f32 1.0, %v4514_v0 }
 0xabd   :  { %v4516_v17 = vpop.eup %4515 }
 0xabe   :  { %v3827_v53 = vmul.f32 0.5, %v3826_v22  ;;  %v3828_v58 = vadd.f32 1.0, %v4516_v17  ;;  %v4518_v8 = vpop.eup %4517 }
 0xabf   :  { %v4520_v28 = vpop.eup %4519 }
 0xac0   :  { %v3829_v52 = vmul.f32 0.5, %v3828_v58  ;;  %v3836_v44 = vmul.f32 %v4518_v8, %v3827_v53  ;;  %v3830_v40 = vadd.f32 1.0, %v4520_v28  ;;  %v4217_v28 = vld [vmem:[#allocation10 + $0x68] sm:$0xff] }
 0xac2   :  { %v3835_v56 = vmul.f32 %v3833_v23, %v3829_v52  ;;  %v3831_v16 = vmul.f32 0.5, %v3830_v40  ;;  %v6995_v52 = vld [vmem:[#allocation68_spill] sm:$0xff] }
 0xac3   :  { %v4216_v40 = vld [vmem:[#allocation10 + $0x60] sm:$0xff] }
 0xac4   :  { %v6415_v5 = vadd.f32 %v3836_v44, %v3835_v56  ;;  %v4218_v44 = vld [vmem:[#allocation10 + $0x70] sm:$0xff] }
 0xac6   :  { %4521 = vtanh.f32 %v6415_v5 }
 0xad3   :  { %v4522_v13 = vpop.eup %4521 }
 0xad4   :  { %v6418_v55 = vmul.f32 %v4522_v13, %v3831_v16  ;;  %v4215_v16 = vld [vmem:[#allocation10 + $0x58] sm:$0xff]  ;;  %v4214_v13 = vld [vmem:[#allocation10 + $0x50] sm:$0xff] }
 0xad6   :  { %v3841_v22 = vrot.slane %v6418_v55, 1  ;;  %v4199_v23 = vsel %vm4198_vm4, %v6995_v52, %v6418_v55  ;;  %v4213_v55 = vld [vmem:[#allocation10 + $0x48] sm:$0xff] }
 0xad8   :  { %3908 = vmatmul.mubr.f32.vlgmr.msra.gmra.mxu0 %v3841_v22  ;;  %3979 = vmatmul.mubr.f32.vlgmr.msra.gmra.mxu1 %v3841_v22  ;;  %v4212_v22 = vld [vmem:[#allocation10 + $0x40] sm:$0xff] }
 0xad9   :  { %4023 = vmatpush1.msra.mxu0 %v6045_v2  ;;  %4094 = vmatpush1.msra.mxu1 %v6102_v26  ;;  %v6974_v2 = vld [vmem:[#allocation57_spill] sm:$0xff] }
 0xada   :  { %4024 = vmatprep.subr.mxu0 %v6048_v39  ;;  %4095 = vmatprep.subr.mxu1 %v6108_v37  ;;  %v6975_v39 = vld [vmem:[#allocation39_spill] sm:$0xff]  ;;  %v6990_v26 = vld [vmem:[#allocation65_spill] sm:$0xff]  ;;  %v6992_v37 = vmov 0.0  }
 0xadb   :  { %4025 = vmatpush1.msra.mxu0 %v6050_v18  ;;  %4096 = vmatpush1.msra.mxu1 %v6114_v43  ;;  %v6976_v18 = vld [vmem:[#allocation45_spill] sm:$0xff] }
 0xadc   :  { %4026 = vmatprep.subr.mxu0 %v6053_v57  ;;  %4097 = vmatprep.subr.mxu1 %v6120_v41  ;;  %v6977_v57 = vld [vmem:[#allocation30_spill] sm:$0xff] }
 0xadd   :  { %4027 = vmatpush1.msra.mxu0 %v6056_v15  ;;  %4098 = vmatpush1.msra.mxu1 %v6126_v60  ;;  %v6978_v15 = vld [vmem:[#allocation59_spill] sm:$0xff] }
 0xade   :  { %4028 = vmatprep.subr.mxu0 %v6059_v9  ;;  %4099 = vmatprep.subr.mxu1 %v6132_v47  ;;  %v6979_v9 = vld [vmem:[#allocation40_spill] sm:$0xff] }
 0xadf   :  { %4029 = vmatpush1.msra.mxu0 %v6950_v31  ;;  %4100 = vmatpush1.msra.mxu1 %v6138_v1  ;;  %v6994_v1 = vld [vmem:[#allocation67_spill] sm:$0xff] }
 0xae0   :  { %4030 = vmatprep.subr.mxu0 %v6069_v4  ;;  %4101 = vmatprep.subr.mxu1 %v6144_v11  ;;  %v6980_v4 = vld [vmem:[#allocation46_spill] sm:$0xff] }
 0xae1   :  { %4031 = vmatpush1.msra.mxu0 %v6072_v51  ;;  %4102 = vmatpush1.msra.mxu1 %v6150_v38  ;;  %v6981_v51 = vld [vmem:[#allocation31_spill] sm:$0xff] }
 0xae2   :  { %4032 = vmatprep.subr.mxu0 %v6076_v62  ;;  %4103 = vmatprep.subr.mxu1 %v6156_v42  ;;  %v6982_v62 = vld [vmem:[#allocation61_spill] sm:$0xff] }
 0xae3   :  { %4033 = vmatpush1.msra.mxu0 %v6079_v21  ;;  %4104 = vmatpush1.msra.mxu1 %v6162_v46  ;;  %v6983_v21 = vld [vmem:[#allocation41_spill] sm:$0xff] }
 0xae4   :  { %4034 = vmatprep.subr.mxu0 %v6082_v32  ;;  %4105 = vmatprep.subr.mxu1 %v6168_v50  ;;  %v6984_v32 = vld [vmem:[#allocation48_spill] sm:$0xff] }
 0xae5   :  { %4035 = vmatpush1.msra.mxu0 %v6085_v10  ;;  %4106 = vmatpush1.msra.mxu1 %v6174_v54  ;;  %v6985_v10 = vld [vmem:[#allocation21_spill] sm:$0xff] }
 0xae6   :  { %4036 = vmatprep.subr.mxu0 %v6088_v30  ;;  %4107 = vmatprep.subr.mxu1 %v6180_v61  ;;  %v6986_v30 = vld [vmem:[#allocation63_spill] sm:$0xff] }
 0xae7   :  { %4037 = vmatpush1.msra.mxu0 %v6092_v33  ;;  %4108 = vmatpush1.msra.mxu1 %v6188_v3  ;;  %v6987_v33 = vld [vmem:[#allocation43_spill] sm:$0xff] }
 0xae8   :  { %4038 = vmatprep.subr.mxu0 %v6095_v35  ;;  %4109 = vmatprep.subr.mxu1 %v6192_v27  ;;  %v6988_v35 = vld [vmem:[#allocation50_spill] sm:$0xff] }
 0xae9   :  { %4039 = vmatpush1.msra.mxu0 %v6100_v34  ;;  %4110 = vmatpush1.msra.mxu1 %v6196_v29  ;;  %v6989_v34 = vld [vmem:[#allocation55_spill] sm:$0xff] }
 0xaea   :  { %4040 = vmatprep.subr.mxu0 %v6106_v24  ;;  %4111 = vmatprep.subr.mxu1 %v6200_v49  ;;  %v6991_v24 = vld [vmem:[#allocation44_spill] sm:$0xff] }
 0xaeb   :  { %4041 = vmatpush1.msra.mxu0 %v6112_v12  ;;  %4112 = vmatpush1.msra.mxu1 %v6203_v19  ;;  %v6993_v12 = vld [vmem:[#allocation52_spill] sm:$0xff]  ;;  %v4012_v19 = vrot.slane %v6415_v5, 7  ;;  %v4219_v5 = vld [vmem:[#allocation10 + $0x78] sm:$0xff] }
 0xaec   :  { %4042 = vmatprep.subr.mxu0 %v6118_v25  ;;  %4113 = vmatprep.subr.mxu1 %v6207_v7 }
 0xaed   :  { %4043 = vmatpush1.msra.mxu0 %v6124_v6  ;;  %4114 = vmatpush1.msra.mxu1 %v6211_v45 }
 0xaee   :  { %4044 = vmatprep.subr.mxu0 %v6130_v20  ;;  %4115 = vmatprep.subr.mxu1 %v6974_v2  ;;  %v4211_v2 = vld [vmem:[#allocation10 + $0x38] sm:$0xff] }
 0xaef   :  { %4045 = vmatpush1.msra.mxu0 %v6975_v39  ;;  %4116 = vmatpush1.msra.mxu1 %v6976_v18  ;;  %v4210_v39 = vld [vmem:[#allocation10 + $0x30] sm:$0xff]  ;;  %v4209_v18 = vld [vmem:[#allocation10 + $0x28] sm:$0xff] }
 0xaf0   :  { %4046 = vmatprep.subr.mxu0 %v6977_v57  ;;  %4117 = vmatprep.subr.mxu1 %v6978_v15  ;;  %v4208_v57 = vld [vmem:[#allocation10 + $0x20] sm:$0xff]  ;;  %v4207_v15 = vld [vmem:[#allocation10 + $0x18] sm:$0xff] }
 0xaf1   :  { %4047 = vmatpush1.msra.mxu0 %v6979_v9  ;;  %4118 = vmatpush1.msra.mxu1 %v6980_v4  ;;  %v4206_v9 = vld [vmem:[#allocation10 + $0x10] sm:$0xff]  ;;  %v4205_v4 = vld [vmem:[#allocation10 + $0x8] sm:$0xff] }
 0xaf2   :  { %4048 = vmatprep.subr.mxu0 %v6981_v51  ;;  %4119 = vmatprep.subr.mxu1 %v6982_v62  ;;  %v4204_v51 = vld [vmem:[#allocation10] sm:$0xff] }
 0xaf3   :  { %4049 = vmatpush1.msra.mxu0 %v6983_v21  ;;  %4120 = vmatpush1.msra.mxu1 %v6984_v32 }
 0xaf4   :  { %4050 = vmatprep.subr.mxu0 %v6985_v10  ;;  %4121 = vmatprep.subr.mxu1 %v6986_v30 }
 0xaf5   :  { %4051 = vmatpush1.msra.mxu0 %v6987_v33  ;;  %4122 = vmatpush1.msra.mxu1 %v6988_v35 }
 0xaf6   :  { %4052 = vmatprep.subr.mxu0 %v6989_v34  ;;  %4123 = vmatprep.subr.mxu1 %v6990_v26 }
 0xaf7   :  { %4053 = vmatpush1.msra.mxu0 %v6991_v24  ;;  %4086 = vmatprep.mubr.f32.mxu0 %v6992_v37 }
 0xaf8   :  { %4124 = vmatpush1.msra.mxu1 %v6993_v12  ;;  %4157 = vmatprep.mubr.f32.mxu1 %v6992_v37 }
 0xaf9   :  { %4363 = vmatprep.subr.mxu0 %v6992_v37 }
 0xb98   :  { %v3909_v43 = vpop.f32.mrf.mxu0  ;;  %v3980_v25 = vpop.f32.mrf.mxu1 }
 0xb99   :  { %v3989_v41 = vrot.slane %v3909_v43, 6  ;;  %v3991_v20 = vrot.slane %v3980_v25, 6 }
 0xb9a   :  { %v3911_v6 = vpop.f32.mrf.mxu0  ;;  %v3982_v42 = vpop.f32.mrf.mxu1 }
 0xb9b   :  { %v3997_v60 = vadd.f32 %v3989_v41, %v6972_v14  ;;  %v3990_v47 = vrot.slane %v3911_v6, 6  ;;  %v3999_v38 = vadd.f32 %v3991_v20, %v6329_v63  ;;  %v3992_v46 = vrot.slane %v3982_v42, 6 }
 0xb9d   :  { %4523 = vtanh.f32 %v3997_v60  ;;  %v3998_v11 = vadd.f32 %v3990_v47, %v6994_v1  ;;  %v4000_v50 = vadd.f32 %v3992_v46, %v6334_v36 }
 0xb9f   :  { %4525 = vtanh.f32 %v3998_v11 }
 0xba0   :  { %4527 = vtanh.f32 %v3999_v38 }
 0xba1   :  { %4529 = vtanh.f32 %v4000_v50 }
 0xbaa   :  { %v4524_v54 = vpop.eup %4523 }
 0xbab   :  { %v4005_v61 = vadd.f32 1.0, %v4524_v54 }
 0xbac   :  { %v4526_v3 = vpop.eup %4525 }
 0xbad   :  { %v4006_v27 = vmul.f32 0.5, %v4005_v61  ;;  %v4007_v29 = vadd.f32 1.0, %v4526_v3  ;;  %v4528_v7 = vpop.eup %4527  ;;  %v4345_v61 = vld [vmem:[%s6537_s11] ss:$0 sm:$0xff] }
 0xbae   :  { %v4530_v31 = vpop.eup %4529 }
 0xbaf   :  { %v4008_v49 = vmul.f32 0.5, %v4007_v29  ;;  %v4015_v58 = vmul.f32 %v4528_v7, %v4006_v27  ;;  %v4009_v17 = vadd.f32 1.0, %v4530_v31 }
 0xbb1   :  { %v4014_v45 = vmul.f32 %v4012_v19, %v4008_v49  ;;  %v4010_v48 = vmul.f32 0.5, %v4009_v17 }
 0xbb3   :  { %v6491_v59 = vadd.f32 %v4015_v58, %v4014_v45 }
 0xbb5   :  { %4531 = vtanh.f32 %v6491_v59  ;;  %v4191_v20 = vrot.slane %v6491_v59, 7 }
 0xbc2   :  { %v4532_v0 = vpop.eup %4531 }
 0xbc3   :  { %v4018_v53 = vmul.f32 %v4532_v0, %v4010_v48 }
 0xbc5   :  { %v4020_v8 = vrot.slane %v4018_v53, 2  ;;  %v6496_v56 = vsel %vm4200_vm5, %v4199_v23, %v4018_v53 }
 0xbc7   :  { %4087 = vmatmul.mubr.f32.vlgmr.msra.gmra.mxu0 %v4020_v8  ;;  %4158 = vmatmul.mubr.f32.vlgmr.msra.gmra.mxu1 %v4020_v8 }
 0xbc8   :  { %4364 = vmatpush3.msra.mxu0 %v4219_v5  ;;  %4395 = vmatprep.mubr.msk.f32.mxu0 %vm4746_vm6, %v6992_v37 }
 0xbc9   :  { %4365 = vmatprep.subr.mxu0 %v6992_v37 }
 0xbca   :  { %4366 = vmatpush3.msra.mxu0 %v4218_v44 }
 0xbcb   :  { %4367 = vmatprep.subr.mxu0 %v6992_v37 }
 0xbcc   :  { %4368 = vmatpush3.msra.mxu0 %v4217_v28 }
 0xbcd   :  { %4369 = vmatprep.subr.mxu0 %v6992_v37 }
 0xbce   :  { %4370 = vmatpush3.msra.mxu0 %v4216_v40 }
 0xbcf   :  { %4371 = vmatprep.subr.mxu0 %v6992_v37 }
 0xbd0   :  { %4372 = vmatpush3.msra.mxu0 %v4215_v16 }
 0xbd1   :  { %4373 = vmatprep.subr.mxu0 %v6992_v37 }
 0xbd2   :  { %4374 = vmatpush3.msra.mxu0 %v4214_v13 }
 0xbd3   :  { %4375 = vmatprep.subr.mxu0 %v6992_v37 }
 0xbd4   :  { %4376 = vmatpush3.msra.mxu0 %v4213_v55 }
 0xbd5   :  { %4377 = vmatprep.subr.mxu0 %v6992_v37 }
 0xbd6   :  { %4378 = vmatpush3.msra.mxu0 %v4212_v22 }
 0xbd7   :  { %4379 = vmatprep.subr.mxu0 %v6992_v37 }
 0xbd8   :  { %4380 = vmatpush3.msra.mxu0 %v4211_v2 }
 0xbd9   :  { %4381 = vmatprep.subr.mxu0 %v6992_v37 }
 0xbda   :  { %4382 = vmatpush3.msra.mxu0 %v4210_v39 }
 0xbdb   :  { %4383 = vmatprep.subr.mxu0 %v6992_v37 }
 0xbdc   :  { %4384 = vmatpush3.msra.mxu0 %v4209_v18 }
 0xbdd   :  { %4385 = vmatprep.subr.mxu0 %v6992_v37 }
 0xbde   :  { %4386 = vmatpush3.msra.mxu0 %v4208_v57 }
 0xbdf   :  { %4387 = vmatprep.subr.mxu0 %v6992_v37 }
 0xbe0   :  { %4388 = vmatpush3.msra.mxu0 %v4207_v15 }
 0xbe1   :  { %4389 = vmatprep.subr.mxu0 %v6992_v37 }
 0xbe2   :  { %4390 = vmatpush3.msra.mxu0 %v4206_v9 }
 0xbe3   :  { %4391 = vmatprep.subr.mxu0 %v6992_v37 }
 0xbe4   :  { %4392 = vmatpush3.msra.mxu0 %v4205_v4 }
 0xbe5   :  { %4393 = vmatprep.subr.mxu0 %v6992_v37 }
 0xbe6   :  { %4394 = vmatpush3.msra.mxu0 %v4204_v51 }
 0xc87   :  { %v4088_v62 = vpop.f32.mrf.mxu0  ;;  %v4159_v21 = vpop.f32.mrf.mxu1 }
 0xc88   :  { %v4168_v32 = vrot.slane %v4088_v62, 5  ;;  %v4170_v33 = vrot.slane %v4159_v21, 5 }
 0xc89   :  { %v4090_v10 = vpop.f32.mrf.mxu0  ;;  %v4161_v24 = vpop.f32.mrf.mxu1 }
 0xc8a   :  { %v4176_v30 = vadd.f32 %v4168_v32, %v6972_v14  ;;  %v4169_v35 = vrot.slane %v4090_v10, 5  ;;  %v4178_v26 = vadd.f32 %v4170_v33, %v6329_v63  ;;  %v4171_v12 = vrot.slane %v4161_v24, 5 }
 0xc8c   :  { %4533 = vtanh.f32 %v4176_v30  ;;  %v4177_v34 = vadd.f32 %v4169_v35, %v6994_v1  ;;  %v4179_v37 = vadd.f32 %v4171_v12, %v6334_v36 }
 0xc8e   :  { %4535 = vtanh.f32 %v4177_v34 }
 0xc8f   :  { %4537 = vtanh.f32 %v4178_v26 }
 0xc90   :  { %4539 = vtanh.f32 %v4179_v37 }
 0xc99   :  { %v4534_v43 = vpop.eup %4533 }
 0xc9a   :  { %v4184_v25 = vadd.f32 1.0, %v4534_v43 }
 0xc9b   :  { %v4536_v41 = vpop.eup %4535 }
 0xc9c   :  { %v4185_v6 = vmul.f32 0.5, %v4184_v25  ;;  %v4186_v60 = vadd.f32 1.0, %v4536_v41  ;;  %v4538_v47 = vpop.eup %4537 }
 0xc9d   :  { %v4540_v63 = vpop.eup %4539 }
 0xc9e   :  { %v4187_v14 = vmul.f32 0.5, %v4186_v60  ;;  %v4194_v1 = vmul.f32 %v4538_v47, %v4185_v6  ;;  %v4188_v42 = vadd.f32 1.0, %v4540_v63 }
 0xca0   :  { %v4193_v11 = vmul.f32 %v4191_v20, %v4187_v14  ;;  %v4189_v46 = vmul.f32 0.5, %v4188_v42 }
 0xca2   :  { %v4195_v38 = vadd.f32 %v4194_v1, %v4193_v11 }
 0xca4   :  { %4541 = vtanh.f32 %v4195_v38 }
 0xcb1   :  { %v4542_v50 = vpop.eup %4541 }
 0xcb2   :  { %v4197_v36 = vmul.f32 %v4542_v50, %v4189_v46 }
 0xcb4   :  { %v4203_v54 = vsel %vm4202_vm7, %v6496_v56, %v4197_v36 }
 0xcb5   :  { %4396 = vmatmul.mubr.f32.vlgmr.msra.gmra.mxu0 %v4203_v54 }
 0xd75   :  { %v4293_v3 = vpop.f32.mrf.mxu0 }
 0xd76   :  { %v4294_v27 = vadd.f32 %v4345_v61, %v4293_v3 }
 0xd77   :  { %v4397_v29 = vpop.f32.mrf.mxu0 }
 0xd78   :  { %4297 = vst [vmem:[#allocation11] sm:$0xf] %v4294_v27 }
 0xd79   :  { %4718 = shalt.err (!%p4715_p1)
}
 0xd7a   :  { %4307 = dma.vmem_to_hbm [thread:$0]  %s4305_s17, 64, %s6538_s12, [#allocation4]  }
 0xd7b   :  { %4733 = dma.done.wait [#allocation4], 64  }
 0xd7c   :  { %4734 = vsyncadd [#allocation4], 4294967232 }
 0xd7d   :  { %4311 = vsyncpa [#allocation3], 1 }
 0xd7e   :  { %4312 = vsyncpa [#allocation6], 1 }
 0xd7f   :  { %4313 = vsyncpa [#allocation9], 1 }
 0xd80   :  { %4314 = vsyncpa [#allocation4], 1 }

</bundles_post_ra>
